<compile_context>
chip_gen: v5e
topology: v5e:2x2
jax: 0.10.0
libtpu: 0.0.40
codegen_flags: <defaults>
</compile_context>

<pallas_src>
import functools

import numpy as np

import jax
import jax.numpy as jnp
from jax.experimental import pallas as pl
from jax.experimental.pallas import tpu as pltpu


# ----------------------------------------------------------------------------
# Host-side constants
# ----------------------------------------------------------------------------
@functools.lru_cache(maxsize=None)
def _upsample2_matrix_np(n: int) -> np.ndarray:
    """(2n, n) interpolation matrix matching PyTorch linear upsampling,
    scale_factor=2, align_corners=False (half-pixel centers, edge clamp).
    Computed once on the host with numpy (no device-side scatters)."""
    out = 2 * n
    j = np.arange(out, dtype=np.float64)
    src = np.maximum((j + 0.5) * 0.5 - 0.5, 0.0)       # half-pixel, clamp >= 0
    i0 = np.clip(np.floor(src).astype(np.int64), 0, n - 1)
    i1 = np.minimum(i0 + 1, n - 1)
    lam = src - i0
    m = np.zeros((out, n), dtype=np.float64)
    rows = np.arange(out)
    m[rows, i0] += 1.0 - lam
    m[rows, i1] += lam
    return m.astype(np.float32)


def _vmem_capacity_bytes() -> int:
    """Per-core VMEM capacity; conservative 64 MiB (v7x) fallback."""
    try:
        info = pltpu.get_tpu_info()
        cap = getattr(info, "vmem_capacity_bytes", None)
        if cap:
            return int(cap)
    except Exception:
        pass
    return 64 * 1024 * 1024


def _pick_d_tile(D: int, H: int, W: int, in_itemsize: int, out_itemsize: int,
                 budget_bytes: int, max_tile_elems: int = 256 * 1024,
                 max_td: int = 64) -> int:
    """Largest divisor TD of D whose full VMEM footprint fits the budget.

    Footprint model (per review): 2x resident full-D input block (double
    buffered) + 2x (2*TD, 2H, 2W) output tile + ~14 tile-sized f32 temporaries
    (cur/prev/nxt, D-lerped slabs, flattened W-matmul operand/result)."""
    in_block = 2 * D * H * W * in_itemsize
    best = 1
    for td in range(1, min(D, max_td) + 1):
        if D % td:
            continue
        if td * H * W > max_tile_elems:
            break
        out_tile = 2 * (2 * td) * (2 * H) * (2 * W) * out_itemsize
        temps = 14 * td * H * W * 4
        if in_block + out_tile + temps <= budget_bytes:
            best = td
    return best


# ----------------------------------------------------------------------------
# Kernel + wrapper
# ----------------------------------------------------------------------------
def interpolate_trilinear_x2(x: jnp.ndarray, *, d_tile: int | None = None,
                             out_dtype=None,
                             precision=jax.lax.Precision.HIGHEST) -> jnp.ndarray:
    """x: (N, C, D, H, W) -> (N, C, 2D, 2H, 2W); matches
    F.interpolate(x, scale_factor=2, mode='trilinear', align_corners=False)."""
    N, C, D, H, W = x.shape
    B = N * C
    out_dtype = x.dtype if out_dtype is None else out_dtype
    xb = x.reshape(B, D, H, W)

    mwt = jnp.asarray(_upsample2_matrix_np(W).T)        # (W, 2W)
    mh = jnp.asarray(_upsample2_matrix_np(H))           # (2H, H)

    vmem_cap = _vmem_capacity_bytes()
    # ~48 MiB on v7x (64 MiB physical), ~96 MiB on v5e/v6e (128 MiB physical).
    vmem_limit = max(32 * 1024 * 1024,
                     min(int(0.75 * vmem_cap), 96 * 1024 * 1024))

    in_itemsize = jnp.dtype(x.dtype).itemsize
    out_itemsize = jnp.dtype(out_dtype).itemsize
    if d_tile is None:
        TD = _pick_d_tile(D, H, W, in_itemsize, out_itemsize,
                          budget_bytes=int(0.8 * vmem_limit))
    else:
        TD = d_tile
    assert D % TD == 0, (D, TD)
    nd = D // TD

    def kernel(x_ref, mwt_ref, mh_ref, o_ref):
        # x_ref  : (1, D, H, W)       full-depth input, resident across d tiles
        # mwt_ref: (W, 2W)            W-axis upsample matrix (transposed)
        # mh_ref : (2H, H)            H-axis upsample matrix
        # o_ref  : (1, 2*TD, 2H, 2W)  output depth tile
        base = pl.program_id(1) * TD                    # first input-D row

        # ---- D axis: scale-2 lerp on raw rows.  Only the two 1-row halos are
        # re-read from x_ref; the TD-1 overlapping rows reuse `cur` (vld relief).
        cur = x_ref[0, pl.ds(base, TD), :, :].astype(jnp.float32)
        prev_halo = x_ref[0, pl.ds(jnp.maximum(base - 1, 0), 1), :, :].astype(
            jnp.float32)
        next_halo = x_ref[0, pl.ds(jnp.minimum(base + TD, D - 1), 1), :, :].astype(
            jnp.float32)
        if TD > 1:
            prev = jnp.concatenate([prev_halo, cur[:TD - 1]], axis=0)
            nxt = jnp.concatenate([cur[1:], next_halo], axis=0)
        else:
            prev = prev_halo
            nxt = next_halo

        # out[2k] = 0.75*x[k] + 0.25*x[k-1] ; out[2k+1] = 0.75*x[k] + 0.25*x[k+1]
        d_even = 0.75 * cur + 0.25 * prev
        d_odd = 0.75 * cur + 0.25 * nxt
        # stack on a major dim + major-dim merge: free (no sublane/lane shuffle)
        z = jnp.stack([d_even, d_odd], axis=1).reshape(2 * TD, H, W)

        # ---- W axis: ONE flattened MXU matmul over the lane dimension.
        y = jnp.dot(z.reshape(2 * TD * H, W), mwt_ref[...],
                    preferred_element_type=jnp.float32, precision=precision)
        y = y.reshape(2 * TD, H, 2 * W)

        # ---- H axis on the MXU: (2H,H)@(H,2W) per depth slice, producing
        # already-interleaved rows (no XLU sublane shuffle), stored directly
        # into o_ref (no full-tile temporary / extra VMEM copy).
        mh_v = mh_ref[...]
        for dd in range(2 * TD):                        # static unrolled loop
            o_ref[0, dd] = jnp.dot(
                mh_v, y[dd], preferred_element_type=jnp.float32,
                precision=precision).astype(o_ref.dtype)

    # 8:1 write-amplified, HBM-bandwidth-bound op; tell XLA the truth.
    flops = int(B * D * H * W * (8 * W + 8 * H + 8))
    bytes_accessed = int(B * D * H * W * (in_itemsize + 8 * out_itemsize)
                         + 4 * (2 * W * W + 2 * H * H))

    out = pl.pallas_call(
        kernel,
        out_shape=jax.ShapeDtypeStruct((B, 2 * D, 2 * H, 2 * W), out_dtype),
        grid_spec=pltpu.PrefetchScalarGridSpec(
            num_scalar_prefetch=0,
            grid=(B, nd),
            in_specs=[
                # Full-D volume; index_map ignores the D-tile index so the
                # block stays resident (read once per channel from HBM).
                pl.BlockSpec((1, D, H, W), lambda b, d: (b, 0, 0, 0)),
                pl.BlockSpec((W, 2 * W), lambda b, d: (0, 0)),
                pl.BlockSpec((2 * H, H), lambda b, d: (0, 0)),
            ],
            out_specs=pl.BlockSpec((1, 2 * TD, 2 * H, 2 * W),
                                   lambda b, d: (b, d, 0, 0)),
        ),
        compiler_params=pltpu.CompilerParams(
            # Only the B axis is sharded across TensorCores (v7x megacore),
            # so each core keeps the resident-input amortization.
            dimension_semantics=("parallel", "arbitrary"),
            vmem_limit_bytes=vmem_limit),
        cost_estimate=pl.CostEstimate(flops=flops, transcendentals=0,
                                      bytes_accessed=bytes_accessed),
    )(xb, mwt, mh)
    return out.reshape(N, C, 2 * D, 2 * H, 2 * W)


# ----------------------------------------------------------------------------
# Self-test
# ----------------------------------------------------------------------------
if __name__ == "__main__":
    key = jax.random.PRNGKey(0)
    N, C, D, H, W = 2, 3, 8, 16, 8
    x = jax.random.normal(key, (N, C, D, H, W), dtype=jnp.float32)

    # Pure-JAX reference using the same closed-form interpolation matrices.
    md = jnp.asarray(_upsample2_matrix_np(D))
    mh = jnp.asarray(_upsample2_matrix_np(H))
    mw = jnp.asarray(_upsample2_matrix_np(W))
    ref = jnp.einsum('Dd,Hh,Ww,ncdhw->ncDHW', md, mh, mw, x,
                     precision=jax.lax.Precision.HIGHEST)

    # Default tiling (single D tile for this small shape).
    y = jax.block_until_ready(interpolate_trilinear_x2(x))
    assert y.shape == (N, C, 2 * D, 2 * H, 2 * W), y.shape
    assert jnp.allclose(y, ref, atol=1e-4, rtol=1e-4), float(
        jnp.max(jnp.abs(y - ref)))

    # Explicitly exercise the multi-D-tile path (nd > 1, halo reuse from cur).
    y2 = jax.block_until_ready(interpolate_trilinear_x2(x, d_tile=2))
    assert jnp.allclose(y2, ref, atol=1e-4, rtol=1e-4), float(
        jnp.max(jnp.abs(y2 - ref)))

    print("KERNEL_OK")
</pallas_src>

<mosaic_0001>
module attributes {stable_mosaic.version = 11 : i64} {
  func.func @kernel(%arg0: i32, %arg1: i32, %arg2: memref<1x8x16x8xf32, #tpu.memory_space<vmem>>, %arg3: memref<8x16xf32, #tpu.memory_space<vmem>>, %arg4: memref<32x16xf32, #tpu.memory_space<vmem>>, %arg5: memref<1x16x32x16xf32, #tpu.memory_space<vmem>>) attributes {dimension_semantics = [#tpu.dimension_semantics<parallel>, #tpu.dimension_semantics<arbitrary>], iteration_bounds = array<i64: 6, 1>, scalar_prefetch = 0 : i64, scratch_operands = 0 : i64, tpu.core_type = #tpu.core_type<tc>, window_params = [{transform_indices = @transform_0, window_bounds = array<i64: 1, 8, 16, 8>}, {pipeline_mode = #tpu.pipeline_mode<synchronous>, transform_indices = @transform_1, window_bounds = array<i64: 8, 16>}, {pipeline_mode = #tpu.pipeline_mode<synchronous>, transform_indices = @transform_2, window_bounds = array<i64: 32, 16>}, {transform_indices = @transform_3, window_bounds = array<i64: 1, 16, 32, 16>}]} {
    %c8_i32 = arith.constant 8 : i32
    %0 = arith.muli %arg1, %c8_i32 : i32
    %c0 = arith.constant 0 : index
    %1 = arith.index_cast %0 : i32 to index
    %c0_0 = arith.constant 0 : index
    %c0_1 = arith.constant 0 : index
    %2 = vector.load %arg2[%c0, %1, %c0_0, %c0_1] : memref<1x8x16x8xf32, #tpu.memory_space<vmem>>, vector<1x8x16x8xf32>
    %3 = vector.shape_cast %2 : vector<1x8x16x8xf32> to vector<8x16x8xf32>
    %c1_i32 = arith.constant 1 : i32
    %4 = arith.subi %0, %c1_i32 : i32
    %c0_i32 = arith.constant 0 : i32
    %5 = arith.maxsi %4, %c0_i32 : i32
    %c0_2 = arith.constant 0 : index
    %6 = arith.index_cast %5 : i32 to index
    %c0_3 = arith.constant 0 : index
    %c0_4 = arith.constant 0 : index
    %7 = vector.load %arg2[%c0_2, %6, %c0_3, %c0_4] : memref<1x8x16x8xf32, #tpu.memory_space<vmem>>, vector<1x1x16x8xf32>
    %8 = vector.shape_cast %7 : vector<1x1x16x8xf32> to vector<1x16x8xf32>
    %c8_i32_5 = arith.constant 8 : i32
    %9 = arith.addi %0, %c8_i32_5 : i32
    %c7_i32 = arith.constant 7 : i32
    %10 = arith.minsi %9, %c7_i32 : i32
    %c0_6 = arith.constant 0 : index
    %11 = arith.index_cast %10 : i32 to index
    %c0_7 = arith.constant 0 : index
    %c0_8 = arith.constant 0 : index
    %12 = vector.load %arg2[%c0_6, %11, %c0_7, %c0_8] : memref<1x8x16x8xf32, #tpu.memory_space<vmem>>, vector<1x1x16x8xf32>
    %13 = vector.shape_cast %12 : vector<1x1x16x8xf32> to vector<1x16x8xf32>
    %14 = vector.extract_strided_slice %3 {offsets = [0, 0, 0], sizes = [7, 16, 8], strides = [1, 1, 1]} : vector<8x16x8xf32> to vector<7x16x8xf32>
    %15 = tpu.concatenate %8, %14 in 0 : vector<1x16x8xf32>, vector<7x16x8xf32> -> vector<8x16x8xf32>
    %16 = vector.extract_strided_slice %3 {offsets = [1, 0, 0], sizes = [7, 16, 8], strides = [1, 1, 1]} : vector<8x16x8xf32> to vector<7x16x8xf32>
    %17 = tpu.concatenate %16, %13 in 0 : vector<7x16x8xf32>, vector<1x16x8xf32> -> vector<8x16x8xf32>
    %cst = arith.constant 7.500000e-01 : f32
    %18 = vector.broadcast %cst : f32 to vector<8x16x8xf32>
    %19 = arith.mulf %18, %3 : vector<8x16x8xf32>
    %cst_9 = arith.constant 2.500000e-01 : f32
    %20 = vector.broadcast %cst_9 : f32 to vector<8x16x8xf32>
    %21 = arith.mulf %20, %15 : vector<8x16x8xf32>
    %22 = arith.addf %19, %21 : vector<8x16x8xf32>
    %cst_10 = arith.constant 7.500000e-01 : f32
    %23 = vector.broadcast %cst_10 : f32 to vector<8x16x8xf32>
    %24 = arith.mulf %23, %3 : vector<8x16x8xf32>
    %cst_11 = arith.constant 2.500000e-01 : f32
    %25 = vector.broadcast %cst_11 : f32 to vector<8x16x8xf32>
    %26 = arith.mulf %25, %17 : vector<8x16x8xf32>
    %27 = arith.addf %24, %26 : vector<8x16x8xf32>
    %28 = vector.shape_cast %22 : vector<8x16x8xf32> to vector<8x1x16x8xf32>
    %29 = vector.shape_cast %27 : vector<8x16x8xf32> to vector<8x1x16x8xf32>
    %30 = tpu.concatenate %28, %29 in 1 : vector<8x1x16x8xf32>, vector<8x1x16x8xf32> -> vector<8x2x16x8xf32>
    %31 = vector.shape_cast %30 : vector<8x2x16x8xf32> to vector<16x16x8xf32>
    %32 = vector.shape_cast %31 : vector<16x16x8xf32> to vector<256x8xf32>
    %c0_12 = arith.constant 0 : index
    %c0_13 = arith.constant 0 : index
    %33 = vector.load %arg3[%c0_12, %c0_13] : memref<8x16xf32, #tpu.memory_space<vmem>>, vector<8x16xf32>
    %cst_14 = arith.constant dense<0.000000e+00> : vector<256x16xf32>
    %34 = tpu.matmul %32, %33, %cst_14 {dimension_numbers = #tpu.dot_dimension_numbers<[1], [0], [0], [1], [0, 0, 1, 1], [], []>, precision = #tpu.contract_precision<fp32>} : vector<256x8xf32>, vector<8x16xf32>, vector<256x16xf32> -> vector<256x16xf32>
    %35 = vector.shape_cast %34 : vector<256x16xf32> to vector<16x16x16xf32>
    %c0_15 = arith.constant 0 : index
    %c0_16 = arith.constant 0 : index
    %36 = vector.load %arg4[%c0_15, %c0_16] : memref<32x16xf32, #tpu.memory_space<vmem>>, vector<32x16xf32>
    %37 = vector.extract_strided_slice %35 {offsets = [0, 0, 0], sizes = [1, 16, 16], strides = [1, 1, 1]} : vector<16x16x16xf32> to vector<1x16x16xf32>
    %38 = vector.shape_cast %37 : vector<1x16x16xf32> to vector<16x16xf32>
    %cst_17 = arith.constant dense<0.000000e+00> : vector<32x16xf32>
    %39 = tpu.matmul %36, %38, %cst_17 {dimension_numbers = #tpu.dot_dimension_numbers<[1], [0], [0], [1], [0, 0, 1, 1], [], []>, precision = #tpu.contract_precision<fp32>} : vector<32x16xf32>, vector<16x16xf32>, vector<32x16xf32> -> vector<32x16xf32>
    %c0_18 = arith.constant 0 : index
    %c0_19 = arith.constant 0 : index
    %c0_20 = arith.constant 0 : index
    %c0_21 = arith.constant 0 : index
    %40 = vector.load %arg5[%c0_18, %c0_19, %c0_20, %c0_21] : memref<1x16x32x16xf32, #tpu.memory_space<vmem>>, vector<1x1x32x16xf32>
    %41 = vector.shape_cast %40 : vector<1x1x32x16xf32> to vector<32x16xf32>
    %42 = vector.shape_cast %39 : vector<32x16xf32> to vector<1x1x32x16xf32>
    tpu.vector_store %arg5[%c0_18, %c0_19, %c0_20, %c0_21], %42 {strides = array<i32>} : memref<1x16x32x16xf32, #tpu.memory_space<vmem>>, vector<1x1x32x16xf32>,
    %43 = vector.extract_strided_slice %35 {offsets = [1, 0, 0], sizes = [1, 16, 16], strides = [1, 1, 1]} : vector<16x16x16xf32> to vector<1x16x16xf32>
    %44 = vector.shape_cast %43 : vector<1x16x16xf32> to vector<16x16xf32>
    %cst_22 = arith.constant dense<0.000000e+00> : vector<32x16xf32>
    %45 = tpu.matmul %36, %44, %cst_22 {dimension_numbers = #tpu.dot_dimension_numbers<[1], [0], [0], [1], [0, 0, 1, 1], [], []>, precision = #tpu.contract_precision<fp32>} : vector<32x16xf32>, vector<16x16xf32>, vector<32x16xf32> -> vector<32x16xf32>
    %c0_23 = arith.constant 0 : index
    %c1 = arith.constant 1 : index
    %c0_24 = arith.constant 0 : index
    %c0_25 = arith.constant 0 : index
    %46 = vector.load %arg5[%c0_23, %c1, %c0_24, %c0_25] : memref<1x16x32x16xf32, #tpu.memory_space<vmem>>, vector<1x1x32x16xf32>
    %47 = vector.shape_cast %46 : vector<1x1x32x16xf32> to vector<32x16xf32>
    %48 = vector.shape_cast %45 : vector<32x16xf32> to vector<1x1x32x16xf32>
    tpu.vector_store %arg5[%c0_23, %c1, %c0_24, %c0_25], %48 {strides = array<i32>} : memref<1x16x32x16xf32, #tpu.memory_space<vmem>>, vector<1x1x32x16xf32>,
    %49 = vector.extract_strided_slice %35 {offsets = [2, 0, 0], sizes = [1, 16, 16], strides = [1, 1, 1]} : vector<16x16x16xf32> to vector<1x16x16xf32>
    %50 = vector.shape_cast %49 : vector<1x16x16xf32> to vector<16x16xf32>
    %cst_26 = arith.constant dense<0.000000e+00> : vector<32x16xf32>
    %51 = tpu.matmul %36, %50, %cst_26 {dimension_numbers = #tpu.dot_dimension_numbers<[1], [0], [0], [1], [0, 0, 1, 1], [], []>, precision = #tpu.contract_precision<fp32>} : vector<32x16xf32>, vector<16x16xf32>, vector<32x16xf32> -> vector<32x16xf32>
    %c0_27 = arith.constant 0 : index
    %c2 = arith.constant 2 : index
    %c0_28 = arith.constant 0 : index
    %c0_29 = arith.constant 0 : index
    %52 = vector.load %arg5[%c0_27, %c2, %c0_28, %c0_29] : memref<1x16x32x16xf32, #tpu.memory_space<vmem>>, vector<1x1x32x16xf32>
    %53 = vector.shape_cast %52 : vector<1x1x32x16xf32> to vector<32x16xf32>
    %54 = vector.shape_cast %51 : vector<32x16xf32> to vector<1x1x32x16xf32>
    tpu.vector_store %arg5[%c0_27, %c2, %c0_28, %c0_29], %54 {strides = array<i32>} : memref<1x16x32x16xf32, #tpu.memory_space<vmem>>, vector<1x1x32x16xf32>,
    %55 = vector.extract_strided_slice %35 {offsets = [3, 0, 0], sizes = [1, 16, 16], strides = [1, 1, 1]} : vector<16x16x16xf32> to vector<1x16x16xf32>
    %56 = vector.shape_cast %55 : vector<1x16x16xf32> to vector<16x16xf32>
    %cst_30 = arith.constant dense<0.000000e+00> : vector<32x16xf32>
    %57 = tpu.matmul %36, %56, %cst_30 {dimension_numbers = #tpu.dot_dimension_numbers<[1], [0], [0], [1], [0, 0, 1, 1], [], []>, precision = #tpu.contract_precision<fp32>} : vector<32x16xf32>, vector<16x16xf32>, vector<32x16xf32> -> vector<32x16xf32>
    %c0_31 = arith.constant 0 : index
    %c3 = arith.constant 3 : index
    %c0_32 = arith.constant 0 : index
    %c0_33 = arith.constant 0 : index
    %58 = vector.load %arg5[%c0_31, %c3, %c0_32, %c0_33] : memref<1x16x32x16xf32, #tpu.memory_space<vmem>>, vector<1x1x32x16xf32>
    %59 = vector.shape_cast %58 : vector<1x1x32x16xf32> to vector<32x16xf32>
    %60 = vector.shape_cast %57 : vector<32x16xf32> to vector<1x1x32x16xf32>
    tpu.vector_store %arg5[%c0_31, %c3, %c0_32, %c0_33], %60 {strides = array<i32>} : memref<1x16x32x16xf32, #tpu.memory_space<vmem>>, vector<1x1x32x16xf32>,
    %61 = vector.extract_strided_slice %35 {offsets = [4, 0, 0], sizes = [1, 16, 16], strides = [1, 1, 1]} : vector<16x16x16xf32> to vector<1x16x16xf32>
    %62 = vector.shape_cast %61 : vector<1x16x16xf32> to vector<16x16xf32>
    %cst_34 = arith.constant dense<0.000000e+00> : vector<32x16xf32>
    %63 = tpu.matmul %36, %62, %cst_34 {dimension_numbers = #tpu.dot_dimension_numbers<[1], [0], [0], [1], [0, 0, 1, 1], [], []>, precision = #tpu.contract_precision<fp32>} : vector<32x16xf32>, vector<16x16xf32>, vector<32x16xf32> -> vector<32x16xf32>
    %c0_35 = arith.constant 0 : index
    %c4 = arith.constant 4 : index
    %c0_36 = arith.constant 0 : index
    %c0_37 = arith.constant 0 : index
    %64 = vector.load %arg5[%c0_35, %c4, %c0_36, %c0_37] : memref<1x16x32x16xf32, #tpu.memory_space<vmem>>, vector<1x1x32x16xf32>
    %65 = vector.shape_cast %64 : vector<1x1x32x16xf32> to vector<32x16xf32>
    %66 = vector.shape_cast %63 : vector<32x16xf32> to vector<1x1x32x16xf32>
    tpu.vector_store %arg5[%c0_35, %c4, %c0_36, %c0_37], %66 {strides = array<i32>} : memref<1x16x32x16xf32, #tpu.memory_space<vmem>>, vector<1x1x32x16xf32>,
    %67 = vector.extract_strided_slice %35 {offsets = [5, 0, 0], sizes = [1, 16, 16], strides = [1, 1, 1]} : vector<16x16x16xf32> to vector<1x16x16xf32>
    %68 = vector.shape_cast %67 : vector<1x16x16xf32> to vector<16x16xf32>
    %cst_38 = arith.constant dense<0.000000e+00> : vector<32x16xf32>
    %69 = tpu.matmul %36, %68, %cst_38 {dimension_numbers = #tpu.dot_dimension_numbers<[1], [0], [0], [1], [0, 0, 1, 1], [], []>, precision = #tpu.contract_precision<fp32>} : vector<32x16xf32>, vector<16x16xf32>, vector<32x16xf32> -> vector<32x16xf32>
    %c0_39 = arith.constant 0 : index
    %c5 = arith.constant 5 : index
    %c0_40 = arith.constant 0 : index
    %c0_41 = arith.constant 0 : index
    %70 = vector.load %arg5[%c0_39, %c5, %c0_40, %c0_41] : memref<1x16x32x16xf32, #tpu.memory_space<vmem>>, vector<1x1x32x16xf32>
    %71 = vector.shape_cast %70 : vector<1x1x32x16xf32> to vector<32x16xf32>
    %72 = vector.shape_cast %69 : vector<32x16xf32> to vector<1x1x32x16xf32>
    tpu.vector_store %arg5[%c0_39, %c5, %c0_40, %c0_41], %72 {strides = array<i32>} : memref<1x16x32x16xf32, #tpu.memory_space<vmem>>, vector<1x1x32x16xf32>,
    %73 = vector.extract_strided_slice %35 {offsets = [6, 0, 0], sizes = [1, 16, 16], strides = [1, 1, 1]} : vector<16x16x16xf32> to vector<1x16x16xf32>
    %74 = vector.shape_cast %73 : vector<1x16x16xf32> to vector<16x16xf32>
    %cst_42 = arith.constant dense<0.000000e+00> : vector<32x16xf32>
    %75 = tpu.matmul %36, %74, %cst_42 {dimension_numbers = #tpu.dot_dimension_numbers<[1], [0], [0], [1], [0, 0, 1, 1], [], []>, precision = #tpu.contract_precision<fp32>} : vector<32x16xf32>, vector<16x16xf32>, vector<32x16xf32> -> vector<32x16xf32>
    %c0_43 = arith.constant 0 : index
    %c6 = arith.constant 6 : index
    %c0_44 = arith.constant 0 : index
    %c0_45 = arith.constant 0 : index
    %76 = vector.load %arg5[%c0_43, %c6, %c0_44, %c0_45] : memref<1x16x32x16xf32, #tpu.memory_space<vmem>>, vector<1x1x32x16xf32>
    %77 = vector.shape_cast %76 : vector<1x1x32x16xf32> to vector<32x16xf32>
    %78 = vector.shape_cast %75 : vector<32x16xf32> to vector<1x1x32x16xf32>
    tpu.vector_store %arg5[%c0_43, %c6, %c0_44, %c0_45], %78 {strides = array<i32>} : memref<1x16x32x16xf32, #tpu.memory_space<vmem>>, vector<1x1x32x16xf32>,
    %79 = vector.extract_strided_slice %35 {offsets = [7, 0, 0], sizes = [1, 16, 16], strides = [1, 1, 1]} : vector<16x16x16xf32> to vector<1x16x16xf32>
    %80 = vector.shape_cast %79 : vector<1x16x16xf32> to vector<16x16xf32>
    %cst_46 = arith.constant dense<0.000000e+00> : vector<32x16xf32>
    %81 = tpu.matmul %36, %80, %cst_46 {dimension_numbers = #tpu.dot_dimension_numbers<[1], [0], [0], [1], [0, 0, 1, 1], [], []>, precision = #tpu.contract_precision<fp32>} : vector<32x16xf32>, vector<16x16xf32>, vector<32x16xf32> -> vector<32x16xf32>
    %c0_47 = arith.constant 0 : index
    %c7 = arith.constant 7 : index
    %c0_48 = arith.constant 0 : index
    %c0_49 = arith.constant 0 : index
    %82 = vector.load %arg5[%c0_47, %c7, %c0_48, %c0_49] : memref<1x16x32x16xf32, #tpu.memory_space<vmem>>, vector<1x1x32x16xf32>
    %83 = vector.shape_cast %82 : vector<1x1x32x16xf32> to vector<32x16xf32>
    %84 = vector.shape_cast %81 : vector<32x16xf32> to vector<1x1x32x16xf32>
    tpu.vector_store %arg5[%c0_47, %c7, %c0_48, %c0_49], %84 {strides = array<i32>} : memref<1x16x32x16xf32, #tpu.memory_space<vmem>>, vector<1x1x32x16xf32>,
    %85 = vector.extract_strided_slice %35 {offsets = [8, 0, 0], sizes = [1, 16, 16], strides = [1, 1, 1]} : vector<16x16x16xf32> to vector<1x16x16xf32>
    %86 = vector.shape_cast %85 : vector<1x16x16xf32> to vector<16x16xf32>
    %cst_50 = arith.constant dense<0.000000e+00> : vector<32x16xf32>
    %87 = tpu.matmul %36, %86, %cst_50 {dimension_numbers = #tpu.dot_dimension_numbers<[1], [0], [0], [1], [0, 0, 1, 1], [], []>, precision = #tpu.contract_precision<fp32>} : vector<32x16xf32>, vector<16x16xf32>, vector<32x16xf32> -> vector<32x16xf32>
    %c0_51 = arith.constant 0 : index
    %c8 = arith.constant 8 : index
    %c0_52 = arith.constant 0 : index
    %c0_53 = arith.constant 0 : index
    %88 = vector.load %arg5[%c0_51, %c8, %c0_52, %c0_53] : memref<1x16x32x16xf32, #tpu.memory_space<vmem>>, vector<1x1x32x16xf32>
    %89 = vector.shape_cast %88 : vector<1x1x32x16xf32> to vector<32x16xf32>
    %90 = vector.shape_cast %87 : vector<32x16xf32> to vector<1x1x32x16xf32>
    tpu.vector_store %arg5[%c0_51, %c8, %c0_52, %c0_53], %90 {strides = array<i32>} : memref<1x16x32x16xf32, #tpu.memory_space<vmem>>, vector<1x1x32x16xf32>,
    %91 = vector.extract_strided_slice %35 {offsets = [9, 0, 0], sizes = [1, 16, 16], strides = [1, 1, 1]} : vector<16x16x16xf32> to vector<1x16x16xf32>
    %92 = vector.shape_cast %91 : vector<1x16x16xf32> to vector<16x16xf32>
    %cst_54 = arith.constant dense<0.000000e+00> : vector<32x16xf32>
    %93 = tpu.matmul %36, %92, %cst_54 {dimension_numbers = #tpu.dot_dimension_numbers<[1], [0], [0], [1], [0, 0, 1, 1], [], []>, precision = #tpu.contract_precision<fp32>} : vector<32x16xf32>, vector<16x16xf32>, vector<32x16xf32> -> vector<32x16xf32>
    %c0_55 = arith.constant 0 : index
    %c9 = arith.constant 9 : index
    %c0_56 = arith.constant 0 : index
    %c0_57 = arith.constant 0 : index
    %94 = vector.load %arg5[%c0_55, %c9, %c0_56, %c0_57] : memref<1x16x32x16xf32, #tpu.memory_space<vmem>>, vector<1x1x32x16xf32>
    %95 = vector.shape_cast %94 : vector<1x1x32x16xf32> to vector<32x16xf32>
    %96 = vector.shape_cast %93 : vector<32x16xf32> to vector<1x1x32x16xf32>
    tpu.vector_store %arg5[%c0_55, %c9, %c0_56, %c0_57], %96 {strides = array<i32>} : memref<1x16x32x16xf32, #tpu.memory_space<vmem>>, vector<1x1x32x16xf32>,
    %97 = vector.extract_strided_slice %35 {offsets = [10, 0, 0], sizes = [1, 16, 16], strides = [1, 1, 1]} : vector<16x16x16xf32> to vector<1x16x16xf32>
    %98 = vector.shape_cast %97 : vector<1x16x16xf32> to vector<16x16xf32>
    %cst_58 = arith.constant dense<0.000000e+00> : vector<32x16xf32>
    %99 = tpu.matmul %36, %98, %cst_58 {dimension_numbers = #tpu.dot_dimension_numbers<[1], [0], [0], [1], [0, 0, 1, 1], [], []>, precision = #tpu.contract_precision<fp32>} : vector<32x16xf32>, vector<16x16xf32>, vector<32x16xf32> -> vector<32x16xf32>
    %c0_59 = arith.constant 0 : index
    %c10 = arith.constant 10 : index
    %c0_60 = arith.constant 0 : index
    %c0_61 = arith.constant 0 : index
    %100 = vector.load %arg5[%c0_59, %c10, %c0_60, %c0_61] : memref<1x16x32x16xf32, #tpu.memory_space<vmem>>, vector<1x1x32x16xf32>
    %101 = vector.shape_cast %100 : vector<1x1x32x16xf32> to vector<32x16xf32>
    %102 = vector.shape_cast %99 : vector<32x16xf32> to vector<1x1x32x16xf32>
    tpu.vector_store %arg5[%c0_59, %c10, %c0_60, %c0_61], %102 {strides = array<i32>} : memref<1x16x32x16xf32, #tpu.memory_space<vmem>>, vector<1x1x32x16xf32>,
    %103 = vector.extract_strided_slice %35 {offsets = [11, 0, 0], sizes = [1, 16, 16], strides = [1, 1, 1]} : vector<16x16x16xf32> to vector<1x16x16xf32>
    %104 = vector.shape_cast %103 : vector<1x16x16xf32> to vector<16x16xf32>
    %cst_62 = arith.constant dense<0.000000e+00> : vector<32x16xf32>
    %105 = tpu.matmul %36, %104, %cst_62 {dimension_numbers = #tpu.dot_dimension_numbers<[1], [0], [0], [1], [0, 0, 1, 1], [], []>, precision = #tpu.contract_precision<fp32>} : vector<32x16xf32>, vector<16x16xf32>, vector<32x16xf32> -> vector<32x16xf32>
    %c0_63 = arith.constant 0 : index
    %c11 = arith.constant 11 : index
    %c0_64 = arith.constant 0 : index
    %c0_65 = arith.constant 0 : index
    %106 = vector.load %arg5[%c0_63, %c11, %c0_64, %c0_65] : memref<1x16x32x16xf32, #tpu.memory_space<vmem>>, vector<1x1x32x16xf32>
    %107 = vector.shape_cast %106 : vector<1x1x32x16xf32> to vector<32x16xf32>
    %108 = vector.shape_cast %105 : vector<32x16xf32> to vector<1x1x32x16xf32>
    tpu.vector_store %arg5[%c0_63, %c11, %c0_64, %c0_65], %108 {strides = array<i32>} : memref<1x16x32x16xf32, #tpu.memory_space<vmem>>, vector<1x1x32x16xf32>,
    %109 = vector.extract_strided_slice %35 {offsets = [12, 0, 0], sizes = [1, 16, 16], strides = [1, 1, 1]} : vector<16x16x16xf32> to vector<1x16x16xf32>
    %110 = vector.shape_cast %109 : vector<1x16x16xf32> to vector<16x16xf32>
    %cst_66 = arith.constant dense<0.000000e+00> : vector<32x16xf32>
    %111 = tpu.matmul %36, %110, %cst_66 {dimension_numbers = #tpu.dot_dimension_numbers<[1], [0], [0], [1], [0, 0, 1, 1], [], []>, precision = #tpu.contract_precision<fp32>} : vector<32x16xf32>, vector<16x16xf32>, vector<32x16xf32> -> vector<32x16xf32>
    %c0_67 = arith.constant 0 : index
    %c12 = arith.constant 12 : index
    %c0_68 = arith.constant 0 : index
    %c0_69 = arith.constant 0 : index
    %112 = vector.load %arg5[%c0_67, %c12, %c0_68, %c0_69] : memref<1x16x32x16xf32, #tpu.memory_space<vmem>>, vector<1x1x32x16xf32>
    %113 = vector.shape_cast %112 : vector<1x1x32x16xf32> to vector<32x16xf32>
    %114 = vector.shape_cast %111 : vector<32x16xf32> to vector<1x1x32x16xf32>
    tpu.vector_store %arg5[%c0_67, %c12, %c0_68, %c0_69], %114 {strides = array<i32>} : memref<1x16x32x16xf32, #tpu.memory_space<vmem>>, vector<1x1x32x16xf32>,
    %115 = vector.extract_strided_slice %35 {offsets = [13, 0, 0], sizes = [1, 16, 16], strides = [1, 1, 1]} : vector<16x16x16xf32> to vector<1x16x16xf32>
    %116 = vector.shape_cast %115 : vector<1x16x16xf32> to vector<16x16xf32>
    %cst_70 = arith.constant dense<0.000000e+00> : vector<32x16xf32>
    %117 = tpu.matmul %36, %116, %cst_70 {dimension_numbers = #tpu.dot_dimension_numbers<[1], [0], [0], [1], [0, 0, 1, 1], [], []>, precision = #tpu.contract_precision<fp32>} : vector<32x16xf32>, vector<16x16xf32>, vector<32x16xf32> -> vector<32x16xf32>
    %c0_71 = arith.constant 0 : index
    %c13 = arith.constant 13 : index
    %c0_72 = arith.constant 0 : index
    %c0_73 = arith.constant 0 : index
    %118 = vector.load %arg5[%c0_71, %c13, %c0_72, %c0_73] : memref<1x16x32x16xf32, #tpu.memory_space<vmem>>, vector<1x1x32x16xf32>
    %119 = vector.shape_cast %118 : vector<1x1x32x16xf32> to vector<32x16xf32>
    %120 = vector.shape_cast %117 : vector<32x16xf32> to vector<1x1x32x16xf32>
    tpu.vector_store %arg5[%c0_71, %c13, %c0_72, %c0_73], %120 {strides = array<i32>} : memref<1x16x32x16xf32, #tpu.memory_space<vmem>>, vector<1x1x32x16xf32>,
    %121 = vector.extract_strided_slice %35 {offsets = [14, 0, 0], sizes = [1, 16, 16], strides = [1, 1, 1]} : vector<16x16x16xf32> to vector<1x16x16xf32>
    %122 = vector.shape_cast %121 : vector<1x16x16xf32> to vector<16x16xf32>
    %cst_74 = arith.constant dense<0.000000e+00> : vector<32x16xf32>
    %123 = tpu.matmul %36, %122, %cst_74 {dimension_numbers = #tpu.dot_dimension_numbers<[1], [0], [0], [1], [0, 0, 1, 1], [], []>, precision = #tpu.contract_precision<fp32>} : vector<32x16xf32>, vector<16x16xf32>, vector<32x16xf32> -> vector<32x16xf32>
    %c0_75 = arith.constant 0 : index
    %c14 = arith.constant 14 : index
    %c0_76 = arith.constant 0 : index
    %c0_77 = arith.constant 0 : index
    %124 = vector.load %arg5[%c0_75, %c14, %c0_76, %c0_77] : memref<1x16x32x16xf32, #tpu.memory_space<vmem>>, vector<1x1x32x16xf32>
    %125 = vector.shape_cast %124 : vector<1x1x32x16xf32> to vector<32x16xf32>
    %126 = vector.shape_cast %123 : vector<32x16xf32> to vector<1x1x32x16xf32>
    tpu.vector_store %arg5[%c0_75, %c14, %c0_76, %c0_77], %126 {strides = array<i32>} : memref<1x16x32x16xf32, #tpu.memory_space<vmem>>, vector<1x1x32x16xf32>,
    %127 = vector.extract_strided_slice %35 {offsets = [15, 0, 0], sizes = [1, 16, 16], strides = [1, 1, 1]} : vector<16x16x16xf32> to vector<1x16x16xf32>
    %128 = vector.shape_cast %127 : vector<1x16x16xf32> to vector<16x16xf32>
    %cst_78 = arith.constant dense<0.000000e+00> : vector<32x16xf32>
    %129 = tpu.matmul %36, %128, %cst_78 {dimension_numbers = #tpu.dot_dimension_numbers<[1], [0], [0], [1], [0, 0, 1, 1], [], []>, precision = #tpu.contract_precision<fp32>} : vector<32x16xf32>, vector<16x16xf32>, vector<32x16xf32> -> vector<32x16xf32>
    %c0_79 = arith.constant 0 : index
    %c15 = arith.constant 15 : index
    %c0_80 = arith.constant 0 : index
    %c0_81 = arith.constant 0 : index
    %130 = vector.load %arg5[%c0_79, %c15, %c0_80, %c0_81] : memref<1x16x32x16xf32, #tpu.memory_space<vmem>>, vector<1x1x32x16xf32>
    %131 = vector.shape_cast %130 : vector<1x1x32x16xf32> to vector<32x16xf32>
    %132 = vector.shape_cast %129 : vector<32x16xf32> to vector<1x1x32x16xf32>
    tpu.vector_store %arg5[%c0_79, %c15, %c0_80, %c0_81], %132 {strides = array<i32>} : memref<1x16x32x16xf32, #tpu.memory_space<vmem>>, vector<1x1x32x16xf32>,
    return
  }
  func.func @transform_0(%arg0: i32, %arg1: i32) -> (i32, i32, i32, i32) {
    %c0_i32 = arith.constant 0 : i32
    %c0_i32_0 = arith.constant 0 : i32
    %c0_i32_1 = arith.constant 0 : i32
    %c0_i32_2 = arith.constant 0 : i32
    return %arg0, %c0_i32, %c0_i32_0, %c0_i32_1 : i32, i32, i32, i32
  }
  func.func @transform_1(%arg0: i32, %arg1: i32) -> (i32, i32) {
    %c0_i32 = arith.constant 0 : i32
    %c0_i32_0 = arith.constant 0 : i32
    %c0_i32_1 = arith.constant 0 : i32
    return %c0_i32, %c0_i32_0 : i32, i32
  }
  func.func @transform_2(%arg0: i32, %arg1: i32) -> (i32, i32) {
    %c0_i32 = arith.constant 0 : i32
    %c0_i32_0 = arith.constant 0 : i32
    %c0_i32_1 = arith.constant 0 : i32
    return %c0_i32, %c0_i32_0 : i32, i32
  }
  func.func @transform_3(%arg0: i32, %arg1: i32) -> (i32, i32, i32, i32) {
    %c0_i32 = arith.constant 0 : i32
    %c0_i32_0 = arith.constant 0 : i32
    %c0_i32_1 = arith.constant 0 : i32
    return %arg0, %arg1, %c0_i32, %c0_i32_0 : i32, i32, i32, i32
  }
}

</mosaic_0001>

<bundles_post_ra>
// kernel: tpu_custom_call.1
= control target key start
LH: loop header
LB: loop body
LE: loop exit
PB: predicated region body
PF: predicated region fallthrough
CT: control target
= control target key end

     0   :  { %8 = vsyncpa [#allocation3], 0  ;;  %s5941_s12 = smov 0   ;;  %s5943_s13 = smov 0   ;;  %s8080_s0 = inlined_call_operand.vmem [shape: f32[6,8,16,8], index: 0, kind: input, shape index: {}]   ;;  %s8081_s1 = inlined_call_operand.hbm [shape: f32[8,16], index: 1, kind: input, shape index: {}]   ;;  %s8082_s2 = inlined_call_operand.vmem [shape: f32[32,16], index: 2, kind: input, shape index: {}]   ;;  %s8083_s3 = inlined_call_operand.vmem [shape: f32[6,16,32,16], index: 3, kind: output, shape index: {}]  }
   0x1   :  { %s5945_s14 = smov 0  }
   0x2 LB: > { %s5750_s15 = sadd.s32 4294967295, %s5918_s14   ;;  %s26_s16 = sadd.s32 1, %s5914_s13  ;;  %s5918_s14 = sphi %s5945_s14, %s14_s14   ;;  %s5914_s13 = sphi %s5943_s13, %s8391_s13   ;;  %s5910_s12 = sphi %s5941_s12, %s8390_s12  }
   0x3   : > { %p28_p0 = scmp.ge.s32.totalorder %s26_s16, 6  ;;  %p5752_p1 = scmp.ge.s32.totalorder %s5918_s14, 1 }
   0x4   : > { %p127_p2 = scmp.lt.s32.totalorder %s5918_s14, 7  ;;  %p5835_p4 = scmp.eq.s32.totalorder %s5750_s15, 0 }
   0x5   : > { %s8393_s16 = smov (%p28_p0, %s26_s16), 0  ;;  %s139_s19 = sshll.u32 %s8081_s1, 4  ;;  %s140_s19 = int_to_ptr.hbm [resolvable:$true] %s139_s19 }
   0x6   : > { %p128_p3 = pnand %p5752_p1, %p127_p2  ;;  %s5920_s20 = smov [#allocation2]  }
   0x7   : > { %s141_s21 = sshll.u32 %s5920_s20, 4  ;;  %s142_s21 = int_to_ptr.vmem [resolvable:$true] %s141_s21 }
   0x8   : > { %p5831_p5 = pneg %p128_p3  ;;  %165 = sbr.rel (%p128_p3) target bundleno = 1465 (0x5b9), region = 32 }
   0xa   : > { %p5832_p6 = pnand %p5835_p4, %p5831_p5 }
   0xc   : > { %5834 = dma.hbm_to_vmem [thread:$0]  (!%p5832_p6), %s140_s19, 128, %s142_s21, [#allocation3]  }
   0xd   : > { %5905 = dma.done.wait (%p5835_p4), [#allocation3], 128  }
   0xe   : > { %5907 = vsyncadd (%p5835_p4), [#allocation3], 4294967168  ;;  %p195_p7 = scmp.lt.s32.totalorder %s5910_s12, 5  ;;  %v312_v0 = vld [vmem:[#allocation2] sm:$0xff]  ;;  %vm313_vm0 = vcmask 64512   ;;  %vm1521_vm1 = vcmask 130048  }
   0xf   : > { %v425_v3 = vand.u32 4294901760, %v312_v0 }
  0x10   : > { %s8395_s12 = smov (!%p195_p7, %s5910_s12), 5 }
  0x11   : > { %s5825_s22 = sshll.u32 %s8395_s12, 7  ;;  %v700_v10 = vsub.f32 %v312_v0, %v425_v3  ;;  %1029 = vmatpush.msra.mxu3 %v425_v3  ;;  %426 = vmatpush.msra.mxu0 %v425_v3  ;;  %s5826_s7 = sshll.u32 %s8395_s12, 9 }
  0x12   : > { %s5969_s25 = scalar_lea.vmem %s8080_s0, %s5825_s22  ;;  %s6945_s10 = scalar_lea.vmem %s8083_s3, %s5826_s7 }
  0x13   : > { %v214_v1 = vld [vmem:[%s5969_s25] sm:$0xff]  ;;  %v215_v2 = vld [vmem:[%s5969_s25 + $0x8] sm:$0xff]  ;;  %v216_v7 = vld [vmem:[%s5969_s25 + $0x10] sm:$0xff]  ;;  %v701_v13 = vand.u32 4294901760, %v700_v10  ;;  %851 = vmatpush.msra.mxu2 %v700_v10 }
  0x14   : > { %v244_v4 = vmul.f32 0.75, %v214_v1  ;;  %v260_v5 = vmul.f32 0.25, %v214_v1  ;;  %v245_v6 = vmul.f32 0.75, %v215_v2  ;;  %v261_v8 = vmul.f32 0.25, %v215_v2  ;;  %v217_v18 = vld [vmem:[%s5969_s25 + $0x18] sm:$0xff]  ;;  %v218_v48 = vld [vmem:[%s5969_s25 + $0x20] sm:$0xff] }
  0x15   : > { %v5974_v9 = vmul.f32 0.25, %v216_v7  ;;  %v702_v19 = vsub.f32 %v700_v10, %v701_v13  ;;  %1241 = vmatpush.msrb.mxu0 %v701_v13  ;;  %v5987_v25 = vmul.f32 0.25, %v217_v18  ;;  %v246_v35 = vmul.f32 0.75, %v216_v7  ;;  %v219_v57 = vld [vmem:[%s5969_s25 + $0x28] sm:$0xff] }
  0x16   : > { %v276_v11 = vadd.f32 %v260_v5, %v244_v4  ;;  %v277_v12 = vadd.f32 %v261_v8, %v245_v6  ;;  %v247_v43 = vmul.f32 0.75, %v217_v18  ;;  %v6006_v52 = vmul.f32 0.25, %v218_v48 }
  0x17   : > { %v296_v15 = vadd.f32 %v5974_v9, %v244_v4  ;;  %v703_v22 = vand.u32 4294901760, %v702_v19  ;;  %v297_v30 = vadd.f32 %v5987_v25, %v245_v6  ;;  %v278_v39 = vadd.f32 %v260_v5, %v246_v35 }
  0x18   : > { %v315_v14 = vsel %vm313_vm0, %v276_v11, 0  ;;  %v318_v17 = vsel %vm313_vm0, %v277_v12, 0  ;;  %v279_v47 = vadd.f32 %v261_v8, %v247_v43  ;;  %v298_v56 = vadd.f32 %v6006_v52, %v246_v35 }
  0x19   : > { %v5978_v16 = vand.u32 4294901760, %v315_v14  ;;  %v5982_v20 = vand.u32 4294901760, %v318_v17  ;;  %v321_v24 = vsel %vm313_vm0, %v296_v15, 0  ;;  %704 = vmatpush.msra.mxu1 %v703_v22  ;;  %v324_v34 = vsel %vm313_vm0, %v297_v30, 0 }
  0x1a   : > { %v5990_v29 = vand.u32 4294901760, %v321_v24  ;;  %v5996_v38 = vand.u32 4294901760, %v324_v34  ;;  %v327_v42 = vsel %vm313_vm0, %v278_v39, 0  ;;  %v330_v51 = vsel %vm313_vm0, %v279_v47, 0 }
  0x1b   : > { %v428_v21 = vsub.f32 %v315_v14, %v5978_v16  ;;  %v436_v23 = vsub.f32 %v318_v17, %v5982_v20  ;;  %706 = vmatmul.f32.vlgmr.msra.gmra.mxu1 %v5978_v16  ;;  %v6001_v46 = vand.u32 4294901760, %v327_v42  ;;  %v6009_v55 = vand.u32 4294901760, %v330_v51 }
  0x1c   : > { %1387 = vmatpush.msrb.mxu1 %v425_v3  ;;  %v444_v33 = vsub.f32 %v321_v24, %v5990_v29  ;;  %v452_v41 = vsub.f32 %v324_v34, %v5996_v38  ;;  %v333_v60 = vsel %vm313_vm0, %v298_v56, 0  ;;  %v6015_v61 = vmul.f32 0.25, %v219_v57 }
  0x1d   : > { %854 = vmatmul.f32.vlgmr.msra.gmra.mxu2 %v428_v21  ;;  %v429_v26 = vand.u32 4294901760, %v428_v21  ;;  %v437_v28 = vand.u32 4294901760, %v436_v23  ;;  %v460_v50 = vsub.f32 %v327_v42, %v6001_v46  ;;  %v468_v59 = vsub.f32 %v330_v51, %v6009_v55 }
  0x1e   : > { %v445_v37 = vand.u32 4294901760, %v444_v33  ;;  %v453_v45 = vand.u32 4294901760, %v452_v41  ;;  %v6018_v0 = vand.u32 4294901760, %v333_v60  ;;  %v299_v1 = vadd.f32 %v6015_v61, %v247_v43 }
  0x1f   : > { %1033 = vmatmul.f32.vlgmr.msra.gmra.mxu3 %v429_v26  ;;  %v430_v27 = vsub.f32 %v428_v21, %v429_v26  ;;  %v438_v32 = vsub.f32 %v436_v23, %v437_v28  ;;  %v461_v54 = vand.u32 4294901760, %v460_v50  ;;  %v469_v63 = vand.u32 4294901760, %v468_v59  ;;  %v220_v21 = vld [vmem:[%s5969_s25 + $0x30] sm:$0xff] }
  0x20   : > { %v446_v40 = vsub.f32 %v444_v33, %v445_v37  ;;  %v454_v49 = vsub.f32 %v452_v41, %v453_v45  ;;  %v476_v3 = vsub.f32 %v333_v60, %v6018_v0  ;;  %v336_v4 = vsel %vm313_vm0, %v299_v1, 0 }
  0x21   : > { %v431_v31 = vand.u32 4294901760, %v430_v27  ;;  %v439_v36 = vand.u32 4294901760, %v438_v32  ;;  %v462_v58 = vsub.f32 %v460_v50, %v461_v54  ;;  %v470_v2 = vsub.f32 %v468_v59, %v469_v63 }
  0x22   : > { %v447_v44 = vand.u32 4294901760, %v446_v40  ;;  %v455_v53 = vand.u32 4294901760, %v454_v49  ;;  %v248_v5 = vmul.f32 0.75, %v218_v48  ;;  %v477_v7 = vand.u32 4294901760, %v476_v3 }
  0x23   : > { %432 = vmatmul.f32.vlgmr.msra.gmra.mxu0 %v431_v31  ;;  %710 = vmatmul.f32.gmra.mxu1 %v5982_v20  ;;  %v463_v62 = vand.u32 4294901760, %v462_v58  ;;  %v471_v6 = vand.u32 4294901760, %v470_v2  ;;  %v6024_v8 = vand.u32 4294901760, %v336_v4  ;;  %v249_v14 = vmul.f32 0.75, %v219_v57 }
  0x24   : > { %v280_v10 = vadd.f32 %v5974_v9, %v248_v5  ;;  %v478_v11 = vsub.f32 %v476_v3, %v477_v7  ;;  %v6036_v24 = vmul.f32 0.25, %v220_v21  ;;  %v250_v43 = vmul.f32 0.75, %v220_v21 }
  0x25   : > { %859 = vmatmul.f32.gmra.mxu2 %v436_v23  ;;  %v484_v12 = vsub.f32 %v336_v4, %v6024_v8  ;;  %v281_v19 = vadd.f32 %v5987_v25, %v249_v14  ;;  %v221_v25 = vld [vmem:[%s5969_s25 + $0x38] sm:$0xff] }
  0x26   : > { %v339_v13 = vsel %vm313_vm0, %v280_v10, 0  ;;  %v479_v15 = vand.u32 4294901760, %v478_v11  ;;  %v300_v30 = vadd.f32 %v6036_v24, %v248_v5  ;;  %v6045_v34 = vmul.f32 0.25, %v221_v25 }
  0x27   : > { %1039 = vmatmul.f32.gmra.mxu3 %v437_v28  ;;  %v485_v17 = vand.u32 4294901760, %v484_v12  ;;  %v6030_v18 = vand.u32 4294901760, %v339_v13  ;;  %v342_v23 = vsel %vm313_vm0, %v281_v19, 0  ;;  %v282_v48 = vadd.f32 %v6006_v52, %v250_v43 }
  0x28   : > { %v6039_v28 = vand.u32 4294901760, %v342_v23  ;;  %v301_v39 = vadd.f32 %v6045_v34, %v249_v14 }
  0x29   : > { %v486_v9 = vsub.f32 %v484_v12, %v485_v17  ;;  %v492_v22 = vsub.f32 %v339_v13, %v6030_v18  ;;  %v351_v51 = vsel %vm313_vm0, %v282_v48, 0 }
  0x2a   : > { %v500_v32 = vsub.f32 %v342_v23, %v6039_v28  ;;  %v348_v42 = vsel %vm313_vm0, %v301_v39, 0  ;;  %v6060_v57 = vand.u32 4294901760, %v351_v51  ;;  %v224_v39 = vld [vmem:[%s5969_s25 + $0x50] sm:$0xff] }
  0x2b   : > { %440 = vmatmul.f32.gmra.mxu0 %v439_v36  ;;  %714 = vmatmul.f32.gmra.mxu1 %v5990_v29  ;;  %v487_v26 = vand.u32 4294901760, %v486_v9  ;;  %v493_v27 = vand.u32 4294901760, %v492_v22  ;;  %v6054_v47 = vand.u32 4294901760, %v348_v42 }
  0x2c   : > { %v501_v36 = vand.u32 4294901760, %v500_v32  ;;  %v524_v60 = vsub.f32 %v351_v51, %v6060_v57 }
  0x2d   : > { %864 = vmatmul.f32.gmra.mxu2 %v444_v33  ;;  %v494_v31 = vsub.f32 %v492_v22, %v493_v27  ;;  %v345_v33 = vsel %vm313_vm0, %v300_v30, 0 }
  0x2e   : > { %v502_v40 = vsub.f32 %v500_v32, %v501_v36  ;;  %v525_v2 = vand.u32 4294901760, %v524_v60 }
  0x2f   : > { %1045 = vmatmul.f32.gmra.mxu3 %v445_v37  ;;  %v495_v35 = vand.u32 4294901760, %v494_v31  ;;  %v6048_v37 = vand.u32 4294901760, %v345_v33 }
  0x30   : > { %v526_v5 = vsub.f32 %v524_v60, %v525_v2 }
  0x32   : > { %v527_v11 = vand.u32 4294901760, %v526_v5 }
  0x33   : > { %448 = vmatmul.f32.gmra.mxu0 %v447_v44  ;;  %718 = vmatmul.f32.gmra.mxu1 %v5996_v38  ;;  %v503_v44 = vand.u32 4294901760, %v502_v40 }
  0x35   : > { %869 = vmatmul.f32.gmra.mxu2 %v452_v41  ;;  %v508_v41 = vsub.f32 %v345_v33, %v6048_v37 }
  0x37   : > { %1051 = vmatmul.f32.gmra.mxu3 %v453_v45  ;;  %v509_v45 = vand.u32 4294901760, %v508_v41 }
  0x39   : > { %v510_v49 = vsub.f32 %v508_v41, %v509_v45 }
  0x3b   : > { %456 = vmatmul.f32.gmra.mxu0 %v455_v53  ;;  %722 = vmatmul.f32.gmra.mxu1 %v6001_v46  ;;  %v251_v53 = vmul.f32 0.75, %v221_v25 }
  0x3d   : > { %874 = vmatmul.f32.gmra.mxu2 %v460_v50  ;;  %v516_v50 = vsub.f32 %v348_v42, %v6054_v47  ;;  %v283_v58 = vadd.f32 %v6015_v61, %v251_v53  ;;  %v223_v61 = vld [vmem:[%s5969_s25 + $0x48] sm:$0xff]  ;;  %v6096_v42 = vmul.f32 0.25, %v224_v39 }
  0x3e   : > { %v6075_v10 = vmul.f32 0.25, %v223_v61  ;;  %v253_v31 = vmul.f32 0.75, %v223_v61 }
  0x3f   : > { %1057 = vmatmul.f32.gmra.mxu3 %v461_v54  ;;  %v511_v54 = vand.u32 4294901760, %v510_v49  ;;  %v517_v56 = vand.u32 4294901760, %v516_v50 }
  0x40   : > { %v303_v14 = vadd.f32 %v6075_v10, %v251_v53 }
  0x41   : > { %v518_v52 = vsub.f32 %v516_v50, %v517_v56 }
  0x42   : > { %v360_v19 = vsel %vm313_vm0, %v303_v14, 0 }
  0x43   : > { %464 = vmatmul.f32.gmra.mxu0 %v463_v62  ;;  %726 = vmatmul.f32.gmra.mxu1 %v6009_v55  ;;  %v354_v62 = vsel %vm313_vm0, %v283_v58, 0  ;;  %v519_v1 = vand.u32 4294901760, %v518_v52  ;;  %v6084_v23 = vand.u32 4294901760, %v360_v19 }
  0x45   : > { %879 = vmatmul.f32.gmra.mxu2 %v468_v59  ;;  %v222_v59 = vld [vmem:[%s5969_s25 + $0x40] sm:$0xff]  ;;  %v548_v30 = vsub.f32 %v360_v19, %v6084_v23 }
  0x46   : > { %v252_v21 = vmul.f32 0.75, %v222_v59 }
  0x47   : > { %1063 = vmatmul.f32.gmra.mxu3 %v469_v63  ;;  %v6066_v63 = vmul.f32 0.25, %v222_v59  ;;  %v549_v33 = vand.u32 4294901760, %v548_v30 }
  0x48   : > { %v304_v48 = vadd.f32 %v6096_v42, %v252_v21 }
  0x49   : > { %v302_v4 = vadd.f32 %v6066_v63, %v250_v43 }
  0x4a   : > { %v369_v53 = vsel %vm313_vm0, %v304_v48, 0  ;;  %v226_v48 = vld [vmem:[%s5969_s25 + $0x60] sm:$0xff] }
  0x4b   : > { %472 = vmatmul.f32.gmra.mxu0 %v471_v6  ;;  %730 = vmatmul.f32.gmra.mxu1 %v6018_v0  ;;  %v6108_v59 = vand.u32 4294901760, %v369_v53 }
  0x4d   : > { %884 = vmatmul.f32.gmra.mxu2 %v476_v3  ;;  %v6069_v3 = vand.u32 4294901760, %v354_v62  ;;  %v572_v5 = vsub.f32 %v369_v53, %v6108_v59 }
  0x4f   : > { %1069 = vmatmul.f32.gmra.mxu3 %v477_v7  ;;  %v532_v6 = vsub.f32 %v354_v62, %v6069_v3  ;;  %v357_v7 = vsel %vm313_vm0, %v302_v4, 0 }
  0x50   : > { %v6078_v13 = vand.u32 4294901760, %v357_v7 }
  0x53   : > { %480 = vmatmul.f32.gmra.mxu0 %v479_v15  ;;  %734 = vmatmul.f32.gmra.mxu1 %v6024_v8 }
  0x55   : > { %889 = vmatmul.f32.gmra.mxu2 %v484_v12  ;;  %v533_v12 = vand.u32 4294901760, %v532_v6 }
  0x57   : > { %1075 = vmatmul.f32.gmra.mxu3 %v485_v17  ;;  %v534_v15 = vsub.f32 %v532_v6, %v533_v12  ;;  %v540_v17 = vsub.f32 %v357_v7, %v6078_v13 }
  0x59   : > { %v535_v9 = vand.u32 4294901760, %v534_v15  ;;  %v573_v15 = vand.u32 4294901760, %v572_v5 }
  0x5b   : > { %488 = vmatmul.f32.gmra.mxu0 %v487_v26  ;;  %738 = vmatmul.f32.gmra.mxu1 %v6030_v18  ;;  %v284_v26 = vadd.f32 %v6036_v24, %v252_v21  ;;  %v550_v24 = vsub.f32 %v548_v30, %v549_v33 }
  0x5d   : > { %894 = vmatmul.f32.gmra.mxu2 %v492_v22  ;;  %v541_v22 = vand.u32 4294901760, %v540_v17  ;;  %v363_v25 = vsel %vm313_vm0, %v284_v26, 0  ;;  %v551_v43 = vand.u32 4294901760, %v550_v24 }
  0x5f   : > { %1081 = vmatmul.f32.gmra.mxu3 %v493_v27  ;;  %v542_v27 = vsub.f32 %v540_v17, %v541_v22 }
  0x63   : > { %496 = vmatmul.f32.gmra.mxu0 %v495_v35  ;;  %742 = vmatmul.f32.gmra.mxu1 %v6039_v28  ;;  %v6090_v35 = vand.u32 4294901760, %v363_v25 }
  0x65   : > { %899 = vmatmul.f32.gmra.mxu2 %v500_v32  ;;  %v543_v32 = vand.u32 4294901760, %v542_v27  ;;  %v556_v40 = vsub.f32 %v363_v25, %v6090_v35 }
  0x67   : > { %1087 = vmatmul.f32.gmra.mxu3 %v501_v36  ;;  %v285_v36 = vadd.f32 %v6045_v34, %v253_v31  ;;  %v225_v34 = vld [vmem:[%s5969_s25 + $0x58] sm:$0xff] }
  0x6b   : > { %504 = vmatmul.f32.gmra.mxu0 %v503_v44  ;;  %746 = vmatmul.f32.gmra.mxu1 %v6048_v37  ;;  %v557_v44 = vand.u32 4294901760, %v556_v40 }
  0x6d   : > { %904 = vmatmul.f32.gmra.mxu2 %v508_v41  ;;  %v366_v41 = vsel %vm313_vm0, %v285_v36, 0  ;;  %v558_v49 = vsub.f32 %v556_v40, %v557_v44 }
  0x6f   : > { %1093 = vmatmul.f32.gmra.mxu3 %v509_v45  ;;  %v6099_v45 = vand.u32 4294901760, %v366_v41 }
  0x73   : > { %512 = vmatmul.f32.gmra.mxu0 %v511_v54  ;;  %750 = vmatmul.f32.gmra.mxu1 %v6054_v47  ;;  %v6105_v54 = vmul.f32 0.25, %v225_v34 }
  0x75   : > { %909 = vmatmul.f32.gmra.mxu2 %v516_v50  ;;  %v564_v50 = vsub.f32 %v366_v41, %v6099_v45  ;;  %v305_v62 = vadd.f32 %v6105_v54, %v253_v31 }
  0x77   : > { %1099 = vmatmul.f32.gmra.mxu3 %v517_v56  ;;  %v559_v56 = vand.u32 4294901760, %v558_v49  ;;  %v565_v58 = vand.u32 4294901760, %v564_v50  ;;  %v372_v7 = vsel %vm313_vm0, %v305_v62, 0 }
  0x79   : > { %v566_v61 = vsub.f32 %v564_v50, %v565_v58 }
  0x7b   : > { %520 = vmatmul.f32.gmra.mxu0 %v519_v1  ;;  %754 = vmatmul.f32.gmra.mxu1 %v6060_v57  ;;  %v567_v14 = vand.u32 4294901760, %v566_v61 }
  0x7d   : > { %914 = vmatmul.f32.gmra.mxu2 %v524_v60 }
  0x7f   : > { %1105 = vmatmul.f32.gmra.mxu3 %v525_v2 }
  0x83   : > { %528 = vmatmul.f32.gmra.mxu0 %v527_v11  ;;  %758 = vmatmul.f32.gmra.mxu1 %v6069_v3  ;;  %v254_v11 = vmul.f32 0.75, %v224_v39 }
  0x85   : > { %919 = vmatmul.f32.gmra.mxu2 %v532_v6 }
  0x87   : > { %1111 = vmatmul.f32.gmra.mxu3 %v533_v12 }
  0x8b   : > { %536 = vmatmul.f32.gmra.mxu0 %v535_v9  ;;  %762 = vmatmul.f32.gmra.mxu1 %v6078_v13  ;;  %v286_v9 = vadd.f32 %v6066_v63, %v254_v11 }
  0x8d   : > { %924 = vmatmul.f32.gmra.mxu2 %v540_v17  ;;  %v6116_v17 = vand.u32 4294901760, %v372_v7 }
  0x8f   : > { %1117 = vmatmul.f32.gmra.mxu3 %v541_v22  ;;  %v580_v25 = vsub.f32 %v372_v7, %v6116_v17 }
  0x91   : > { %v581_v63 = vand.u32 4294901760, %v580_v25 }
  0x93   : > { %544 = vmatmul.f32.gmra.mxu0 %v543_v32  ;;  %766 = vmatmul.f32.gmra.mxu1 %v6084_v23  ;;  %v375_v32 = vsel %vm313_vm0, %v286_v9, 0 }
  0x94   : > { %v6124_v24 = vand.u32 4294901760, %v375_v32 }
  0x95   : > { %929 = vmatmul.f32.gmra.mxu2 %v548_v30  ;;  %v574_v30 = vsub.f32 %v572_v5, %v573_v15 }
  0x97   : > { %1123 = vmatmul.f32.gmra.mxu3 %v549_v33  ;;  %v255_v33 = vmul.f32 0.75, %v225_v34  ;;  %v575_v39 = vand.u32 4294901760, %v574_v30  ;;  %v582_v34 = vsub.f32 %v580_v25, %v581_v63 }
  0x98   : > { %v707_v51 = vpop.f32.mrf.mxu1 }
  0x9b   : > { %552 = vmatmul.f32.gmra.mxu0 %v551_v43  ;;  %770 = vmatmul.f32.gmra.mxu1 %v6090_v35  ;;  %v287_v43 = vadd.f32 %v6075_v10, %v255_v33  ;;  %v583_v10 = vand.u32 4294901760, %v582_v34 }
  0x9d   : > { %934 = vmatmul.f32.gmra.mxu2 %v556_v40 }
  0x9f   : > { %1129 = vmatmul.f32.gmra.mxu3 %v557_v44 }
  0xa0   : > { %v433_v52 = vpop.f32.mrf.mxu0  ;;  %v855_v60 = vpop.f32.mrf.mxu2 }
  0xa1   : > { %v708_v1 = vadd.f32 %v707_v51, %v433_v52  ;;  %v711_v6 = vpop.f32.mrf.mxu1  ;;  %v588_v51 = vsub.f32 %v375_v32, %v6124_v24 }
  0xa2   : > { %v1034_v2 = vpop.f32.mrf.mxu3 }
  0xa3   : > { %v856_v4 = vadd.f32 %v855_v60, %v708_v1  ;;  %560 = vmatmul.f32.gmra.mxu0 %v559_v56  ;;  %774 = vmatmul.f32.gmra.mxu1 %v6099_v45  ;;  %v378_v56 = vsel %vm313_vm0, %v287_v43, 0  ;;  %v589_v60 = vand.u32 4294901760, %v588_v51 }
  0xa4   : > { %v6135_v62 = vand.u32 4294901760, %v378_v56 }
  0xa5   : > { %v6113_v12 = vadd.f32 %v1034_v2, %v856_v4  ;;  %939 = vmatmul.f32.gmra.mxu2 %v564_v50 }
  0xa7   : > { %1135 = vmatmul.f32.gmra.mxu3 %v565_v58  ;;  %v6130_v58 = vmul.f32 0.25, %v226_v48 }
  0xa8   : > { %v441_v19 = vpop.f32.mrf.mxu0  ;;  %v860_v21 = vpop.f32.mrf.mxu2 }
  0xa9   : > { %v712_v22 = vadd.f32 %v711_v6, %v441_v19  ;;  %v715_v31 = vpop.f32.mrf.mxu1  ;;  %v306_v4 = vadd.f32 %v6130_v58, %v254_v11 }
  0xaa   : > { %v1040_v26 = vpop.f32.mrf.mxu3 }
  0xab   : > { %v861_v27 = vadd.f32 %v860_v21, %v712_v22  ;;  %568 = vmatmul.f32.gmra.mxu0 %v567_v14  ;;  %778 = vmatmul.f32.gmra.mxu1 %v6108_v59  ;;  %v590_v14 = vsub.f32 %v588_v51, %v589_v60  ;;  %v381_v21 = vsel %vm313_vm0, %v306_v4, 0 }
  0xad   : > { %v6121_v36 = vadd.f32 %v1040_v26, %v861_v27  ;;  %944 = vmatmul.f32.gmra.mxu2 %v572_v5  ;;  %v227_v5 = vld [vmem:[%s5969_s25 + $0x68] sm:$0xff]  ;;  %v591_v11 = vand.u32 4294901760, %v590_v14  ;;  %v6146_v27 = vand.u32 4294901760, %v381_v21 }
  0xae   : > { %v6141_v9 = vmul.f32 0.25, %v227_v5 }
  0xaf   : > { %1141 = vmatmul.f32.gmra.mxu3 %v573_v15  ;;  %v596_v15 = vsub.f32 %v378_v56, %v6135_v62 }
  0xb0   : > { %v449_v40 = vpop.f32.mrf.mxu0  ;;  %v865_v41 = vpop.f32.mrf.mxu2 }
  0xb1   : > { %v716_v44 = vadd.f32 %v715_v31, %v449_v40  ;;  %v719_v53 = vpop.f32.mrf.mxu1  ;;  %v597_v26 = vand.u32 4294901760, %v596_v15  ;;  %v307_v31 = vadd.f32 %v6141_v9, %v255_v33 }
  0xb2   : > { %v1046_v49 = vpop.f32.mrf.mxu3 }
  0xb3   : > { %v866_v50 = vadd.f32 %v865_v41, %v716_v44  ;;  %576 = vmatmul.f32.gmra.mxu0 %v575_v39  ;;  %782 = vmatmul.f32.gmra.mxu1 %v6116_v17  ;;  %v598_v40 = vsub.f32 %v596_v15, %v597_v26  ;;  %v604_v41 = vsub.f32 %v381_v21, %v6146_v27  ;;  %v384_v44 = vsel %vm313_vm0, %v307_v31, 0 }
  0xb4   : > { %v6154_v33 = vand.u32 4294901760, %v384_v44 }
  0xb5   : > { %v6132_v52 = vadd.f32 %v1046_v49, %v866_v50  ;;  %949 = vmatmul.f32.gmra.mxu2 %v580_v25  ;;  %v256_v49 = vmul.f32 0.75, %v226_v48  ;;  %v599_v34 = vand.u32 4294901760, %v598_v40 }
  0xb6   : > { %v612_v48 = vsub.f32 %v384_v44, %v6154_v33 }
  0xb7   : > { %1147 = vmatmul.f32.gmra.mxu3 %v581_v63 }
  0xb8   : > { %v457_v1 = vpop.f32.mrf.mxu0  ;;  %v870_v2 = vpop.f32.mrf.mxu2 }
  0xb9   : > { %v720_v61 = vadd.f32 %v719_v53, %v457_v1  ;;  %v723_v19 = vpop.f32.mrf.mxu1 }
  0xba   : > { %v1052_v6 = vpop.f32.mrf.mxu3 }
  0xbb   : > { %v871_v7 = vadd.f32 %v870_v2, %v720_v61  ;;  %584 = vmatmul.f32.gmra.mxu0 %v583_v10  ;;  %786 = vmatmul.f32.gmra.mxu1 %v6124_v24  ;;  %v288_v10 = vadd.f32 %v6096_v42, %v256_v49  ;;  %v613_v42 = vand.u32 4294901760, %v612_v48 }
  0xbd   : > { %v6143_v22 = vadd.f32 %v1052_v6, %v871_v7  ;;  %954 = vmatmul.f32.gmra.mxu2 %v588_v51  ;;  %v605_v51 = vand.u32 4294901760, %v604_v41  ;;  %v387_v6 = vsel %vm313_vm0, %v288_v10, 0  ;;  %v257_v7 = vmul.f32 0.75, %v227_v5 }
  0xbe   : > { %v614_v5 = vsub.f32 %v612_v48, %v613_v42 }
  0xbf   : > { %1153 = vmatmul.f32.gmra.mxu3 %v589_v60  ;;  %v606_v4 = vsub.f32 %v604_v41, %v605_v51 }
  0xc0   : > { %v465_v30 = vpop.f32.mrf.mxu0  ;;  %v875_v25 = vpop.f32.mrf.mxu2 }
  0xc1   : > { %v724_v32 = vadd.f32 %v723_v19, %v465_v30  ;;  %v727_v43 = vpop.f32.mrf.mxu1  ;;  %v6162_v19 = vand.u32 4294901760, %v387_v6 }
  0xc2   : > { %v1058_v39 = vpop.f32.mrf.mxu3 }
  0xc3   : > { %v876_v63 = vadd.f32 %v875_v25, %v724_v32  ;;  %592 = vmatmul.f32.gmra.mxu0 %v591_v11  ;;  %790 = vmatmul.f32.gmra.mxu1 %v6135_v62  ;;  %v228_v25 = vld [vmem:[%s5969_s25 + $0x70] sm:$0xff] }
  0xc5   : > { %v6151_v50 = vadd.f32 %v1058_v39, %v876_v63  ;;  %959 = vmatmul.f32.gmra.mxu2 %v596_v15  ;;  %v607_v15 = vand.u32 4294901760, %v606_v4  ;;  %v620_v39 = vsub.f32 %v387_v6, %v6162_v19 }
  0xc7   : > { %1159 = vmatmul.f32.gmra.mxu3 %v597_v26  ;;  %v289_v26 = vadd.f32 %v6105_v54, %v257_v7  ;;  %v615_v54 = vand.u32 4294901760, %v614_v5  ;;  %v621_v44 = vand.u32 4294901760, %v620_v39 }
  0xc8   : > { %v473_v53 = vpop.f32.mrf.mxu0  ;;  %v880_v56 = vpop.f32.mrf.mxu2 }
  0xc9   : > { %v728_v60 = vadd.f32 %v727_v43, %v473_v53  ;;  %v731_v61 = vpop.f32.mrf.mxu1  ;;  %v390_v40 = vsel %vm313_vm0, %v289_v26, 0  ;;  %v622_v4 = vsub.f32 %v620_v39, %v621_v44 }
  0xca   : > { %v1064_v1 = vpop.f32.mrf.mxu3 }
  0xcb   : > { %v881_v2 = vadd.f32 %v880_v56, %v728_v60  ;;  %600 = vmatmul.f32.gmra.mxu0 %v599_v34  ;;  %794 = vmatmul.f32.gmra.mxu1 %v6146_v27  ;;  %v6173_v34 = vand.u32 4294901760, %v390_v40  ;;  %v229_v60 = vld [vmem:[%s5969_s25 + $0x78] sm:$0xff] }
  0xcd   : > { %v6159_v14 = vadd.f32 %v1064_v1, %v881_v2  ;;  %964 = vmatmul.f32.gmra.mxu2 %v604_v41  ;;  %v6168_v41 = vmul.f32 0.25, %v228_v25 }
  0xcf   : > { %1165 = vmatmul.f32.gmra.mxu3 %v605_v51  ;;  %v308_v56 = vadd.f32 %v6168_v41, %v256_v49  ;;  %v623_v49 = vand.u32 4294901760, %v622_v4 }
  0xd0   : > { %v481_v21 = vpop.f32.mrf.mxu0  ;;  %v885_v11 = vpop.f32.mrf.mxu2 }
  0xd1   : > { %v732_v30 = vadd.f32 %v731_v61, %v481_v21  ;;  %v735_v63 = vpop.f32.mrf.mxu1  ;;  %v628_v61 = vsub.f32 %v390_v40, %v6173_v34  ;;  %v393_v6 = vsel %vm313_vm0, %v308_v56, 0 }
  0xd2   : > { %v1070_v31 = vpop.f32.mrf.mxu3 }
  0xd3   : > { %v886_v32 = vadd.f32 %v885_v11, %v732_v30  ;;  %608 = vmatmul.f32.gmra.mxu0 %v607_v15  ;;  %798 = vmatmul.f32.gmra.mxu1 %v6154_v33  ;;  %v6181_v15 = vmul.f32 0.25, %v229_v60  ;;  %v629_v21 = vand.u32 4294901760, %v628_v61  ;;  %v6186_v11 = vand.u32 4294901760, %v393_v6 }
  0xd5   : > { %v6170_v43 = vadd.f32 %v1070_v31, %v886_v32  ;;  %969 = vmatmul.f32.gmra.mxu2 %v612_v48  ;;  %v309_v30 = vadd.f32 %v6181_v15, %v257_v7  ;;  %v630_v31 = vsub.f32 %v628_v61, %v629_v21  ;;  %v636_v32 = vsub.f32 %v393_v6, %v6186_v11 }
  0xd7   : > { %1171 = vmatmul.f32.gmra.mxu3 %v613_v42  ;;  %v631_v40 = vand.u32 4294901760, %v630_v31 }
  0xd8   : > { %v489_v51 = vpop.f32.mrf.mxu0  ;;  %v890_v53 = vpop.f32.mrf.mxu2 }
  0xd9   : > { %v736_v10 = vadd.f32 %v735_v63, %v489_v51  ;;  %v6178_v48 = vpop.f32.mrf.mxu1  ;;  %v396_v63 = vsel %vm313_vm0, %v309_v30, 0 }
  0xda   : > { %v1076_v1 = vpop.f32.mrf.mxu3 }
  0xdb   : > { %v891_v2 = vadd.f32 %v890_v53, %v736_v10  ;;  %616 = vmatmul.f32.gmra.mxu0 %v615_v54  ;;  %802 = vmatmul.f32.gmra.mxu1 %v6162_v19  ;;  %v637_v54 = vand.u32 4294901760, %v636_v32 }
  0xdd   : > { %v6183_v42 = vadd.f32 %v1076_v1, %v891_v2  ;;  %974 = vmatmul.f32.gmra.mxu2 %v620_v39  ;;  %v258_v39 = vmul.f32 0.75, %v228_v25  ;;  %v638_v53 = vsub.f32 %v636_v32, %v637_v54  ;;  %v259_v1 = vmul.f32 0.75, %v229_v60 }
  0xdf   : > { %1177 = vmatmul.f32.gmra.mxu3 %v621_v44  ;;  %v6196_v44 = vand.u32 4294901760, %v396_v63  ;;  %v290_v7 = vadd.f32 %v6130_v58, %v258_v39  ;;  %v639_v2 = vand.u32 4294901760, %v638_v53  ;;  %v291_v58 = vadd.f32 %v6141_v9, %v259_v1 }
  0xe0   : > { %v6188_v26 = vpop.f32.mrf.mxu0  ;;  %v310_v9 = vadd.f32 %v6168_v41, %v258_v39  ;;  %v311_v41 = vadd.f32 %v6181_v15, %v259_v1 }
  0xe1   : > { %v6192_v5 = vpop.f32.mrf.mxu1  ;;  %v644_v56 = vsub.f32 %v396_v63, %v6196_v44  ;;  %v399_v25 = vsel %vm313_vm0, %v290_v7, 0  ;;  %v402_v60 = vsel %vm313_vm0, %v291_v58, 0 }
  0xe2   : > { %v6216_v63 = vand.u32 4294901760, %v402_v60 }
  0xe3   : > { %624 = vmatmul.f32.gmra.mxu0 %v623_v49  ;;  %806 = vmatmul.f32.gmra.mxu1 %v6173_v34  ;;  %v645_v4 = vand.u32 4294901760, %v644_v56 }
  0xe4   : > { %v660_v7 = vsub.f32 %v402_v60, %v6216_v63 }
  0xe5   : > { %979 = vmatmul.f32.gmra.mxu2 %v628_v61  ;;  %v6206_v61 = vand.u32 4294901760, %v399_v25  ;;  %v646_v49 = vsub.f32 %v644_v56, %v645_v4 }
  0xe7   : > { %1183 = vmatmul.f32.gmra.mxu3 %v629_v21  ;;  %v652_v21 = vsub.f32 %v399_v25, %v6206_v61  ;;  %v647_v31 = vand.u32 4294901760, %v646_v49  ;;  %v405_v25 = vsel %vm313_vm0, %v310_v9, 0 }
  0xe8   : > { %v6198_v51 = vpop.f32.mrf.mxu0 }
  0xe9   : > { %v6202_v10 = vpop.f32.mrf.mxu1 }
  0xea   : > { %8145 = vst [vmem:[#allocation5_spill] sm:$0xff] %v6202_v10 }
  0xeb   : > { %632 = vmatmul.f32.gmra.mxu0 %v631_v40  ;;  %810 = vmatmul.f32.gmra.mxu1 %v6186_v11 }
  0xed   : > { %984 = vmatmul.f32.gmra.mxu2 %v636_v32  ;;  %v653_v32 = vand.u32 4294901760, %v652_v21 }
  0xef   : > { %1189 = vmatmul.f32.gmra.mxu3 %v637_v54  ;;  %v654_v54 = vsub.f32 %v652_v21, %v653_v32 }
  0xf0   : > { %v6208_v6 = vpop.f32.mrf.mxu0 }
  0xf1   : > { %8146 = vst [vmem:[#allocation6_spill] sm:$0xff] %v6208_v6  ;;  %v6212_v30 = vpop.f32.mrf.mxu1 }
  0xf2   : > { %8147 = vst [vmem:[#allocation7_spill] sm:$0xff] %v6212_v30 }
  0xf3   : > { %640 = vmatmul.f32.gmra.mxu0 %v639_v2  ;;  %814 = vmatmul.f32.gmra.mxu1 %v6196_v44  ;;  %v661_v2 = vand.u32 4294901760, %v660_v7 }
  0xf5   : > { %989 = vmatmul.f32.gmra.mxu2 %v644_v56  ;;  %v655_v56 = vand.u32 4294901760, %v654_v54  ;;  %v662_v39 = vsub.f32 %v660_v7, %v661_v2 }
  0xf7   : > { %1195 = vmatmul.f32.gmra.mxu3 %v645_v4  ;;  %v6226_v4 = vand.u32 4294901760, %v405_v25 }
  0xf8   : > { %v6218_v40 = vpop.f32.mrf.mxu0 }
  0xf9   : > { %8148 = vst [vmem:[#allocation8_spill] sm:$0xff] %v6218_v40  ;;  %v6222_v53 = vpop.f32.mrf.mxu1  ;;  %v668_v49 = vsub.f32 %v405_v25, %v6226_v4 }
  0xfa   : > { %8149 = vst [vmem:[#allocation9_spill] sm:$0xff] %v6222_v53 }
  0xfb   : > { %648 = vmatmul.f32.gmra.mxu0 %v647_v31  ;;  %818 = vmatmul.f32.gmra.mxu1 %v6206_v61  ;;  %v408_v31 = vsel %vm313_vm0, %v311_v41, 0 }
  0xfc   : > { %v6236_v9 = vand.u32 4294901760, %v408_v31 }
  0xfd   : > { %994 = vmatmul.f32.gmra.mxu2 %v652_v21  ;;  %v663_v21 = vand.u32 4294901760, %v662_v39 }
  0xfe   : > { %8152 = vst [vmem:[#allocation12_spill] sm:$0xff] %v6236_v9  ;;  %v676_v1 = vsub.f32 %v408_v31, %v6236_v9 }
  0xff   : > { %1201 = vmatmul.f32.gmra.mxu3 %v653_v32  ;;  %v669_v32 = vand.u32 4294901760, %v668_v49 }
 0x100   : > { %v6228_v58 = vpop.f32.mrf.mxu0  ;;  %v677_v25 = vand.u32 4294901760, %v676_v1 }
 0x101   : > { %8150 = vst [vmem:[#allocation10_spill] sm:$0xff] %v6228_v58  ;;  %v6232_v60 = vpop.f32.mrf.mxu1  ;;  %v670_v15 = vsub.f32 %v668_v49, %v669_v32  ;;  %v6283_v58 = vpop.f32.mrf.mxu2 }
 0x102   : > { %8151 = vst [vmem:[#allocation11_spill] sm:$0xff] %v6232_v60 }
 0x103   : > { %656 = vmatmul.f32.gmra.mxu0 %v655_v56  ;;  %822 = vmatmul.f32.gmra.mxu1 %v6216_v63 }
 0x105   : > { %999 = vmatmul.f32.gmra.mxu2 %v660_v7  ;;  %v671_v7 = vand.u32 4294901760, %v670_v15 }
 0x107   : > { %1207 = vmatmul.f32.gmra.mxu3 %v661_v2  ;;  %v678_v2 = vsub.f32 %v676_v1, %v677_v25 }
 0x108   : > { %v6238_v54 = vpop.f32.mrf.mxu0 }
 0x109   : > { %8153 = vst [vmem:[#allocation13_spill] sm:$0xff] %v6238_v54  ;;  %v6241_v56 = vpop.f32.mrf.mxu1  ;;  %v6296_v10 = vpop.f32.mrf.mxu2 }
 0x10b   : > { %664 = vmatmul.f32.gmra.mxu0 %v663_v21  ;;  %826 = vmatmul.f32.gmra.mxu1 %v6226_v4  ;;  %v679_v21 = vand.u32 4294901760, %v678_v2 }
 0x10d   : > { %1004 = vmatmul.f32.gmra.mxu2 %v668_v49 }
 0x10f   : > { %1213 = vmatmul.f32.gmra.mxu3 %v669_v32 }
 0x110   : > { %v6244_v41 = vpop.f32.mrf.mxu0 }
 0x111   : > { %v6246_v39 = vpop.f32.mrf.mxu1 }
 0x113   : > { %672 = vmatmul.f32.gmra.mxu0 %v671_v7  ;;  %830 = vmatmul.f32.gmra.mxu1 %v6236_v9 }
 0x115   : > { %1009 = vmatmul.f32.gmra.mxu2 %v676_v1 }
 0x117   : > { %1219 = vmatmul.f32.gmra.mxu3 %v677_v25 }
 0x118   : > { %v6249_v31 = vpop.f32.mrf.mxu0 }
 0x119   : > { %v6251_v49 = vpop.f32.mrf.mxu1 }
 0x11a   : > { %8154 = vst [vmem:[#allocation14_spill] sm:$0xff] %v6251_v49 }
 0x11b   : > { %680 = vmatmul.f32.gmra.mxu0 %v679_v21  ;;  %1389 = vmatmul.f32.vlgmr.msrb.gmra.mxu1 %v5978_v16 }
 0x120   : > { %v6254_v32 = vpop.f32.mrf.mxu0 }
 0x121   : > { %8155 = vst [vmem:[#allocation15_spill] sm:$0xff] %v6254_v32  ;;  %v6257_v15 = vpop.f32.mrf.mxu1 }
 0x122   : > { %8156 = vst [vmem:[#allocation16_spill] sm:$0xff] %v6257_v15 }
 0x123   : > { %1243 = vmatmul.f32.vlgmr.msrb.gmra.mxu0 %v5978_v16  ;;  %1393 = vmatmul.f32.gmra.mxu1 %v5982_v20 }
 0x128   : > { %v6260_v1 = vpop.f32.mrf.mxu0 }
 0x129   : > { %8157 = vst [vmem:[#allocation17_spill] sm:$0xff] %v6260_v1  ;;  %v6263_v7 = vpop.f32.mrf.mxu1 }
 0x12a   : > { %8158 = vst [vmem:[#allocation18_spill] sm:$0xff] %v6263_v7 }
 0x12b   : > { %1247 = vmatmul.f32.gmra.mxu0 %v5982_v20  ;;  %1397 = vmatmul.f32.gmra.mxu1 %v5990_v29 }
 0x130   : > { %v6266_v25 = vpop.f32.mrf.mxu0 }
 0x131   : > { %8159 = vst [vmem:[#allocation19_spill] sm:$0xff] %v6266_v25  ;;  %v6269_v2 = vpop.f32.mrf.mxu1 }
 0x132   : > { %8160 = vst [vmem:[#allocation20_spill] sm:$0xff] %v6269_v2 }
 0x133   : > { %1251 = vmatmul.f32.gmra.mxu0 %v5990_v29  ;;  %1401 = vmatmul.f32.gmra.mxu1 %v5996_v38 }
 0x138   : > { %v6272_v16 = vpop.f32.mrf.mxu0 }
 0x139   : > { %8161 = vst [vmem:[#allocation21_spill] sm:$0xff] %v6272_v16  ;;  %v6275_v21 = vpop.f32.mrf.mxu1 }
 0x13a   : > { %8162 = vst [vmem:[#allocation22_spill] sm:$0xff] %v6275_v21 }
 0x13b   : > { %1255 = vmatmul.f32.gmra.mxu0 %v5996_v38  ;;  %1405 = vmatmul.f32.gmra.mxu1 %v6001_v46  ;;  %v6291_v38 = vpop.f32.mrf.mxu3 }
 0x140   : > { %v6278_v20 = vpop.f32.mrf.mxu0 }
 0x141   : > { %8163 = vst [vmem:[#allocation23_spill] sm:$0xff] %v6278_v20  ;;  %v6281_v53 = vpop.f32.mrf.mxu1 }
 0x142   : > { %8164 = vst [vmem:[#allocation24_spill] sm:$0xff] %v6281_v53 }
 0x143   : > { %1259 = vmatmul.f32.gmra.mxu0 %v6001_v46  ;;  %1409 = vmatmul.f32.gmra.mxu1 %v6009_v55  ;;  %v6304_v30 = vpop.f32.mrf.mxu3 }
 0x148   : > { %v6286_v29 = vpop.f32.mrf.mxu0 }
 0x149   : > { %8165 = vst [vmem:[#allocation25_spill] sm:$0xff] %v6286_v29  ;;  %v6289_v60 = vpop.f32.mrf.mxu1 }
 0x14a   : > { %8166 = vst [vmem:[#allocation26_spill] sm:$0xff] %v6289_v60 }
 0x14b   : > { %1263 = vmatmul.f32.gmra.mxu0 %v6009_v55  ;;  %1413 = vmatmul.f32.gmra.mxu1 %v6018_v0  ;;  %v6306_v55 = vpop.f32.mrf.mxu2 }
 0x14c   : > { %8170 = vst [vmem:[#allocation30_spill] sm:$0xff] %v6306_v55 }
 0x150   : > { %v6294_v54 = vpop.f32.mrf.mxu0 }
 0x151   : > { %8167 = vst [vmem:[#allocation27_spill] sm:$0xff] %v6294_v54  ;;  %v6299_v46 = vpop.f32.mrf.mxu1  ;;  %v6314_v54 = vpop.f32.mrf.mxu3 }
 0x152   : > { %8168 = vst [vmem:[#allocation28_spill] sm:$0xff] %v6299_v46 }
 0x153   : > { %1267 = vmatmul.f32.gmra.mxu0 %v6018_v0  ;;  %1417 = vmatmul.f32.gmra.mxu1 %v6024_v8  ;;  %8173 = vst [vmem:[#allocation33_spill] sm:$0xff] %v6314_v54  ;;  %v6319_v46 = vpop.f32.mrf.mxu2 }
 0x154   : > { %8175 = vst [vmem:[#allocation35_spill] sm:$0xff] %v6319_v46 }
 0x158   : > { %v6302_v6 = vpop.f32.mrf.mxu0 }
 0x159   : > { %8169 = vst [vmem:[#allocation29_spill] sm:$0xff] %v6302_v6  ;;  %v6309_v40 = vpop.f32.mrf.mxu1 }
 0x15a   : > { %8171 = vst [vmem:[#allocation31_spill] sm:$0xff] %v6309_v40  ;;  %v6327_v40 = vpop.f32.mrf.mxu3 }
 0x15b   : > { %1271 = vmatmul.f32.gmra.mxu0 %v6024_v8  ;;  %1421 = vmatmul.f32.gmra.mxu1 %v6030_v18  ;;  %8178 = vst [vmem:[#allocation38_spill] sm:$0xff] %v6327_v40  ;;  %v6329_v55 = vpop.f32.mrf.mxu2 }
 0x15c   : > { %8179 = vst [vmem:[#allocation39_spill] sm:$0xff] %v6329_v55 }
 0x160   : > { %v6312_v60 = vpop.f32.mrf.mxu0 }
 0x161   : > { %8172 = vst [vmem:[#allocation32_spill] sm:$0xff] %v6312_v60  ;;  %v6317_v0 = vpop.f32.mrf.mxu1 }
 0x162   : > { %8174 = vst [vmem:[#allocation34_spill] sm:$0xff] %v6317_v0  ;;  %v6337_v0 = vpop.f32.mrf.mxu3 }
 0x163   : > { %1275 = vmatmul.f32.gmra.mxu0 %v6030_v18  ;;  %1425 = vmatmul.f32.gmra.mxu1 %v6039_v28  ;;  %8182 = vst [vmem:[#allocation42_spill] sm:$0xff] %v6337_v0 }
 0x168   : > { %v6322_v6 = vpop.f32.mrf.mxu0 }
 0x169   : > { %8176 = vst [vmem:[#allocation36_spill] sm:$0xff] %v6322_v6  ;;  %v6325_v8 = vpop.f32.mrf.mxu1 }
 0x16a   : > { %8177 = vst [vmem:[#allocation37_spill] sm:$0xff] %v6325_v8 }
 0x16b   : > { %1279 = vmatmul.f32.gmra.mxu0 %v6039_v28  ;;  %1429 = vmatmul.f32.gmra.mxu1 %v6048_v37  ;;  %v6342_v28 = vpop.f32.mrf.mxu2 }
 0x16c   : > { %8184 = vst [vmem:[#allocation44_spill] sm:$0xff] %v6342_v28 }
 0x170   : > { %v6332_v60 = vpop.f32.mrf.mxu0 }
 0x171   : > { %8180 = vst [vmem:[#allocation40_spill] sm:$0xff] %v6332_v60  ;;  %v6335_v18 = vpop.f32.mrf.mxu1  ;;  %v6350_v60 = vpop.f32.mrf.mxu3 }
 0x172   : > { %8181 = vst [vmem:[#allocation41_spill] sm:$0xff] %v6335_v18 }
 0x173   : > { %1283 = vmatmul.f32.gmra.mxu0 %v6048_v37  ;;  %1433 = vmatmul.f32.gmra.mxu1 %v6054_v47  ;;  %8187 = vst [vmem:[#allocation47_spill] sm:$0xff] %v6350_v60  ;;  %v6352_v37 = vpop.f32.mrf.mxu2 }
 0x178   : > { %v6340_v6 = vpop.f32.mrf.mxu0 }
 0x179   : > { %8183 = vst [vmem:[#allocation43_spill] sm:$0xff] %v6340_v6  ;;  %v6345_v8 = vpop.f32.mrf.mxu1  ;;  %v6360_v0 = vpop.f32.mrf.mxu3 }
 0x17a   : > { %8185 = vst [vmem:[#allocation45_spill] sm:$0xff] %v6345_v8 }
 0x17b   : > { %1287 = vmatmul.f32.gmra.mxu0 %v6054_v47  ;;  %1437 = vmatmul.f32.gmra.mxu1 %v6060_v57  ;;  %v6365_v8 = vpop.f32.mrf.mxu2 }
 0x180   : > { %v6348_v55 = vpop.f32.mrf.mxu0 }
 0x181   : > { %8186 = vst [vmem:[#allocation46_spill] sm:$0xff] %v6348_v55  ;;  %v6355_v18 = vpop.f32.mrf.mxu1 }
 0x182   : > { %8188 = vst [vmem:[#allocation48_spill] sm:$0xff] %v6355_v18  ;;  %v6373_v18 = vpop.f32.mrf.mxu3 }
 0x183   : > { %1291 = vmatmul.f32.gmra.mxu0 %v6060_v57  ;;  %1441 = vmatmul.f32.gmra.mxu1 %v6069_v3  ;;  %v6375_v60 = vpop.f32.mrf.mxu2 }
 0x184   : > { %8193 = vst [vmem:[#allocation53_spill] sm:$0xff] %v6375_v60 }
 0x188   : > { %v6358_v6 = vpop.f32.mrf.mxu0 }
 0x189   : > { %8189 = vst [vmem:[#allocation49_spill] sm:$0xff] %v6358_v6  ;;  %v6363_v47 = vpop.f32.mrf.mxu1 }
 0x18a   : > { %8190 = vst [vmem:[#allocation50_spill] sm:$0xff] %v6363_v47 }
 0x18b   : > { %1295 = vmatmul.f32.gmra.mxu0 %v6069_v3  ;;  %1445 = vmatmul.f32.gmra.mxu1 %v6078_v13  ;;  %v1517_v3 = vld [vmem:[%s8082_s2] sm:$0xff]  ;;  %v6393_v54 = vpop.f32.mrf.mxu2 }
 0x18c   : > { %v1523_v47 = vsel %vm1521_vm1, %v1517_v3, 0  ;;  %8196 = vst [vmem:[#allocation56_spill] sm:$0xff] %v6393_v54 }
 0x190   : > { %v6368_v55 = vpop.f32.mrf.mxu0 }
 0x191   : > { %8191 = vst [vmem:[#allocation51_spill] sm:$0xff] %v6368_v55  ;;  %v6371_v57 = vpop.f32.mrf.mxu1  ;;  %v6385_v55 = vand.u32 4294901760, %v1523_v47 }
 0x192   : > { %8192 = vst [vmem:[#allocation52_spill] sm:$0xff] %v6371_v57  ;;  %v6387_v57 = vpop.f32.mrf.mxu3 }
 0x193   : > { %1299 = vmatmul.f32.gmra.mxu0 %v6078_v13  ;;  %1449 = vmatmul.f32.gmra.mxu1 %v6084_v23  ;;  %8195 = vst [vmem:[#allocation55_spill] sm:$0xff] %v6387_v57 }
 0x198   : > { %v6378_v6 = vpop.f32.mrf.mxu0 }
 0x199   : > { %8194 = vst [vmem:[#allocation54_spill] sm:$0xff] %v6378_v6  ;;  %v1390_v13 = vpop.f32.mrf.mxu1  ;;  %v1518_v6 = vld [vmem:[%s8082_s2 + $0x8] sm:$0xff] }
 0x19a   : > { %v1526_v46 = vsel %vm1521_vm1, %v1518_v6, 0 }
 0x19b   : > { %1303 = vmatmul.f32.gmra.mxu0 %v6084_v23  ;;  %1453 = vmatmul.f32.gmra.mxu1 %v6090_v35  ;;  %v6397_v23 = vsub.f32 %v1523_v47, %v6385_v55  ;;  %v6404_v21 = vand.u32 4294901760, %v1526_v46  ;;  %v6418_v47 = vpop.f32.mrf.mxu2 }
 0x19c   : > { %8199 = vst [vmem:[#allocation59_spill] sm:$0xff] %v6418_v47 }
 0x19d   : > { %v6402_v29 = vand.u32 4294901760, %v6397_v23 }
 0x19f   : > { %v1555_v6 = vsub.f32 %v6397_v23, %v6402_v29 }
 0x1a0   : > { %v1244_v28 = vpop.f32.mrf.mxu0 }
 0x1a1   : > { %v1245_v40 = vadd.f32 %v1244_v28, %v6113_v12  ;;  %v1394_v53 = vpop.f32.mrf.mxu1  ;;  %v1519_v12 = vld [vmem:[%s8082_s2 + $0x10] sm:$0xff]  ;;  %v6410_v28 = vpop.f32.mrf.mxu3 }
 0x1a2   : > { %8197 = vst [vmem:[#allocation57_spill] sm:$0xff] %v6410_v28  ;;  %v1529_v7 = vsel %vm1521_vm1, %v1519_v12, 0  ;;  %v6424_v28 = vand.u32 4294901760, %v1555_v6 }
 0x1a3   : > { %v1391_v3 = vadd.f32 %v1390_v13, %v1245_v40  ;;  %1307 = vmatmul.f32.gmra.mxu0 %v6090_v35  ;;  %1457 = vmatmul.f32.gmra.mxu1 %v6099_v45  ;;  %v6416_v40 = vsub.f32 %v1526_v46, %v6404_v21  ;;  %v6445_v60 = vpop.f32.mrf.mxu2 }
 0x1a4   : > { %8202 = vst [vmem:[#allocation62_spill] sm:$0xff] %v6445_v60 }
 0x1a5   : > { %v1550_v20 = vand.u32 4294901760, %v1391_v3  ;;  %8198 = vst [vmem:[#allocation58_spill] sm:$0xff] %v6416_v40 }
 0x1a7   : > { %v1606_v13 = vsub.f32 %v1391_v3, %v1550_v20 }
 0x1a8   : > { %v1248_v2 = vpop.f32.mrf.mxu0 }
 0x1a9   : > { %v1249_v35 = vadd.f32 %v1248_v2, %v6121_v36  ;;  %v6422_v25 = vpop.f32.mrf.mxu1  ;;  %v6427_v36 = vand.u32 4294901760, %v6416_v40  ;;  %v6429_v2 = vand.u32 4294901760, %v1529_v7  ;;  %v1607_v3 = vand.u32 4294901760, %v1606_v13 }
 0x1ab   : > { %v1395_v16 = vadd.f32 %v1394_v53, %v1249_v35  ;;  %1311 = vmatmul.f32.gmra.mxu0 %v6099_v45  ;;  %8200 = vst [vmem:[#allocation60_spill] sm:$0xff] %v6427_v36  ;;  %1461 = vmatmul.f32.gmra.mxu1 %v6108_v59  ;;  %v1520_v45 = vld [vmem:[%s8082_s2 + $0x18] sm:$0xff]  ;;  %v1563_v35 = vsub.f32 %v6416_v40, %v6427_v36 }
 0x1ac   : > { %v6439_v6 = vsub.f32 %v1529_v7, %v6429_v2  ;;  %v1608_v15 = vsub.f32 %v1606_v13, %v1607_v3  ;;  %v1532_v1 = vsel %vm1521_vm1, %v1520_v45, 0 }
 0x1ad   : > { %v1548_v54 = vand.u32 4294901760, %v1395_v16  ;;  %v6447_v49 = vand.u32 4294901760, %v1563_v35  ;;  %v6452_v32 = vand.u32 4294901760, %v1532_v1 }
 0x1ae   : > { %v6450_v7 = vand.u32 4294901760, %v6439_v6 }
 0x1af   : > { %v1600_v46 = vsub.f32 %v1395_v16, %v1548_v54  ;;  %1549 = vmatpush.msrb.mxu2 %v1548_v54  ;;  %v6441_v16 = vpop.f32.mrf.mxu3 }
 0x1b0   : > { %v1252_v53 = vpop.f32.mrf.mxu0  ;;  %8201 = vst [vmem:[#allocation61_spill] sm:$0xff] %v6441_v16 }
 0x1b1   : > { %1551 = vmatpush.msrb.mxu2 %v1550_v20  ;;  %v1601_v12 = vand.u32 4294901760, %v1600_v46  ;;  %v1402_v57 = vpop.f32.mrf.mxu1 }
 0x1b2   : > { %1557 = vmatmul.f32.vlgmr.msrb.gmra.mxu2 %v6424_v28 }
 0x1b3   : > { %1644 = vmatpush.msra.mxu2 %v1600_v46  ;;  %1315 = vmatmul.f32.gmra.mxu0 %v6108_v59  ;;  %v1602_v47 = vsub.f32 %v1600_v46, %v1601_v12  ;;  %v1609_v59 = vand.u32 4294901760, %v1608_v15 }
 0x1b4   : > { %1465 = vmatmul.f32.gmra.mxu1 %v6116_v17 }
 0x1b5   : > { %1647 = vmatpush.msra.mxu2 %v1606_v13  ;;  %v1603_v9 = vand.u32 4294901760, %v1602_v47  ;;  %v1571_v47 = vsub.f32 %v6439_v6, %v6450_v7  ;;  %v6460_v13 = vsub.f32 %v1532_v1, %v6452_v32 }
 0x1b7   : > { %1729 = vmatpush.msrb.mxu2 %v1601_v12  ;;  %1604 = vmatpush.msrb.mxu3 %v1603_v9  ;;  %v6463_v12 = vpop.f32.mrf.mxu3  ;;  %v6465_v9 = vand.u32 4294901760, %v1571_v47  ;;  %v6468_v15 = vand.u32 4294901760, %v6460_v13 }
 0x1b8   : > { %v1256_v46 = vpop.f32.mrf.mxu0  ;;  %8203 = vst [vmem:[#allocation63_spill] sm:$0xff] %v6463_v12 }
 0x1b9   : > { %1733 = vmatpush.msrb.mxu2 %v1607_v3  ;;  %1610 = vmatpush.msrb.mxu3 %v1609_v59  ;;  %v1406_v45 = vpop.f32.mrf.mxu1  ;;  %8204 = vst [vmem:[#allocation64_spill] sm:$0xff] %v6465_v9  ;;  %v6470_v3 = vpop.f32.mrf.mxu2  ;;  %v1257_v35 = vadd.f32 %v1256_v46, %v6143_v22 }
 0x1ba   : > { %1565 = vmatmul.f32.gmra.mxu2 %v6447_v49  ;;  %1612 = vmatmul.f32.vlgmr.msrb.gmra.mxu3 %v6385_v55  ;;  %8205 = vst [vmem:[#allocation65_spill] sm:$0xff] %v6470_v3 }
 0x1bb   : > { %1684 = vmatpush.msra.mxu3 %v1548_v54  ;;  %1319 = vmatmul.f32.gmra.mxu0 %v6116_v17  ;;  %v1579_v17 = vsub.f32 %v6460_v13, %v6468_v15  ;;  %v1403_v3 = vadd.f32 %v1402_v57, %v1257_v35 }
 0x1bc   : > { %1469 = vmatmul.f32.gmra.mxu1 %v6124_v24 }
 0x1bd   : > { %1686 = vmatpush.msra.mxu3 %v1550_v20  ;;  %v6481_v12 = vand.u32 4294901760, %v1579_v17 }
 0x1bf   : > { %1766 = vmatpush.msrb.mxu3 %v1548_v54  ;;  %v1253_v54 = vadd.f32 %v1252_v53, %v6132_v52 }
 0x1c0   : > { %v1260_v1 = vpop.f32.mrf.mxu0 }
 0x1c1   : > { %1768 = vmatpush.msrb.mxu3 %v1550_v20  ;;  %v1261_v59 = vadd.f32 %v1260_v1, %v6151_v50  ;;  %v1410_v47 = vpop.f32.mrf.mxu1  ;;  %v6483_v20 = vpop.f32.mrf.mxu3  ;;  %v1399_v22 = vadd.f32 %v6422_v25, %v1253_v54 }
 0x1c2   : > { %1573 = vmatmul.f32.gmra.mxu2 %v6465_v9  ;;  %1616 = vmatmul.f32.gmra.mxu3 %v6404_v21  ;;  %v6487_v16 = vpop.f32.mrf.mxu2  ;;  %v6489_v9 = vand.u32 4294901760, %v1403_v3 }
 0x1c3   : > { %1323 = vmatmul.f32.gmra.mxu0 %v6124_v24  ;;  %v1407_v46 = vadd.f32 %v1406_v45, %v1261_v59  ;;  %8206 = vst [vmem:[#allocation66_spill] sm:$0xff] %v6487_v16  ;;  %v6494_v52 = vand.u32 4294901760, %v1399_v22 }
 0x1c4   : > { %1473 = vmatmul.f32.gmra.mxu1 %v6135_v62  ;;  %v6500_v53 = vsub.f32 %v1403_v3, %v6489_v9 }
 0x1c5   : > { %v6497_v25 = vand.u32 4294901760, %v1407_v46  ;;  %v6505_v1 = vsub.f32 %v1399_v22, %v6494_v52 }
 0x1c6   : > { %v8089_v3 = vand.u32 4294901760, %v6500_v53 }
 0x1c7   : > { %v8091_v59 = vand.u32 4294901760, %v6505_v1 }
 0x1c8   : > { %v1264_v60 = vpop.f32.mrf.mxu0 }
 0x1c9   : > { %v1265_v24 = vadd.f32 %v1264_v60, %v6159_v14  ;;  %v1414_v57 = vpop.f32.mrf.mxu1  ;;  %v6512_v60 = vsub.f32 %v1407_v46, %v6497_v25  ;;  %v6515_v35 = vpop.f32.mrf.mxu3 }
 0x1ca   : > { %1581 = vmatmul.f32.gmra.mxu2 %v6481_v12  ;;  %1620 = vmatmul.f32.gmra.mxu3 %v6429_v2  ;;  %8207 = vst [vmem:[#allocation67_spill] sm:$0xff] %v6515_v35  ;;  %v6521_v54 = vpop.f32.mrf.mxu2 }
 0x1cb   : > { %v1411_v50 = vadd.f32 %v1410_v47, %v1265_v24  ;;  %1327 = vmatmul.f32.gmra.mxu0 %v6135_v62  ;;  %8208 = vst [vmem:[#allocation68_spill] sm:$0xff] %v6521_v54  ;;  %v8090_v47 = vand.u32 4294901760, %v6512_v60  ;;  %v1858_v24 = vsub.f32 %v6500_v53, %v8089_v3 }
 0x1cc   : > { %1477 = vmatmul.f32.gmra.mxu1 %v6146_v27 }
 0x1cd   : > { %v6502_v45 = vand.u32 4294901760, %v1411_v50 }
 0x1cf   : > { %v6508_v14 = vsub.f32 %v1411_v50, %v6502_v45  ;;  %2279 = vmatpush.msra.mxu1 %v6502_v45 }
 0x1d0   : > { %v1268_v62 = vpop.f32.mrf.mxu0 }
 0x1d1   : > { %v8088_v17 = vand.u32 4294901760, %v6508_v14  ;;  %2281 = vmatpush.msra.mxu1 %v6497_v25  ;;  %v1418_v22 = vpop.f32.mrf.mxu1  ;;  %v1269_v46 = vadd.f32 %v1268_v62, %v6170_v43  ;;  %v1859_v43 = vand.u32 4294901760, %v1858_v24  ;;  %v6543_v62 = vpop.f32.mrf.mxu3 }
 0x1d2   : > { %1624 = vmatmul.f32.gmra.mxu3 %v6452_v32  ;;  %1650 = vmatmul.f32.vlgmr.msra.gmra.mxu2 %v6397_v23  ;;  %v6549_v16 = vpop.f32.mrf.mxu2 }
 0x1d3   : > { %1331 = vmatmul.f32.gmra.mxu0 %v6146_v27  ;;  %1805 = vmatpush.msra.mxu2 %v6489_v9  ;;  %v1864_v27 = vsub.f32 %v6505_v1, %v8091_v59 }
 0x1d4   : > { %2242 = vmatpush.msra.mxu0 %v8088_v17  ;;  %1481 = vmatmul.f32.gmra.mxu1 %v6154_v33  ;;  %v1415_v17 = vadd.f32 %v1414_v57, %v1269_v46 }
 0x1d5   : > { %1807 = vmatpush.msra.mxu2 %v6494_v52 }
 0x1d6   : > { %2246 = vmatpush.msra.mxu0 %v8090_v47  ;;  %v1865_v47 = vand.u32 4294901760, %v1864_v27  ;;  %v6551_v59 = vand.u32 4294901760, %v1415_v17 }
 0x1d8   : > { %v1272_v50 = vpop.f32.mrf.mxu0  ;;  %8209 = vst [vmem:[#allocation69_spill] sm:$0xff] %v6551_v59 }
 0x1d9   : > { %v1273_v54 = vadd.f32 %v1272_v50, %v6183_v42  ;;  %v6547_v35 = vpop.f32.mrf.mxu1 }
 0x1da   : > { %1690 = vmatmul.f32.vlgmr.msra.gmra.mxu3 %v6402_v29  ;;  %1655 = vmatmul.f32.gmra.mxu2 %v6416_v40 }
 0x1db   : > { %v1419_v3 = vadd.f32 %v1418_v22, %v1273_v54  ;;  %1860 = vmatpush.msra.mxu3 %v1859_v43  ;;  %1335 = vmatmul.f32.gmra.mxu0 %v6154_v33  ;;  %v6561_v22 = vsub.f32 %v1415_v17, %v6551_v59 }
 0x1dc   : > { %1485 = vmatmul.f32.gmra.mxu1 %v6162_v19 }
 0x1dd   : > { %v6553_v57 = vand.u32 4294901760, %v1419_v3  ;;  %1866 = vmatpush.msra.mxu3 %v1865_v47  ;;  %8212 = vst [vmem:[#allocation72_spill] sm:$0xff] %v6561_v22  ;;  %v6571_v47 = vpop.f32.mrf.mxu2 }
 0x1df   : > { %8210 = vst [vmem:[#allocation70_spill] sm:$0xff] %v6553_v57  ;;  %v6556_v42 = vsub.f32 %v1419_v3, %v6553_v57  ;;  %2454 = vmatpush.msrb.mxu1 %v6553_v57  ;;  %v6569_v3 = vpop.f32.mrf.mxu3 }
 0x1e0   : > { %v1276_v54 = vpop.f32.mrf.mxu0 }
 0x1e1   : > { %8211 = vst [vmem:[#allocation71_spill] sm:$0xff] %v6556_v42  ;;  %2414 = vmatpush.msrb.mxu0 %v6556_v42  ;;  %2456 = vmatpush.msrb.mxu1 %v6551_v59  ;;  %v1426_v33 = vpop.f32.mrf.mxu1 }
 0x1e2   : > { %1696 = vmatmul.f32.gmra.mxu3 %v6427_v36  ;;  %1660 = vmatmul.f32.gmra.mxu2 %v6439_v6 }
 0x1e3   : > { %2417 = vmatpush.msrb.mxu0 %v6561_v22  ;;  %v740_v22 = vadd.f32 %v6178_v48, %v6188_v26 }
 0x1e4   : > { %1339 = vmatmul.f32.gmra.mxu0 %v6162_v19  ;;  %1489 = vmatmul.f32.gmra.mxu1 %v6173_v34 }
 0x1e5   : > { %v6584_v27 = vpop.f32.mrf.mxu2 }
 0x1e7   : > { %v6579_v24 = vpop.f32.mrf.mxu3 }
 0x1e8   : > { %v1280_v17 = vpop.f32.mrf.mxu0 }
 0x1e9   : > { %v6577_v46 = vpop.f32.mrf.mxu1 }
 0x1ea   : > { %1702 = vmatmul.f32.gmra.mxu3 %v6450_v7  ;;  %1665 = vmatmul.f32.gmra.mxu2 %v6460_v13 }
 0x1ec   : > { %1343 = vmatmul.f32.gmra.mxu0 %v6173_v34  ;;  %1493 = vmatmul.f32.gmra.mxu1 %v6186_v11 }
 0x1ed   : > { %v6599_v59 = vpop.f32.mrf.mxu2 }
 0x1ee   : > { %8214 = vst [vmem:[#allocation74_spill] sm:$0xff] %v6599_v59 }
 0x1ef   : > { %v6596_v43 = vpop.f32.mrf.mxu3 }
 0x1f0   : > { %v6582_v19 = vpop.f32.mrf.mxu0  ;;  %8213 = vst [vmem:[#allocation73_spill] sm:$0xff] %v6596_v43  ;;  %v896_v43 = vadd.f32 %v6283_v58, %v740_v22  ;;  %v764_v58 = vadd.f32 %v6241_v56, %v6244_v41 }
 0x1f1   : > { %v6590_v50 = vpop.f32.mrf.mxu1 }
 0x1f2   : > { %1708 = vmatmul.f32.gmra.mxu3 %v6468_v15  ;;  %1735 = vmatmul.f32.vlgmr.msrb.gmra.mxu2 %v6385_v55  ;;  %v1083_v26 = vadd.f32 %v6291_v38, %v896_v43 }
 0x1f3   : > { %1900 = vmatpush.msrb.mxu2 %v6500_v53 }
 0x1f4   : > { %1347 = vmatmul.f32.gmra.mxu0 %v6186_v11  ;;  %1497 = vmatmul.f32.gmra.mxu1 %v6196_v44  ;;  %v744_v11 = vadd.f32 %v6192_v5, %v6198_v51  ;;  %v1277_v22 = vadd.f32 %v1276_v54, %v1083_v26  ;;  %v768_v54 = vadd.f32 %v6246_v39, %v6249_v31  ;;  %v8221_v31 = vand.u32 4294901760, %v6500_v53 }
 0x1f5   : > { %1903 = vmatpush.msrb.mxu2 %v6505_v1  ;;  %v6624_v48 = vpop.f32.mrf.mxu2  ;;  %v8222_v26 = vand.u32 4294901760, %v6505_v1 }
 0x1f6   : > { %v901_v42 = vadd.f32 %v6296_v10, %v744_v11  ;;  %v931_v43 = vadd.f32 %v6365_v8, %v768_v54 }
 0x1f7   : > { %v6617_v5 = vpop.f32.mrf.mxu3 }
 0x1f8   : > { %v6594_v34 = vpop.f32.mrf.mxu0  ;;  %8215 = vst [vmem:[#allocation75_spill] sm:$0xff] %v6617_v5  ;;  %v1125_v8 = vadd.f32 %v6373_v18, %v931_v43  ;;  %v8226_v18 = vld [vmem:[#allocation53_spill] sm:$0xff] }
 0x1f9   : > { %v6606_v57 = vpop.f32.mrf.mxu1 }
 0x1fa   : > { %1770 = vmatmul.f32.vlgmr.msrb.gmra.mxu3 %v6385_v55  ;;  %1739 = vmatmul.f32.gmra.mxu2 %v6404_v21 }
 0x1fb   : > { %1940 = vmatpush.msrb.mxu3 %v6489_v9 }
 0x1fc   : > { %1351 = vmatmul.f32.gmra.mxu0 %v6196_v44  ;;  %1501 = vmatmul.f32.gmra.mxu1 %v6206_v61  ;;  %v1089_v44 = vadd.f32 %v6304_v30, %v901_v42  ;;  %v1423_v30 = vadd.f32 %v6547_v35, %v1277_v22 }
 0x1fd   : > { %1942 = vmatpush.msrb.mxu3 %v6494_v52 }
 0x1fe   : > { %v1281_v10 = vadd.f32 %v1280_v17, %v1089_v44 }
 0x1ff   : > { %v6637_v42 = vpop.f32.mrf.mxu3 }
 0x200   : > { %v6613_v59 = vpop.f32.mrf.mxu0  ;;  %v1427_v5 = vadd.f32 %v1426_v33, %v1281_v10  ;;  %v6644_v33 = vpop.f32.mrf.mxu2  ;;  %v8223_v10 = vld [vmem:[#allocation15_spill] sm:$0xff] }
 0x201   : > { %v6622_v51 = vpop.f32.mrf.mxu1 }
 0x202   : > { %1774 = vmatmul.f32.gmra.mxu3 %v6404_v21  ;;  %1743 = vmatmul.f32.gmra.mxu2 %v6429_v2  ;;  %v6639_v56 = vand.u32 4294901760, %v1427_v5 }
 0x204   : > { %1355 = vmatmul.f32.gmra.mxu0 %v6206_v61  ;;  %1505 = vmatmul.f32.gmra.mxu1 %v6216_v63  ;;  %v926_v61 = vadd.f32 %v6352_v37, %v764_v58  ;;  %8216 = vst [vmem:[#allocation76_spill] sm:$0xff] %v6639_v56  ;;  %v6647_v37 = vand.u32 4294901760, %v1423_v30  ;;  %v8224_v58 = vld [vmem:[#allocation14_spill] sm:$0xff] }
 0x205   : > { %v772_v22 = vadd.f32 %v8224_v58, %v8223_v10  ;;  %v8229_v10 = vld [vmem:[#allocation17_spill] sm:$0xff]  ;;  %v8230_v58 = vld [vmem:[#allocation16_spill] sm:$0xff] }
 0x206   : > { %v1119_v41 = vadd.f32 %v6360_v0, %v926_v61  ;;  %8217 = vst [vmem:[#allocation77_spill] sm:$0xff] %v6647_v37  ;;  %v6658_v39 = vsub.f32 %v1423_v30, %v6647_v37  ;;  %v8225_v30 = vld [vmem:[#allocation12_spill] sm:$0xff] }
 0x207   : > { %v6669_v61 = vpop.f32.mrf.mxu3  ;;  %v936_v54 = vadd.f32 %v8226_v18, %v772_v22 }
 0x208   : > { %v6630_v11 = vpop.f32.mrf.mxu0  ;;  %8220 = vst [vmem:[#allocation80_spill] sm:$0xff] %v6658_v39  ;;  %v8100_v53 = vand.u32 4294901760, %v6658_v39 }
 0x209   : > { %v1446_v38 = vpop.f32.mrf.mxu1 }
 0x20a   : > { %1778 = vmatmul.f32.gmra.mxu3 %v6429_v2  ;;  %1747 = vmatmul.f32.gmra.mxu2 %v6452_v32 }
 0x20c   : > { %1359 = vmatmul.f32.gmra.mxu0 %v6216_v63  ;;  %1509 = vmatmul.f32.gmra.mxu1 %v6226_v4  ;;  %v6650_v63 = vsub.f32 %v1427_v5, %v6639_v56 }
 0x20e   : > { %8218 = vst [vmem:[#allocation78_spill] sm:$0xff] %v6650_v63  ;;  %v8101_v5 = vand.u32 4294901760, %v6650_v63 }
 0x210   : > { %v1300_v17 = vpop.f32.mrf.mxu0  ;;  %v2629_v1 = vsub.f32 %v6650_v63, %v8101_v5  ;;  %v8242_v5 = vld [vmem:[#allocation20_spill] sm:$0xff] }
 0x211   : > { %v1301_v35 = vadd.f32 %v1300_v17, %v1119_v41  ;;  %v1450_v0 = vpop.f32.mrf.mxu1  ;;  %v6673_v41 = vpop.f32.mrf.mxu2 }
 0x212   : > { %1782 = vmatmul.f32.gmra.mxu3 %v6452_v32  ;;  %1813 = vmatmul.f32.vlgmr.msra.gmra.mxu2 %v6424_v28 }
 0x213   : > { %v6654_v44 = vadd.f32 %v1446_v38, %v1301_v35  ;;  %1985 = vmatpush.msra.mxu2 %v8221_v31  ;;  %v2635_v35 = vsub.f32 %v6658_v39, %v8100_v53  ;;  %v2630_v31 = vand.u32 4294901760, %v2629_v1  ;;  %v8241_v53 = vld [vmem:[#allocation21_spill] sm:$0xff] }
 0x214   : > { %1363 = vmatmul.f32.gmra.mxu0 %v6226_v4  ;;  %1513 = vmatmul.f32.gmra.mxu1 %v8225_v30 }
 0x215   : > { %8219 = vst [vmem:[#allocation79_spill] sm:$0xff] %v6654_v44  ;;  %1989 = vmatpush.msra.mxu2 %v8222_v26  ;;  %v8228_v26 = vld [vmem:[#allocation55_spill] sm:$0xff] }
 0x218   : > { %v1304_v38 = vpop.f32.mrf.mxu0 }
 0x219   : > { %v1305_v4 = vadd.f32 %v1304_v38, %v1125_v8  ;;  %v1454_v43 = vpop.f32.mrf.mxu1  ;;  %v1131_v8 = vadd.f32 %v8228_v26, %v936_v54  ;;  %v6693_v38 = vpop.f32.mrf.mxu3  ;;  %v8233_v54 = vld [vmem:[#allocation64_spill] sm:$0xff] }
 0x21a   : > { %1868 = vmatmul.f32.vlgmr.msra.gmra.mxu3 %v6385_v55  ;;  %1821 = vmatmul.f32.gmra.mxu2 %v6447_v49 }
 0x21b   : > { %v6680_v17 = vadd.f32 %v1450_v0, %v1305_v4  ;;  %2022 = vmatpush.msra.mxu3 %v6489_v9  ;;  %v776_v0 = vadd.f32 %v8230_v58, %v8229_v10  ;;  %v2636_v9 = vand.u32 4294901760, %v2635_v35  ;;  %v8231_v4 = vld [vmem:[#allocation56_spill] sm:$0xff]  ;;  %v8234_v35 = vld [vmem:[#allocation57_spill] sm:$0xff]  ;;  %v8235_v10 = vld [vmem:[#allocation19_spill] sm:$0xff] }
 0x21c   : > { %1367 = vmatmul.f32.gmra.mxu0 %v8225_v30  ;;  %2283 = vmatmul.f32.vlgmr.msra.gmra.mxu1 %v6385_v55 }
 0x21d   : > { %8227 = vst [vmem:[#allocation15_spill] sm:$0xff] %v6680_v17  ;;  %2024 = vmatpush.msra.mxu3 %v6494_v52  ;;  %2631 = vmatpush.msra.mxu1 %v2630_v31  ;;  %v941_v18 = vadd.f32 %v8231_v4, %v776_v0  ;;  %v6697_v52 = vpop.f32.mrf.mxu2 }
 0x21f   : > { %2637 = vmatpush.msra.mxu1 %v2636_v9  ;;  %v1137_v31 = vadd.f32 %v8234_v35, %v941_v18 }
 0x220   : > { %v1308_v22 = vpop.f32.mrf.mxu0 }
 0x221   : > { %v1309_v30 = vadd.f32 %v1308_v22, %v1131_v8  ;;  %v1458_v26 = vpop.f32.mrf.mxu1  ;;  %v8236_v8 = vld [vmem:[#allocation18_spill] sm:$0xff] }
 0x222   : > { %1872 = vmatmul.f32.gmra.mxu3 %v6404_v21  ;;  %1829 = vmatmul.f32.gmra.mxu2 %v8233_v54  ;;  %v780_v58 = vadd.f32 %v8236_v8, %v8235_v10  ;;  %v8240_v10 = vld [vmem:[#allocation61_spill] sm:$0xff] }
 0x223   : > { %v6699_v1 = vadd.f32 %v1454_v43, %v1309_v30  ;;  %v8237_v43 = vld [vmem:[#allocation59_spill] sm:$0xff]  ;;  %v6711_v30 = vpop.f32.mrf.mxu3 }
 0x224   : > { %2248 = vmatmul.f32.vlgmr.msra.gmra.mxu0 %v6385_v55  ;;  %2287 = vmatmul.f32.gmra.mxu1 %v6404_v21  ;;  %v946_v9 = vadd.f32 %v8237_v43, %v780_v58 }
 0x225   : > { %8232 = vst [vmem:[#allocation14_spill] sm:$0xff] %v6699_v1  ;;  %2576 = vmatpush.msra.mxu0 %v6639_v56  ;;  %v6717_v35 = vpop.f32.mrf.mxu2 }
 0x226   : > { %8239 = vst [vmem:[#allocation53_spill] sm:$0xff] %v6717_v35  ;;  %v1143_v8 = vadd.f32 %v8240_v10, %v946_v9 }
 0x227   : > { %2578 = vmatpush.msra.mxu0 %v6647_v37 }
 0x228   : > { %v1312_v0 = vpop.f32.mrf.mxu0 }
 0x229   : > { %v1313_v22 = vadd.f32 %v1312_v0, %v1137_v31  ;;  %v1462_v18 = vpop.f32.mrf.mxu1  ;;  %v784_v31 = vadd.f32 %v8242_v5, %v8241_v53  ;;  %v8246_v5 = vand.u32 4294901760, %v6508_v14 }
 0x22a   : > { %1876 = vmatmul.f32.gmra.mxu3 %v6429_v2  ;;  %1837 = vmatmul.f32.gmra.mxu2 %v6481_v12 }
 0x22b   : > { %v6713_v4 = vadd.f32 %v1458_v26, %v1313_v22  ;;  %v8243_v26 = vld [vmem:[#allocation62_spill] sm:$0xff]  ;;  %v6730_v10 = vpop.f32.mrf.mxu3  ;;  %v2115_v53 = vsub.f32 %v6508_v14, %v8246_v5  ;;  %v8251_v5 = vld [vmem:[#allocation65_spill] sm:$0xff] }
 0x22c   : > { %2252 = vmatmul.f32.gmra.mxu0 %v6404_v21  ;;  %2291 = vmatmul.f32.gmra.mxu1 %v6429_v2  ;;  %v951_v22 = vadd.f32 %v8243_v26, %v784_v31  ;;  %8245 = vst [vmem:[#allocation17_spill] sm:$0xff] %v6730_v10  ;;  %v8247_v31 = vld [vmem:[#allocation63_spill] sm:$0xff] }
 0x22d   : > { %8238 = vst [vmem:[#allocation12_spill] sm:$0xff] %v6713_v4  ;;  %v2116_v17 = vand.u32 4294901760, %v2115_v53  ;;  %v8253_v53 = vld [vmem:[#allocation25_spill] sm:$0xff] }
 0x230   : > { %v1316_v0 = vpop.f32.mrf.mxu0 }
 0x231   : > { %v1317_v58 = vadd.f32 %v1316_v0, %v1143_v8  ;;  %v1466_v9 = vpop.f32.mrf.mxu1  ;;  %v8248_v0 = vld [vmem:[#allocation23_spill] sm:$0xff] }
 0x232   : > { %1880 = vmatmul.f32.gmra.mxu3 %v6452_v32  ;;  %1906 = vmatmul.f32.vlgmr.msrb.gmra.mxu2 %v6397_v23 }
 0x233   : > { %v6725_v43 = vadd.f32 %v1462_v18, %v1317_v58  ;;  %2062 = vmatpush.msrb.mxu2 %v6502_v45  ;;  %v1149_v18 = vadd.f32 %v8247_v31, %v951_v22  ;;  %v8249_v58 = vld [vmem:[#allocation22_spill] sm:$0xff] }
 0x234   : > { %2256 = vmatmul.f32.gmra.mxu0 %v6429_v2  ;;  %v788_v26 = vadd.f32 %v8249_v58, %v8248_v0  ;;  %2295 = vmatmul.f32.gmra.mxu1 %v6452_v32 }
 0x235   : > { %8244 = vst [vmem:[#allocation55_spill] sm:$0xff] %v6725_v43  ;;  %v6735_v8 = vpop.f32.mrf.mxu2  ;;  %2064 = vmatpush.msrb.mxu2 %v6497_v25  ;;  %v8250_v43 = vand.u32 4294901760, %v6512_v60 }
 0x236   : > { %v956_v10 = vadd.f32 %v8251_v5, %v788_v26 }
 0x237   : > { %v2121_v1 = vsub.f32 %v6512_v60, %v8250_v43 }
 0x238   : > { %v1320_v4 = vpop.f32.mrf.mxu0 }
 0x239   : > { %v1321_v44 = vadd.f32 %v1320_v4, %v1149_v18  ;;  %v2122_v22 = vand.u32 4294901760, %v2121_v1  ;;  %v1470_v31 = vpop.f32.mrf.mxu1  ;;  %v1155_v4 = vadd.f32 %v6483_v20, %v956_v10  ;;  %v8254_v18 = vld [vmem:[#allocation24_spill] sm:$0xff]  ;;  %v8255_v1 = vld [vmem:[#allocation66_spill] sm:$0xff]  ;;  %v8257_v10 = vand.u32 4294901760, %v6650_v63 }
 0x23a   : > { %1946 = vmatmul.f32.vlgmr.msrb.gmra.mxu3 %v6402_v29  ;;  %1911 = vmatmul.f32.gmra.mxu2 %v6416_v40  ;;  %v792_v58 = vadd.f32 %v8254_v18, %v8253_v53  ;;  %v8259_v18 = vld [vmem:[#allocation27_spill] sm:$0xff]  ;;  %v8271_v63 = vld [vmem:[#allocation30_spill] sm:$0xff] }
 0x23b   : > { %v6747_v35 = vadd.f32 %v1466_v9, %v1321_v44  ;;  %2117 = vmatpush.msrb.mxu3 %v2116_v17 }
 0x23c   : > { %2260 = vmatmul.f32.gmra.mxu0 %v6452_v32  ;;  %2460 = vmatmul.f32.vlgmr.msrb.gmra.mxu1 %v6402_v29  ;;  %v961_v9 = vadd.f32 %v8255_v1, %v792_v58  ;;  %v8262_v1 = vld [vmem:[#allocation68_spill] sm:$0xff] }
 0x23d   : > { %8252 = vst [vmem:[#allocation16_spill] sm:$0xff] %v6747_v35  ;;  %2123 = vmatpush.msrb.mxu3 %v2122_v22  ;;  %v6751_v0 = vpop.f32.mrf.mxu2  ;;  %v6753_v43 = vpop.f32.mrf.mxu3  ;;  %2793 = vmatpush.msrb.mxu1 %v6639_v56  ;;  %v8266_v56 = vld [vmem:[#allocation6_spill] sm:$0xff] }
 0x23f   : > { %2795 = vmatpush.msrb.mxu1 %v6647_v37  ;;  %v8264_v37 = vld [vmem:[#allocation8_spill] sm:$0xff] }
 0x240   : > { %v1324_v44 = vpop.f32.mrf.mxu0 }
 0x241   : > { %v1325_v17 = vadd.f32 %v1324_v44, %v1155_v4  ;;  %v1474_v20 = vpop.f32.mrf.mxu1  ;;  %v8258_v4 = vld [vmem:[#allocation67_spill] sm:$0xff]  ;;  %v8260_v44 = vld [vmem:[#allocation26_spill] sm:$0xff] }
 0x242   : > { %1952 = vmatmul.f32.gmra.mxu3 %v6427_v36  ;;  %1916 = vmatmul.f32.gmra.mxu2 %v6439_v6  ;;  %v1161_v53 = vadd.f32 %v8258_v4, %v961_v9  ;;  %v796_v35 = vadd.f32 %v8260_v44, %v8259_v18  ;;  %v8265_v9 = vld [vmem:[#allocation7_spill] sm:$0xff] }
 0x243   : > { %v6763_v26 = vadd.f32 %v1470_v31, %v1325_v17  ;;  %v8261_v31 = vand.u32 4294901760, %v6658_v39  ;;  %v752_v4 = vadd.f32 %v8265_v9, %v8264_v37 }
 0x244   : > { %2420 = vmatmul.f32.vlgmr.msrb.gmra.mxu0 %v6397_v23  ;;  %2466 = vmatmul.f32.gmra.mxu1 %v6427_v36 }
 0x245   : > { %8256 = vst [vmem:[#allocation56_spill] sm:$0xff] %v6763_v26  ;;  %2756 = vmatpush.msrb.mxu0 %v8257_v10  ;;  %v6769_v5 = vpop.f32.mrf.mxu2  ;;  %v6771_v22 = vpop.f32.mrf.mxu3  ;;  %v966_v10 = vadd.f32 %v8262_v1, %v796_v35  ;;  %v8268_v35 = vld [vmem:[#allocation35_spill] sm:$0xff]  ;;  %v8270_v1 = vld [vmem:[#allocation28_spill] sm:$0xff] }
 0x247   : > { %2760 = vmatpush.msrb.mxu0 %v8261_v31  ;;  %v1167_v39 = vadd.f32 %v6543_v62, %v966_v10 }
 0x248   : > { %v1328_v58 = vpop.f32.mrf.mxu0 }
 0x249   : > { %v1329_v17 = vadd.f32 %v1328_v58, %v1161_v53  ;;  %v1478_v18 = vpop.f32.mrf.mxu1  ;;  %v8267_v53 = vld [vmem:[#allocation5_spill] sm:$0xff] }
 0x24a   : > { %1958 = vmatmul.f32.gmra.mxu3 %v6450_v7  ;;  %1921 = vmatmul.f32.gmra.mxu2 %v6460_v13  ;;  %v748_v58 = vadd.f32 %v8267_v53, %v8266_v56  ;;  %v8273_v56 = vld [vmem:[#allocation38_spill] sm:$0xff] }
 0x24b   : > { %v6781_v26 = vadd.f32 %v1474_v20, %v1329_v17  ;;  %v911_v20 = vadd.f32 %v8268_v35, %v752_v4  ;;  %v8269_v17 = vld [vmem:[#allocation29_spill] sm:$0xff] }
 0x24c   : > { %2425 = vmatmul.f32.gmra.mxu0 %v6416_v40  ;;  %2472 = vmatmul.f32.gmra.mxu1 %v6450_v7  ;;  %v906_v36 = vadd.f32 %v8271_v63, %v748_v58 }
 0x24d   : > { %8263 = vst [vmem:[#allocation64_spill] sm:$0xff] %v6781_v26  ;;  %v6787_v44 = vpop.f32.mrf.mxu2  ;;  %v6789_v31 = vpop.f32.mrf.mxu3  ;;  %v800_v26 = vadd.f32 %v8270_v1, %v8269_v17  ;;  %v1101_v53 = vadd.f32 %v8273_v56, %v911_v20 }
 0x24f   : > { %v971_v62 = vadd.f32 %v6549_v16, %v800_v26  ;;  %v1289_v63 = vadd.f32 %v6594_v34, %v1101_v53  ;;  %v8275_v16 = vld [vmem:[#allocation32_spill] sm:$0xff]  ;;  %v8276_v26 = vld [vmem:[#allocation31_spill] sm:$0xff]  ;;  %v8280_v53 = vld [vmem:[#allocation10_spill] sm:$0xff] }
 0x250   : > { %v1332_v37 = vpop.f32.mrf.mxu0 }
 0x251   : > { %v1333_v9 = vadd.f32 %v1332_v37, %v1167_v39  ;;  %v1482_v10 = vpop.f32.mrf.mxu1  ;;  %v8274_v39 = vld [vmem:[#allocation33_spill] sm:$0xff]  ;;  %v1173_v58 = vadd.f32 %v6569_v3, %v971_v62  ;;  %v1435_v1 = vadd.f32 %v6590_v50, %v1289_v63  ;;  %v8283_v63 = vld [vmem:[#allocation36_spill] sm:$0xff] }
 0x252   : > { %1964 = vmatmul.f32.gmra.mxu3 %v6468_v15  ;;  %1991 = vmatmul.f32.vlgmr.msra.gmra.mxu2 %v6385_v55  ;;  %v1095_v35 = vadd.f32 %v8274_v39, %v906_v36  ;;  %v8277_v36 = vld [vmem:[#allocation13_spill] sm:$0xff] }
 0x253   : > { %v6800_v40 = vadd.f32 %v1478_v18, %v1333_v9  ;;  %2157 = vmatpush.msra.mxu2 %v6508_v14  ;;  %v804_v14 = vadd.f32 %v8276_v26, %v8275_v16  ;;  %v8281_v62 = vld [vmem:[#allocation9_spill] sm:$0xff] }
 0x254   : > { %2430 = vmatmul.f32.gmra.mxu0 %v6439_v6  ;;  %2478 = vmatmul.f32.gmra.mxu1 %v6468_v15  ;;  %v1285_v20 = vadd.f32 %v6582_v19, %v1095_v35  ;;  %v756_v39 = vadd.f32 %v8281_v62, %v8280_v53 }
 0x255   : > { %8272 = vst [vmem:[#allocation57_spill] sm:$0xff] %v6800_v40  ;;  %v6807_v4 = vpop.f32.mrf.mxu3  ;;  %2160 = vmatpush.msra.mxu2 %v6512_v60  ;;  %v6812_v18 = vpop.f32.mrf.mxu2  ;;  %v8278_v60 = vld [vmem:[#allocation11_spill] sm:$0xff]  ;;  %v976_v3 = vadd.f32 %v6571_v47, %v804_v14  ;;  %v8282_v47 = vld [vmem:[#allocation44_spill] sm:$0xff] }
 0x256   : > { %v760_v34 = vadd.f32 %v8278_v60, %v8277_v36  ;;  %v1431_v9 = vadd.f32 %v6577_v46, %v1285_v20  ;;  %v8286_v14 = vld [vmem:[#allocation39_spill] sm:$0xff] }
 0x257   : > { %v916_v20 = vadd.f32 %v8286_v14, %v756_v39 }
 0x258   : > { %v1336_v17 = vpop.f32.mrf.mxu0  ;;  %v921_v46 = vadd.f32 %v8282_v47, %v760_v34  ;;  %v6844_v26 = vand.u32 4294901760, %v1431_v9 }
 0x259   : > { %v1337_v37 = vadd.f32 %v1336_v17, %v1173_v58  ;;  %v1486_v19 = vpop.f32.mrf.mxu1  ;;  %v8284_v58 = vld [vmem:[#allocation34_spill] sm:$0xff] }
 0x25a   : > { %2026 = vmatmul.f32.vlgmr.msra.gmra.mxu3 %v6385_v55  ;;  %1995 = vmatmul.f32.gmra.mxu2 %v6404_v21  ;;  %v808_v16 = vadd.f32 %v8284_v58, %v8283_v63  ;;  %8285 = vst [vmem:[#allocation18_spill] sm:$0xff] %v6844_v26  ;;  %v6860_v53 = vsub.f32 %v1431_v9, %v6844_v26  ;;  %v8292_v63 = vld [vmem:[#allocation37_spill] sm:$0xff] }
 0x25b   : > { %2197 = vmatpush.msra.mxu3 %v6502_v45  ;;  %v6827_v56 = vadd.f32 %v1482_v10, %v1337_v37  ;;  %v6835_v45 = vand.u32 4294901760, %v1435_v1  ;;  %v1179_v10 = vadd.f32 %v6579_v24, %v976_v3  ;;  %v8287_v24 = vld [vmem:[#allocation47_spill] sm:$0xff] }
 0x25c   : > { %2435 = vmatmul.f32.gmra.mxu0 %v6460_v13  ;;  %2639 = vmatmul.f32.vlgmr.msra.gmra.mxu1 %v6385_v55  ;;  %v1113_v36 = vadd.f32 %v8287_v24, %v921_v46  ;;  %v981_v60 = vadd.f32 %v6584_v27, %v808_v16  ;;  %v8290_v27 = vld [vmem:[#allocation73_spill] sm:$0xff]  ;;  %v8291_v46 = vld [vmem:[#allocation40_spill] sm:$0xff] }
 0x25d   : > { %8279 = vst [vmem:[#allocation19_spill] sm:$0xff] %v6827_v56  ;;  %2199 = vmatpush.msra.mxu3 %v6497_v25  ;;  %v6831_v50 = vpop.f32.mrf.mxu3  ;;  %v6837_v35 = vpop.f32.mrf.mxu2  ;;  %2968 = vmatpush.msra.mxu1 %v6835_v45  ;;  %v6851_v37 = vsub.f32 %v1435_v1, %v6835_v45  ;;  %v8289_v1 = vld [vmem:[#allocation42_spill] sm:$0xff]  ;;  %v812_v9 = vadd.f32 %v8292_v63, %v8291_v46 }
 0x25e   : > { %v1107_v39 = vadd.f32 %v8289_v1, %v916_v20  ;;  %v1297_v47 = vadd.f32 %v6630_v11, %v1113_v36  ;;  %v8293_v11 = vld [vmem:[#allocation74_spill] sm:$0xff] }
 0x25f   : > { %2970 = vmatpush.msra.mxu1 %v6844_v26  ;;  %v986_v20 = vadd.f32 %v8293_v11, %v812_v9 }
 0x260   : > { %v1293_v58 = vadd.f32 %v6613_v59, %v1107_v39 }
 0x261   : > { %v1340_v25 = vpop.f32.mrf.mxu0  ;;  %v1490_v3 = vpop.f32.mrf.mxu1 }
 0x262   : > { %v1341_v17 = vadd.f32 %v1340_v25, %v1179_v10  ;;  %2030 = vmatmul.f32.gmra.mxu3 %v6404_v21  ;;  %1999 = vmatmul.f32.gmra.mxu2 %v6429_v2  ;;  %v1443_v25 = vadd.f32 %v6622_v51, %v1297_v47  ;;  %v8295_v51 = vld [vmem:[#allocation75_spill] sm:$0xff] }
 0x263   : > { %v1191_v39 = vadd.f32 %v8295_v51, %v986_v20  ;;  %v8296_v47 = vld [vmem:[#allocation43_spill] sm:$0xff] }
 0x264   : > { %v6856_v34 = vadd.f32 %v1486_v19, %v1341_v17  ;;  %2584 = vmatmul.f32.vlgmr.msra.gmra.mxu0 %v6424_v28  ;;  %2643 = vmatmul.f32.gmra.mxu1 %v6404_v21  ;;  %v1185_v19 = vadd.f32 %v8290_v27, %v981_v60  ;;  %v1439_v17 = vadd.f32 %v6606_v57, %v1293_v58  ;;  %v6885_v59 = vand.u32 4294901760, %v1443_v25  ;;  %v8297_v27 = vld [vmem:[#allocation41_spill] sm:$0xff]  ;;  %v8298_v57 = vld [vmem:[#allocation71_spill] sm:$0xff] }
 0x265   : > { %2928 = vmatpush.msra.mxu0 %v6851_v37  ;;  %v6863_v62 = vpop.f32.mrf.mxu3  ;;  %v6867_v10 = vpop.f32.mrf.mxu2 }
 0x266   : > { %8288 = vst [vmem:[#allocation59_spill] sm:$0xff] %v6856_v34  ;;  %v6893_v46 = vand.u32 4294901760, %v1439_v17  ;;  %v6897_v9 = vsub.f32 %v1443_v25, %v6885_v59 }
 0x267   : > { %2931 = vmatpush.msra.mxu0 %v6860_v53 }
 0x268   : > { %v6904_v20 = vsub.f32 %v1439_v17, %v6893_v46 }
 0x269   : > { %v1344_v16 = vpop.f32.mrf.mxu0  ;;  %v1494_v36 = vpop.f32.mrf.mxu1 }
 0x26a   : > { %v1345_v14 = vadd.f32 %v1344_v16, %v1185_v19  ;;  %2034 = vmatmul.f32.gmra.mxu3 %v6429_v2  ;;  %2003 = vmatmul.f32.gmra.mxu2 %v6452_v32  ;;  %v816_v19 = vadd.f32 %v8297_v27, %v8296_v47  ;;  %v8299_v16 = vld [vmem:[#allocation72_spill] sm:$0xff]  ;;  %v8301_v47 = vld [vmem:[#allocation70_spill] sm:$0xff] }
 0x26c   : > { %v6880_v24 = vadd.f32 %v1490_v3, %v1345_v14  ;;  %2592 = vmatmul.f32.gmra.mxu0 %v6447_v49  ;;  %2647 = vmatmul.f32.gmra.mxu1 %v6429_v2  ;;  %v8118_v3 = vand.u32 4294901760, %v8298_v57  ;;  %v991_v11 = vadd.f32 %v6624_v48, %v816_v19  ;;  %v8302_v14 = vld [vmem:[#allocation69_spill] sm:$0xff]  ;;  %v1614_v48 = vadd.f32 %v6753_v43, %v6735_v8 }
 0x26d   : > { %v6883_v60 = vpop.f32.mrf.mxu3  ;;  %v6887_v1 = vpop.f32.mrf.mxu2  ;;  %v8306_v8 = vand.u32 4294901760, %v6897_v9 }
 0x26e   : > { %8294 = vst [vmem:[#allocation61_spill] sm:$0xff] %v6880_v24  ;;  %v1652_v24 = vadd.f32 %v6812_v18, %v1614_v48 }
 0x26f   : > { %v3143_v43 = vsub.f32 %v6897_v9, %v8306_v8 }
 0x271   : > { %v1348_v63 = vpop.f32.mrf.mxu0  ;;  %v1498_v25 = vpop.f32.mrf.mxu1 }
 0x272   : > { %v1349_v58 = vadd.f32 %v1348_v63, %v1191_v39  ;;  %2038 = vmatmul.f32.gmra.mxu3 %v6452_v32  ;;  %2070 = vmatmul.f32.vlgmr.msrb.gmra.mxu2 %v6424_v28  ;;  %v2372_v39 = vsub.f32 %v8298_v57, %v8118_v3  ;;  %v8304_v3 = vld [vmem:[#allocation46_spill] sm:$0xff]  ;;  %v3148_v63 = vand.u32 4294901760, %v6904_v20 }
 0x273   : > { %2319 = vmatpush.msrb.mxu2 %v8301_v47 }
 0x274   : > { %v6906_v51 = vadd.f32 %v1494_v36, %v1349_v58  ;;  %2600 = vmatmul.f32.gmra.mxu0 %v8233_v54  ;;  %2651 = vmatmul.f32.gmra.mxu1 %v6452_v32  ;;  %v8303_v36 = vand.u32 4294901760, %v8299_v16  ;;  %v1197_v58 = vadd.f32 %v6637_v42, %v991_v11  ;;  %v2373_v56 = vand.u32 4294901760, %v2372_v39  ;;  %v8309_v39 = vld [vmem:[#allocation48_spill] sm:$0xff] }
 0x275   : > { %v6913_v27 = vpop.f32.mrf.mxu3  ;;  %2321 = vmatpush.msrb.mxu2 %v8302_v14  ;;  %v1736_v17 = vpop.f32.mrf.mxu2 }
 0x276   : > { %8300 = vst [vmem:[#allocation21_spill] sm:$0xff] %v6906_v51  ;;  %v2378_v19 = vsub.f32 %v8299_v16, %v8303_v36  ;;  %v8305_v51 = vld [vmem:[#allocation45_spill] sm:$0xff]  ;;  %v1692_v36 = vadd.f32 %v6831_v50, %v1652_v24  ;;  %v3144_v50 = vand.u32 4294901760, %v3143_v43 }
 0x277   : > { %v820_v34 = vadd.f32 %v8305_v51, %v8304_v3 }
 0x278   : > { %v2379_v42 = vand.u32 4294901760, %v2378_v19  ;;  %v1737_v51 = vadd.f32 %v1736_v17, %v1692_v36 }
 0x279   : > { %v1352_v40 = vpop.f32.mrf.mxu0  ;;  %v996_v3 = vadd.f32 %v6644_v33, %v820_v34  ;;  %v1502_v18 = vpop.f32.mrf.mxu1  ;;  %v1618_v33 = vadd.f32 %v6771_v22, %v6751_v0 }
 0x27a   : > { %v1353_v26 = vadd.f32 %v1352_v40, %v1197_v58  ;;  %2125 = vmatmul.f32.vlgmr.msrb.gmra.mxu3 %v6385_v55  ;;  %2078 = vmatmul.f32.gmra.mxu2 %v6447_v49  ;;  %v3149_v40 = vsub.f32 %v6904_v20, %v3148_v63 }
 0x27b   : > { %2374 = vmatpush.msrb.mxu3 %v2373_v56  ;;  %v1203_v24 = vadd.f32 %v6669_v61, %v996_v3  ;;  %v1657_v19 = vadd.f32 %v6837_v35, %v1618_v33 }
 0x27c   : > { %v6936_v11 = vadd.f32 %v1498_v25, %v1353_v26  ;;  %2608 = vmatmul.f32.gmra.mxu0 %v6481_v12  ;;  %2797 = vmatmul.f32.vlgmr.msrb.gmra.mxu1 %v6385_v55  ;;  %v8308_v25 = vld [vmem:[#allocation49_spill] sm:$0xff]  ;;  %v3150_v17 = vand.u32 4294901760, %v3149_v40 }
 0x27d   : > { %2380 = vmatpush.msrb.mxu3 %v2379_v42  ;;  %v1771_v56 = vpop.f32.mrf.mxu3  ;;  %v1740_v26 = vpop.f32.mrf.mxu2  ;;  %v824_v48 = vadd.f32 %v8309_v39, %v8308_v25  ;;  %3145 = vmatpush.msrb.mxu1 %v3144_v50  ;;  %v1698_v0 = vadd.f32 %v6863_v62, %v1657_v19  ;;  %v1622_v42 = vadd.f32 %v6789_v31, %v6769_v5  ;;  %v8311_v62 = vld [vmem:[#allocation51_spill] sm:$0xff] }
 0x27e   : > { %8307 = vst [vmem:[#allocation20_spill] sm:$0xff] %v6936_v11  ;;  %v1772_v34 = vadd.f32 %v1771_v56, %v1737_v51 }
 0x27f   : > { %3151 = vmatpush.msrb.mxu1 %v3150_v17  ;;  %v1001_v61 = vadd.f32 %v6673_v41, %v824_v48  ;;  %v1741_v43 = vadd.f32 %v1740_v26, %v1698_v0  ;;  %v1662_v56 = vadd.f32 %v6867_v10, %v1622_v42  ;;  %v1626_v10 = vadd.f32 %v6807_v4, %v6787_v44  ;;  %v8314_v48 = vld [vmem:[#allocation54_spill] sm:$0xff]  ;;  %v8315_v17 = vld [vmem:[#allocation52_spill] sm:$0xff]  ;;  %v8316_v4 = vld [vmem:[#allocation53_spill] sm:$0xff] }
 0x280   : > { %1786 = vst.msk [vmem:[%s6945_s10] sm:$0xff] %vm1521_vm1, %v1772_v34  ;;  %v832_v19 = vadd.f32 %v8315_v17, %v8314_v48 }
 0x281   : > { %v1356_v58 = vpop.f32.mrf.mxu0  ;;  %v1506_v35 = vpop.f32.mrf.mxu1  ;;  %v1209_v41 = vadd.f32 %v6693_v38, %v1001_v61  ;;  %v1704_v5 = vadd.f32 %v6883_v60, %v1662_v56  ;;  %v8323_v56 = vld [vmem:[#allocation60_spill] sm:$0xff] }
 0x282   : > { %v1357_v8 = vadd.f32 %v1356_v58, %v1203_v24  ;;  %2129 = vmatmul.f32.gmra.mxu3 %v6404_v21  ;;  %2086 = vmatmul.f32.gmra.mxu2 %v8233_v54  ;;  %v1011_v0 = vadd.f32 %v8316_v4, %v832_v19  ;;  %v8331_v19 = vld [vmem:[#allocation79_spill] sm:$0xff] }
 0x284   : > { %v6960_v22 = vadd.f32 %v1502_v18, %v1357_v8  ;;  %2762 = vmatmul.f32.vlgmr.msrb.gmra.mxu0 %v6385_v55  ;;  %2801 = vmatmul.f32.gmra.mxu1 %v6404_v21  ;;  %v8312_v18 = vld [vmem:[#allocation50_spill] sm:$0xff] }
 0x285   : > { %3090 = vmatpush.msrb.mxu0 %v6885_v59  ;;  %v1775_v36 = vpop.f32.mrf.mxu3  ;;  %v1744_v3 = vpop.f32.mrf.mxu2  ;;  %v828_v51 = vadd.f32 %v8312_v18, %v8311_v62  ;;  %v8321_v62 = vld [vmem:[#allocation58_spill] sm:$0xff] }
 0x286   : > { %8310 = vst [vmem:[#allocation62_spill] sm:$0xff] %v6960_v22  ;;  %v1776_v40 = vadd.f32 %v1775_v36, %v1741_v43  ;;  %v1745_v38 = vadd.f32 %v1744_v3, %v1704_v5 }
 0x287   : > { %3092 = vmatpush.msrb.mxu0 %v6893_v46  ;;  %v1006_v31 = vadd.f32 %v6697_v52, %v828_v51  ;;  %v1667_v52 = vadd.f32 %v6887_v1, %v1626_v10  ;;  %v8327_v10 = vld [vmem:[#allocation76_spill] sm:$0xff] }
 0x288   : > { %1787 = vst.msk [vmem:[%s6945_s10 + $0x8] sm:$0xff] %vm1521_vm1, %v1776_v40 }
 0x289   : > { %v1360_v50 = vpop.f32.mrf.mxu0  ;;  %v1510_v39 = vpop.f32.mrf.mxu1  ;;  %v1215_v60 = vadd.f32 %v6711_v30, %v1006_v31  ;;  %v1710_v44 = vadd.f32 %v6913_v27, %v1667_v52  ;;  %v8318_v30 = vand.u32 4294901760, %v8298_v57  ;;  %v8320_v27 = vld [vmem:[#allocation17_spill] sm:$0xff]  ;;  %v8325_v31 = vld [vmem:[#allocation78_spill] sm:$0xff]  ;;  %v7063_v52 = vand.u32 4294901760, %v8331_v19 }
 0x28a   : > { %v1361_v33 = vadd.f32 %v1360_v50, %v1209_v41  ;;  %2133 = vmatmul.f32.gmra.mxu3 %v6429_v2  ;;  %2094 = vmatmul.f32.gmra.mxu2 %v6481_v12  ;;  %v1221_v3 = vadd.f32 %v8320_v27, %v1011_v0 }
 0x28b   : > { %8332 = vst [vmem:[#allocation25_spill] sm:$0xff] %v7063_v52 }
 0x28c   : > { %v6978_v26 = vadd.f32 %v1506_v35, %v1361_v33  ;;  %2766 = vmatmul.f32.gmra.mxu0 %v6404_v21  ;;  %2805 = vmatmul.f32.gmra.mxu1 %v6429_v2  ;;  %v8319_v35 = vand.u32 4294901760, %v8299_v16 }
 0x28d   : > { %v1779_v34 = vpop.f32.mrf.mxu3  ;;  %v1748_v24 = vpop.f32.mrf.mxu2 }
 0x28e   : > { %8313 = vst [vmem:[#allocation63_spill] sm:$0xff] %v6978_v26  ;;  %v1780_v25 = vadd.f32 %v1779_v34, %v1745_v38  ;;  %v1749_v1 = vadd.f32 %v1748_v24, %v1710_v44  ;;  %v8326_v38 = vld [vmem:[#allocation80_spill] sm:$0xff]  ;;  %v8328_v24 = vld [vmem:[#allocation77_spill] sm:$0xff]  ;;  %v7078_v44 = vsub.f32 %v8331_v19, %v7063_v52 }
 0x290   : > { %1788 = vst.msk [vmem:[%s6945_s10 + $0x10] sm:$0xff] %vm1521_vm1, %v1780_v25 }
 0x291   : > { %v1364_v58 = vpop.f32.mrf.mxu0  ;;  %v1514_v41 = vpop.f32.mrf.mxu1 }
 0x292   : > { %v1365_v8 = vadd.f32 %v1364_v58, %v1215_v60  ;;  %2137 = vmatmul.f32.gmra.mxu3 %v6452_v32  ;;  %2163 = vmatmul.f32.vlgmr.msra.gmra.mxu2 %v6397_v23  ;;  %v8329_v60 = vld [vmem:[#allocation15_spill] sm:$0xff] }
 0x293   : > { %2499 = vmatpush.msra.mxu2 %v8318_v30  ;;  %v7057_v48 = vand.u32 4294901760, %v8329_v60 }
 0x294   : > { %v6994_v61 = vadd.f32 %v1510_v39, %v1365_v8  ;;  %2770 = vmatmul.f32.gmra.mxu0 %v6429_v2  ;;  %2809 = vmatmul.f32.gmra.mxu1 %v6452_v32 }
 0x295   : > { %v1783_v43 = vpop.f32.mrf.mxu3  ;;  %2503 = vmatpush.msra.mxu2 %v8319_v35  ;;  %v7001_v42 = vpop.f32.mrf.mxu2  ;;  %8330 = vst [vmem:[#allocation65_spill] sm:$0xff] %v7057_v48  ;;  %v7070_v58 = vsub.f32 %v8329_v60, %v7057_v48  ;;  %v8333_v35 = vld [vmem:[#allocation12_spill] sm:$0xff] }
 0x296   : > { %8317 = vst [vmem:[#allocation23_spill] sm:$0xff] %v6994_v61  ;;  %v1784_v36 = vadd.f32 %v1783_v43, %v1749_v1  ;;  %v8336_v61 = vand.u32 4294901760, %v6860_v53 }
 0x298   : > { %1789 = vst.msk [vmem:[%s6945_s10 + $0x18] sm:$0xff] %vm1521_vm1, %v1784_v36  ;;  %v7095_v36 = vand.u32 4294901760, %v8333_v35 }
 0x299   : > { %v1368_v40 = vpop.f32.mrf.mxu0  ;;  %v7054_v25 = vpop.f32.mrf.mxu1 }
 0x29a   : > { %v1369_v57 = vadd.f32 %v1368_v40, %v1221_v3  ;;  %2203 = vmatmul.f32.vlgmr.msra.gmra.mxu3 %v6402_v29  ;;  %2168 = vmatmul.f32.gmra.mxu2 %v8321_v62  ;;  %v8334_v40 = vld [vmem:[#allocation14_spill] sm:$0xff] }
 0x29b   : > { %2536 = vmatpush.msra.mxu3 %v8301_v47  ;;  %v8324_v47 = vand.u32 4294901760, %v6897_v9 }
 0x29c   : > { %v7010_v16 = vadd.f32 %v1514_v41, %v1369_v57  ;;  %2774 = vmatmul.f32.gmra.mxu0 %v6452_v32  ;;  %2974 = vmatmul.f32.vlgmr.msra.gmra.mxu1 %v6402_v29  ;;  %v7103_v41 = vand.u32 4294901760, %v8334_v40  ;;  %v8129_v57 = vand.u32 4294901760, %v6851_v37 }
 0x29d   : > { %2538 = vmatpush.msra.mxu3 %v8302_v14  ;;  %v7014_v18 = vpop.f32.mrf.mxu3  ;;  %v7016_v51 = vpop.f32.mrf.mxu2  ;;  %3307 = vmatpush.msra.mxu1 %v6885_v59 }
 0x29e   : > { %8322 = vst [vmem:[#allocation22_spill] sm:$0xff] %v7010_v16  ;;  %v2892_v16 = vsub.f32 %v6860_v53, %v8336_v61 }
 0x29f   : > { %3309 = vmatpush.msra.mxu1 %v6893_v46 }
 0x2a1   : > { %v7073_v8 = vpop.f32.mrf.mxu0  ;;  %v7085_v30 = vpop.f32.mrf.mxu1 }
 0x2a2   : > { %2209 = vmatmul.f32.gmra.mxu3 %v8323_v56  ;;  %2173 = vmatmul.f32.gmra.mxu2 %v6439_v6 }
 0x2a4   : > { %2934 = vmatmul.f32.vlgmr.msra.gmra.mxu0 %v6397_v23  ;;  %2980 = vmatmul.f32.gmra.mxu1 %v8323_v56 }
 0x2a5   : > { %3270 = vmatpush.msra.mxu0 %v8324_v47  ;;  %v7026_v14 = vpop.f32.mrf.mxu3  ;;  %v7028_v50 = vpop.f32.mrf.mxu2  ;;  %v7108_v47 = vsub.f32 %v8333_v35, %v7095_v36  ;;  %v8335_v35 = vld [vmem:[#allocation18_spill] sm:$0xff] }
 0x2a7   : > { %3274 = vmatpush.msra.mxu0 %v3148_v63  ;;  %v8134_v19 = vand.u32 4294901760, %v7108_v47 }
 0x2a9   : > { %v7089_v1 = vpop.f32.mrf.mxu0  ;;  %v7100_v3 = vpop.f32.mrf.mxu1 }
 0x2aa   : > { %2215 = vmatmul.f32.gmra.mxu3 %v6450_v7  ;;  %2178 = vmatmul.f32.gmra.mxu2 %v6460_v13 }
 0x2ac   : > { %2939 = vmatmul.f32.gmra.mxu0 %v8321_v62  ;;  %2986 = vmatmul.f32.gmra.mxu1 %v6450_v7 }
 0x2ad   : > { %v7036_v33 = vpop.f32.mrf.mxu3  ;;  %v7038_v5 = vpop.f32.mrf.mxu2 }
 0x2b1   : > { %v7134_v22 = vpop.f32.mrf.mxu1 }
 0x2b2   : > { %2221 = vmatmul.f32.gmra.mxu3 %v6468_v15  ;;  %2327 = vmatmul.f32.vlgmr.msrb.gmra.mxu2 %v6424_v28  ;;  %8337 = vst [vmem:[#allocation24_spill] sm:$0xff] %v7134_v22 }
 0x2b3   : > { %2671 = vmatpush.msrb.mxu2 %v8325_v31 }
 0x2b4   : > { %2944 = vmatmul.f32.gmra.mxu0 %v6439_v6  ;;  %2992 = vmatmul.f32.gmra.mxu1 %v6468_v15 }
 0x2b5   : > { %v7045_v63 = vpop.f32.mrf.mxu3  ;;  %2674 = vmatpush.msrb.mxu2 %v8326_v38  ;;  %v1907_v34 = vpop.f32.mrf.mxu2  ;;  %v7115_v38 = vsub.f32 %v8334_v40, %v7103_v41  ;;  %v1870_v40 = vadd.f32 %v7014_v18, %v7001_v42  ;;  %v2893_v18 = vand.u32 4294901760, %v2892_v16 }
 0x2b7   : > { %v1908_v26 = vadd.f32 %v1907_v34, %v1870_v40 }
 0x2ba   : > { %2382 = vmatmul.f32.vlgmr.msrb.gmra.mxu3 %v6385_v55  ;;  %2335 = vmatmul.f32.gmra.mxu2 %v6447_v49 }
 0x2bb   : > { %2711 = vmatpush.msrb.mxu3 %v8327_v10  ;;  %v7119_v10 = vpop.f32.mrf.mxu0 }
 0x2bc   : > { %2949 = vmatmul.f32.gmra.mxu0 %v6460_v13  ;;  %3153 = vmatmul.f32.vlgmr.msrb.gmra.mxu1 %v6385_v55 }
 0x2bd   : > { %2713 = vmatpush.msrb.mxu3 %v8328_v24  ;;  %v1947_v39 = vpop.f32.mrf.mxu3  ;;  %v7059_v17 = vpop.f32.mrf.mxu2  ;;  %3482 = vmatpush.msrb.mxu1 %v7057_v48  ;;  %v2886_v24 = vsub.f32 %v6851_v37, %v8129_v57  ;;  %v3662_v57 = vand.u32 4294901760, %v7115_v38 }
 0x2be   : > { %v1948_v42 = vadd.f32 %v1947_v39, %v1908_v26  ;;  %v1874_v26 = vadd.f32 %v7026_v14, %v7016_v51 }
 0x2bf   : > { %3484 = vmatpush.msrb.mxu1 %v7063_v52  ;;  %v2887_v11 = vand.u32 4294901760, %v2886_v24  ;;  %v3657_v52 = vsub.f32 %v7108_v47, %v8134_v19  ;;  %v3663_v61 = vsub.f32 %v7115_v38, %v3662_v57 }
 0x2c0   : > { %v1913_v48 = vadd.f32 %v7059_v17, %v1874_v26  ;;  %v1878_v17 = vadd.f32 %v7036_v33, %v7028_v50 }
 0x2c1   : > { %v3658_v22 = vand.u32 4294901760, %v3657_v52  ;;  %v3664_v16 = vand.u32 4294901760, %v3663_v61  ;;  %v1882_v61 = vadd.f32 %v7045_v63, %v7038_v5 }
 0x2c2   : > { %2386 = vmatmul.f32.gmra.mxu3 %v6404_v21  ;;  %2343 = vmatmul.f32.gmra.mxu2 %v8233_v54 }
 0x2c3   : > { %v7146_v34 = vpop.f32.mrf.mxu0 }
 0x2c4   : > { %3098 = vmatmul.f32.vlgmr.msrb.gmra.mxu0 %v6424_v28  ;;  %3157 = vmatmul.f32.gmra.mxu1 %v6404_v21 }
 0x2c5   : > { %3442 = vmatpush.msrb.mxu0 %v7070_v58  ;;  %v1953_v4 = vpop.f32.mrf.mxu3  ;;  %v7081_v0 = vpop.f32.mrf.mxu2 }
 0x2c6   : > { %v1954_v52 = vadd.f32 %v1953_v4, %v1913_v48  ;;  %v1918_v4 = vadd.f32 %v7081_v0, %v1878_v17 }
 0x2c7   : > { %3445 = vmatpush.msrb.mxu0 %v7078_v44 }
 0x2ca   : > { %2390 = vmatmul.f32.gmra.mxu3 %v6429_v2  ;;  %2351 = vmatmul.f32.gmra.mxu2 %v6481_v12 }
 0x2cb   : > { %v7159_v51 = vpop.f32.mrf.mxu0 }
 0x2cc   : > { %3106 = vmatmul.f32.gmra.mxu0 %v6447_v49  ;;  %3161 = vmatmul.f32.gmra.mxu1 %v6429_v2 }
 0x2cd   : > { %v7092_v43 = vpop.f32.mrf.mxu3  ;;  %v7097_v27 = vpop.f32.mrf.mxu2 }
 0x2d2   : > { %2394 = vmatmul.f32.gmra.mxu3 %v6452_v32  ;;  %2505 = vmatmul.f32.vlgmr.msra.gmra.mxu2 %v6385_v55 }
 0x2d3   : > { %2833 = vmatpush.msra.mxu2 %v6835_v45  ;;  %v7175_v50 = vpop.f32.mrf.mxu0 }
 0x2d4   : > { %3114 = vmatmul.f32.gmra.mxu0 %v8233_v54  ;;  %3165 = vmatmul.f32.gmra.mxu1 %v6452_v32 }
 0x2d5   : > { %v7124_v60 = vpop.f32.mrf.mxu3  ;;  %2835 = vmatpush.msra.mxu2 %v8335_v35  ;;  %v1992_v31 = vpop.f32.mrf.mxu2 }
 0x2d6   : > { %v1993_v24 = vadd.f32 %v1992_v31, %v1948_v42  ;;  %v1960_v42 = vadd.f32 %v7092_v43, %v1918_v4  ;;  %v1923_v43 = vadd.f32 %v7097_v27, %v1882_v61 }
 0x2d8   : > { %v1966_v26 = vadd.f32 %v7124_v60, %v1923_v43 }
 0x2da   : > { %2540 = vmatmul.f32.vlgmr.msra.gmra.mxu3 %v6385_v55  ;;  %2509 = vmatmul.f32.gmra.mxu2 %v6404_v21 }
 0x2db   : > { %2888 = vmatpush.msra.mxu3 %v2887_v11  ;;  %v7151_v11 = vpop.f32.mrf.mxu1  ;;  %v7191_v5 = vpop.f32.mrf.mxu0 }
 0x2dc   : > { %3122 = vmatmul.f32.gmra.mxu0 %v6481_v12  ;;  %3311 = vmatmul.f32.vlgmr.msra.gmra.mxu1 %v6385_v55 }
 0x2dd   : > { %2894 = vmatpush.msra.mxu3 %v2893_v18  ;;  %v2027_v40 = vpop.f32.mrf.mxu3  ;;  %v1996_v39 = vpop.f32.mrf.mxu2  ;;  %3659 = vmatpush.msra.mxu1 %v3658_v22 }
 0x2de   : > { %v2028_v19 = vadd.f32 %v2027_v40, %v1993_v24  ;;  %v1997_v14 = vadd.f32 %v1996_v39, %v1954_v52  ;;  %v8338_v39 = vand.u32 4294901760, %v6851_v37  ;;  %v8339_v52 = vand.u32 4294901760, %v6860_v53 }
 0x2df   : > { %3665 = vmatpush.msra.mxu1 %v3664_v16 }
 0x2e0   : > { %5763 = vst.msk [vmem:[%s6945_s10 + $0x20] sm:$0xff] %vm1521_vm1, %v2028_v19 }
 0x2e2   : > { %2544 = vmatmul.f32.gmra.mxu3 %v6404_v21  ;;  %2513 = vmatmul.f32.gmra.mxu2 %v6429_v2 }
 0x2e3   : > { %v7166_v48 = vpop.f32.mrf.mxu1  ;;  %v7204_v37 = vpop.f32.mrf.mxu0 }
 0x2e4   : > { %3276 = vmatmul.f32.vlgmr.msra.gmra.mxu0 %v6385_v55  ;;  %3315 = vmatmul.f32.gmra.mxu1 %v6404_v21 }
 0x2e5   : > { %3604 = vmatpush.msra.mxu0 %v7095_v36  ;;  %v2031_v22 = vpop.f32.mrf.mxu3  ;;  %v2000_v31 = vpop.f32.mrf.mxu2 }
 0x2e6   : > { %v2032_v19 = vadd.f32 %v2031_v22, %v1997_v14  ;;  %v2001_v33 = vadd.f32 %v2000_v31, %v1960_v42  ;;  %v8340_v31 = vand.u32 4294901760, %v7108_v47 }
 0x2e7   : > { %3606 = vmatpush.msra.mxu0 %v7103_v41 }
 0x2e8   : > { %5764 = vst.msk [vmem:[%s6945_s10 + $0x28] sm:$0xff] %vm1521_vm1, %v2032_v19 }
 0x2ea   : > { %2548 = vmatmul.f32.gmra.mxu3 %v6429_v2  ;;  %2517 = vmatmul.f32.gmra.mxu2 %v6452_v32 }
 0x2eb   : > { %v7180_v0 = vpop.f32.mrf.mxu1 }
 0x2ec   : > { %3280 = vmatmul.f32.gmra.mxu0 %v6404_v21  ;;  %3319 = vmatmul.f32.gmra.mxu1 %v6429_v2 }
 0x2ed   : > { %v2035_v18 = vpop.f32.mrf.mxu3  ;;  %v2004_v24 = vpop.f32.mrf.mxu2 }
 0x2ee   : > { %v2036_v40 = vadd.f32 %v2035_v18, %v2001_v33  ;;  %v2005_v63 = vadd.f32 %v2004_v24, %v1966_v26 }
 0x2f0   : > { %5765 = vst.msk [vmem:[%s6945_s10 + $0x30] sm:$0xff] %vm1521_vm1, %v2036_v40 }
 0x2f2   : > { %2552 = vmatmul.f32.gmra.mxu3 %v6452_v32  ;;  %2677 = vmatmul.f32.vlgmr.msrb.gmra.mxu2 %v6397_v23 }
 0x2f3   : > { %3013 = vmatpush.msrb.mxu2 %v8338_v39  ;;  %v7196_v22 = vpop.f32.mrf.mxu1 }
 0x2f4   : > { %3284 = vmatmul.f32.gmra.mxu0 %v6429_v2  ;;  %3323 = vmatmul.f32.gmra.mxu1 %v6452_v32 }
 0x2f5   : > { %v2039_v16 = vpop.f32.mrf.mxu3  ;;  %3017 = vmatpush.msrb.mxu2 %v8339_v52  ;;  %v2071_v14 = vpop.f32.mrf.mxu2 }
 0x2f6   : > { %v2040_v27 = vadd.f32 %v2039_v16, %v2005_v63 }
 0x2f8   : > { %5766 = vst.msk [vmem:[%s6945_s10 + $0x38] sm:$0xff] %vm1521_vm1, %v2040_v27 }
 0x2fa   : > { %2717 = vmatmul.f32.vlgmr.msrb.gmra.mxu3 %v6402_v29  ;;  %2682 = vmatmul.f32.gmra.mxu2 %v8321_v62 }
 0x2fb   : > { %3050 = vmatpush.msrb.mxu3 %v6835_v45  ;;  %v2640_v17 = vpop.f32.mrf.mxu1  ;;  %v2585_v45 = vpop.f32.mrf.mxu0 }
 0x2fc   : > { %3288 = vmatmul.f32.gmra.mxu0 %v6452_v32  ;;  %3488 = vmatmul.f32.vlgmr.msrb.gmra.mxu1 %v6402_v29 }
 0x2fd   : > { %3052 = vmatpush.msrb.mxu3 %v8335_v35  ;;  %v2126_v53 = vpop.f32.mrf.mxu3  ;;  %v2079_v60 = vpop.f32.mrf.mxu2  ;;  %3821 = vmatpush.msrb.mxu1 %v7095_v36  ;;  %v7215_v35 = vadd.f32 %v2640_v17, %v2585_v45  ;;  %v8341_v17 = vld [vmem:[#allocation16_spill] sm:$0xff] }
 0x2fe   : > { %v2127_v16 = vadd.f32 %v2126_v53, %v2071_v14  ;;  %v7244_v45 = vand.u32 4294901760, %v8341_v17 }
 0x2ff   : > { %3823 = vmatpush.msrb.mxu1 %v7103_v41 }
 0x302   : > { %2723 = vmatmul.f32.gmra.mxu3 %v8323_v56  ;;  %2687 = vmatmul.f32.gmra.mxu2 %v6439_v6 }
 0x303   : > { %v2644_v42 = vpop.f32.mrf.mxu1  ;;  %v2593_v33 = vpop.f32.mrf.mxu0 }
 0x304   : > { %3448 = vmatmul.f32.vlgmr.msrb.gmra.mxu0 %v6397_v23  ;;  %3494 = vmatmul.f32.gmra.mxu1 %v8323_v56  ;;  %v7223_v18 = vadd.f32 %v2644_v42, %v2593_v33 }
 0x305   : > { %3784 = vmatpush.msrb.mxu0 %v8340_v31  ;;  %v2130_v19 = vpop.f32.mrf.mxu3  ;;  %v2087_v4 = vpop.f32.mrf.mxu2 }
 0x306   : > { %v2131_v33 = vadd.f32 %v2130_v19, %v2079_v60 }
 0x307   : > { %3788 = vmatpush.msrb.mxu0 %v3662_v57 }
 0x30a   : > { %2729 = vmatmul.f32.gmra.mxu3 %v6450_v7  ;;  %2692 = vmatmul.f32.gmra.mxu2 %v6460_v13 }
 0x30b   : > { %v2648_v40 = vpop.f32.mrf.mxu1  ;;  %v2601_v57 = vpop.f32.mrf.mxu0 }
 0x30c   : > { %3453 = vmatmul.f32.gmra.mxu0 %v8321_v62  ;;  %3500 = vmatmul.f32.gmra.mxu1 %v6450_v7  ;;  %v7232_v43 = vadd.f32 %v2648_v40, %v2601_v57  ;;  %v7259_v57 = vsub.f32 %v8341_v17, %v7244_v45 }
 0x30d   : > { %v2134_v61 = vpop.f32.mrf.mxu3  ;;  %v7225_v24 = vpop.f32.mrf.mxu2 }
 0x312   : > { %2735 = vmatmul.f32.gmra.mxu3 %v6468_v15  ;;  %2841 = vmatmul.f32.vlgmr.msra.gmra.mxu2 %v6424_v28 }
 0x313   : > { %3185 = vmatpush.msra.mxu2 %v6897_v9  ;;  %v2652_v63 = vpop.f32.mrf.mxu1  ;;  %v2609_v9 = vpop.f32.mrf.mxu0 }
 0x314   : > { %3458 = vmatmul.f32.gmra.mxu0 %v6439_v6  ;;  %3506 = vmatmul.f32.gmra.mxu1 %v6468_v15  ;;  %v7241_v27 = vadd.f32 %v2652_v63, %v2609_v9 }
 0x315   : > { %v2138_v26 = vpop.f32.mrf.mxu3  ;;  %3188 = vmatpush.msra.mxu2 %v6904_v20  ;;  %v2164_v39 = vpop.f32.mrf.mxu2 }
 0x316   : > { %v2165_v52 = vadd.f32 %v2164_v39, %v2127_v16 }
 0x31a   : > { %2896 = vmatmul.f32.vlgmr.msra.gmra.mxu3 %v6385_v55  ;;  %2849 = vmatmul.f32.gmra.mxu2 %v6447_v49 }
 0x31b   : > { %3225 = vmatpush.msra.mxu3 %v6885_v59  ;;  %v7247_v14 = vpop.f32.mrf.mxu1  ;;  %v8342_v59 = vld [vmem:[#allocation55_spill] sm:$0xff]  ;;  %v7263_v39 = vpop.f32.mrf.mxu0 }
 0x31c   : > { %3463 = vmatmul.f32.gmra.mxu0 %v6460_v13  ;;  %3667 = vmatmul.f32.vlgmr.msra.gmra.mxu1 %v6385_v55  ;;  %v7250_v53 = vand.u32 4294901760, %v8342_v59 }
 0x31d   : > { %3227 = vmatpush.msra.mxu3 %v6893_v46  ;;  %v2204_v20 = vpop.f32.mrf.mxu3  ;;  %v2169_v31 = vpop.f32.mrf.mxu2  ;;  %3996 = vmatpush.msra.mxu1 %v7244_v45 }
 0x31e   : > { %v2205_v42 = vadd.f32 %v2204_v20, %v2165_v52  ;;  %8343 = vst [vmem:[#allocation66_spill] sm:$0xff] %v7250_v53  ;;  %v2170_v63 = vadd.f32 %v2169_v31, %v2131_v33  ;;  %v2135_v52 = vadd.f32 %v2134_v61, %v2087_v4 }
 0x31f   : > { %3998 = vmatpush.msra.mxu1 %v7250_v53 }
 0x320   : > { %v2250_v46 = vadd.f32 %v7073_v8, %v2205_v42  ;;  %v7269_v8 = vsub.f32 %v8342_v59, %v7250_v53  ;;  %v8344_v59 = vld [vmem:[#allocation64_spill] sm:$0xff] }
 0x322   : > { %2900 = vmatmul.f32.gmra.mxu3 %v6404_v21  ;;  %v2285_v40 = vadd.f32 %v7054_v25, %v2250_v46  ;;  %2857 = vmatmul.f32.gmra.mxu2 %v8233_v54  ;;  %v7286_v46 = vand.u32 4294901760, %v8344_v59 }
 0x323   : > { %v7274_v16 = vpop.f32.mrf.mxu1  ;;  %v7281_v17 = vpop.f32.mrf.mxu0 }
 0x324   : > { %3612 = vmatmul.f32.vlgmr.msra.gmra.mxu0 %v6424_v28  ;;  %5767 = vst.msk [vmem:[%s6945_s10 + $0x40] sm:$0xff] %vm1521_vm1, %v2285_v40  ;;  %3671 = vmatmul.f32.gmra.mxu1 %v6404_v21 }
 0x325   : > { %3956 = vmatpush.msra.mxu0 %v7259_v57  ;;  %v2210_v25 = vpop.f32.mrf.mxu3  ;;  %v2174_v60 = vpop.f32.mrf.mxu2 }
 0x326   : > { %v2211_v19 = vadd.f32 %v2210_v25, %v2170_v63  ;;  %v2175_v31 = vadd.f32 %v2174_v60, %v2135_v52  ;;  %v8137_v63 = vand.u32 4294901760, %v7070_v58  ;;  %v7298_v25 = vsub.f32 %v8344_v59, %v7286_v46 }
 0x327   : > { %3959 = vmatpush.msra.mxu0 %v7269_v8  ;;  %v2139_v60 = vadd.f32 %v2138_v26, %v7225_v24 }
 0x328   : > { %v2254_v9 = vadd.f32 %v7089_v1, %v2211_v19  ;;  %v8140_v26 = vand.u32 4294901760, %v7298_v25 }
 0x32a   : > { %2904 = vmatmul.f32.gmra.mxu3 %v6429_v2  ;;  %v2289_v20 = vadd.f32 %v7085_v30, %v2254_v9  ;;  %2865 = vmatmul.f32.gmra.mxu2 %v6481_v12  ;;  %v8345_v30 = vld [vmem:[#allocation56_spill] sm:$0xff]  ;;  %v3405_v9 = vand.u32 4294901760, %v7078_v44 }
 0x32b   : > { %v7289_v4 = vpop.f32.mrf.mxu1  ;;  %v7292_v61 = vand.u32 4294901760, %v8345_v30 }
 0x32c   : > { %3620 = vmatmul.f32.gmra.mxu0 %v6447_v49  ;;  %5768 = vst.msk [vmem:[%s6945_s10 + $0x48] sm:$0xff] %vm1521_vm1, %v2289_v20  ;;  %3675 = vmatmul.f32.gmra.mxu1 %v6429_v2  ;;  %v7311_v20 = vpop.f32.mrf.mxu0 }
 0x32d   : > { %v2216_v42 = vpop.f32.mrf.mxu3  ;;  %v2179_v33 = vpop.f32.mrf.mxu2  ;;  %v7307_v52 = vsub.f32 %v8345_v30, %v7292_v61  ;;  %v3406_v30 = vsub.f32 %v7078_v44, %v3405_v9 }
 0x32e   : > { %v2217_v1 = vadd.f32 %v2216_v42, %v2175_v31  ;;  %v2180_v31 = vadd.f32 %v2179_v33, %v2139_v60  ;;  %v8347_v42 = vld [vmem:[#allocation25_spill] sm:$0xff] }
 0x32f   : > { %v8141_v33 = vand.u32 4294901760, %v7307_v52  ;;  %v3407_v53 = vand.u32 4294901760, %v3406_v30 }
 0x330   : > { %v2258_v40 = vadd.f32 %v7119_v10, %v2217_v1  ;;  %v8346_v10 = vld [vmem:[#allocation65_spill] sm:$0xff] }
 0x331   : > { %v4177_v44 = vsub.f32 %v7307_v52, %v8141_v33 }
 0x332   : > { %2908 = vmatmul.f32.gmra.mxu3 %v6452_v32  ;;  %v2293_v19 = vadd.f32 %v7100_v3, %v2258_v40  ;;  %3019 = vmatmul.f32.vlgmr.msrb.gmra.mxu2 %v6385_v55  ;;  %v3400_v3 = vsub.f32 %v7070_v58, %v8137_v63  ;;  %v4171_v63 = vsub.f32 %v7298_v25, %v8140_v26 }
 0x333   : > { %3347 = vmatpush.msrb.mxu2 %v8346_v10  ;;  %v7322_v40 = vpop.f32.mrf.mxu1  ;;  %v4178_v30 = vand.u32 4294901760, %v4177_v44 }
 0x334   : > { %3628 = vmatmul.f32.gmra.mxu0 %v8233_v54  ;;  %5769 = vst.msk [vmem:[%s6945_s10 + $0x50] sm:$0xff] %vm1521_vm1, %v2293_v19  ;;  %3679 = vmatmul.f32.gmra.mxu1 %v6452_v32  ;;  %v3401_v19 = vand.u32 4294901760, %v3400_v3 }
 0x335   : > { %v2222_v24 = vpop.f32.mrf.mxu3  ;;  %3349 = vmatpush.msrb.mxu2 %v8347_v42  ;;  %v2328_v1 = vpop.f32.mrf.mxu2  ;;  %8348 = vst [vmem:[#allocation67_spill] sm:$0xff] %v7322_v40 }
 0x336   : > { %v2223_v59 = vadd.f32 %v2222_v24, %v2180_v31  ;;  %v8349_v31 = vld [vmem:[#allocation24_spill] sm:$0xff] }
 0x338   : > { %v2262_v60 = vadd.f32 %v7146_v34, %v2223_v59  ;;  %v7336_v34 = vpop.f32.mrf.mxu0  ;;  %v4172_v59 = vand.u32 4294901760, %v4171_v63 }
 0x33a   : > { %3054 = vmatmul.f32.vlgmr.msrb.gmra.mxu3 %v6385_v55  ;;  %v2297_v24 = vadd.f32 %v8349_v31, %v2262_v60  ;;  %3023 = vmatmul.f32.gmra.mxu2 %v6404_v21 }
 0x33b   : > { %3402 = vmatpush.msrb.mxu3 %v3401_v19  ;;  %v7341_v60 = vpop.f32.mrf.mxu1 }
 0x33c   : > { %3636 = vmatmul.f32.gmra.mxu0 %v6481_v12  ;;  %5770 = vst.msk [vmem:[%s6945_s10 + $0x58] sm:$0xff] %vm1521_vm1, %v2297_v24  ;;  %3825 = vmatmul.f32.vlgmr.msrb.gmra.mxu1 %v6385_v55 }
 0x33d   : > { %3408 = vmatpush.msrb.mxu3 %v3407_v53  ;;  %v2383_v3 = vpop.f32.mrf.mxu3  ;;  %v2336_v26 = vpop.f32.mrf.mxu2  ;;  %8350 = vst [vmem:[#allocation27_spill] sm:$0xff] %v7341_v60  ;;  %4173 = vmatpush.msrb.mxu1 %v4172_v59 }
 0x33e   : > { %v2384_v33 = vadd.f32 %v2383_v3, %v2328_v1 }
 0x33f   : > { %4179 = vmatpush.msrb.mxu1 %v4178_v30 }
 0x340   : > { %v7346_v19 = vpop.f32.mrf.mxu0 }
 0x341   : > { %8351 = vst [vmem:[#allocation26_spill] sm:$0xff] %v7346_v19 }
 0x342   : > { %3058 = vmatmul.f32.gmra.mxu3 %v6404_v21  ;;  %3027 = vmatmul.f32.gmra.mxu2 %v6429_v2 }
 0x343   : > { %v7351_v31 = vpop.f32.mrf.mxu1 }
 0x344   : > { %3790 = vmatmul.f32.vlgmr.msrb.gmra.mxu0 %v6385_v55  ;;  %3829 = vmatmul.f32.gmra.mxu1 %v6404_v21  ;;  %8352 = vst [vmem:[#allocation68_spill] sm:$0xff] %v7351_v31  ;;  %v8355_v31 = vand.u32 4294901760, %v7070_v58 }
 0x345   : > { %4118 = vmatpush.msrb.mxu0 %v7286_v46  ;;  %v2387_v53 = vpop.f32.mrf.mxu3  ;;  %v2344_v63 = vpop.f32.mrf.mxu2 }
 0x346   : > { %v2388_v1 = vadd.f32 %v2387_v53, %v2336_v26 }
 0x347   : > { %4120 = vmatpush.msrb.mxu0 %v7292_v61 }
 0x348   : > { %v7356_v24 = vpop.f32.mrf.mxu0  ;;  %v2427_v3 = vadd.f32 %v7175_v50, %v2388_v1 }
 0x349   : > { %8353 = vst [vmem:[#allocation8_spill] sm:$0xff] %v7356_v24  ;;  %v2422_v24 = vadd.f32 %v7159_v51, %v2384_v33 }
 0x34a   : > { %3062 = vmatmul.f32.gmra.mxu3 %v6429_v2  ;;  %3031 = vmatmul.f32.gmra.mxu2 %v6452_v32 }
 0x34b   : > { %v7359_v30 = vpop.f32.mrf.mxu1  ;;  %v2462_v58 = vadd.f32 %v7151_v11, %v2422_v24 }
 0x34c   : > { %3794 = vmatmul.f32.gmra.mxu0 %v6404_v21  ;;  %3833 = vmatmul.f32.gmra.mxu1 %v6429_v2  ;;  %8354 = vst [vmem:[#allocation7_spill] sm:$0xff] %v7359_v30 }
 0x34d   : > { %v2391_v44 = vpop.f32.mrf.mxu3  ;;  %v2352_v59 = vpop.f32.mrf.mxu2 }
 0x34e   : > { %v2392_v11 = vadd.f32 %v2391_v44, %v2344_v63  ;;  %v8358_v63 = vand.u32 4294901760, %v7307_v52 }
 0x350   : > { %v7366_v60 = vpop.f32.mrf.mxu0 }
 0x352   : > { %3066 = vmatmul.f32.gmra.mxu3 %v6452_v32  ;;  %3191 = vmatmul.f32.vlgmr.msra.gmra.mxu2 %v6397_v23 }
 0x353   : > { %3527 = vmatpush.msra.mxu2 %v8355_v31  ;;  %v7370_v30 = vpop.f32.mrf.mxu1 }
 0x354   : > { %3798 = vmatmul.f32.gmra.mxu0 %v6429_v2  ;;  %3837 = vmatmul.f32.gmra.mxu1 %v6452_v32  ;;  %8356 = vst [vmem:[#allocation6_spill] sm:$0xff] %v7370_v30 }
 0x355   : > { %v2395_v19 = vpop.f32.mrf.mxu3  ;;  %3531 = vmatpush.msra.mxu2 %v3405_v9  ;;  %v2506_v40 = vpop.f32.mrf.mxu2 }
 0x356   : > { %v2507_v51 = vadd.f32 %v2506_v40, %v2462_v58  ;;  %v8357_v40 = vand.u32 4294901760, %v7298_v25  ;;  %v2396_v44 = vadd.f32 %v2395_v19, %v2352_v59 }
 0x358   : > { %v7377_v9 = vpop.f32.mrf.mxu0 }
 0x35a   : > { %3231 = vmatmul.f32.vlgmr.msra.gmra.mxu3 %v6402_v29  ;;  %3196 = vmatmul.f32.gmra.mxu2 %v8321_v62 }
 0x35b   : > { %3564 = vmatpush.msra.mxu3 %v8346_v10  ;;  %v3154_v26 = vpop.f32.mrf.mxu1  ;;  %v2468_v10 = vadd.f32 %v7166_v48, %v2427_v3 }
 0x35c   : > { %3802 = vmatmul.f32.gmra.mxu0 %v6452_v32  ;;  %4002 = vmatmul.f32.vlgmr.msra.gmra.mxu1 %v6402_v29 }
 0x35d   : > { %3566 = vmatpush.msra.mxu3 %v8347_v42  ;;  %v2541_v33 = vpop.f32.mrf.mxu3  ;;  %v2510_v31 = vpop.f32.mrf.mxu2  ;;  %4335 = vmatpush.msra.mxu1 %v7286_v46 }
 0x35e   : > { %v2542_v30 = vadd.f32 %v2541_v33, %v2507_v51  ;;  %v2511_v42 = vadd.f32 %v2510_v31, %v2468_v10 }
 0x35f   : > { %4337 = vmatpush.msra.mxu1 %v7292_v61 }
 0x360   : > { %5771 = vst.msk [vmem:[%s6945_s10 + $0x60] sm:$0xff] %vm1521_vm1, %v2542_v30  ;;  %v3099_v50 = vpop.f32.mrf.mxu0  ;;  %v2432_v30 = vadd.f32 %v7191_v5, %v2392_v11 }
 0x361   : > { %v7392_v53 = vadd.f32 %v3154_v26, %v3099_v50  ;;  %v2437_v26 = vadd.f32 %v7204_v37, %v2396_v44 }
 0x362   : > { %3237 = vmatmul.f32.gmra.mxu3 %v8323_v56  ;;  %3201 = vmatmul.f32.gmra.mxu2 %v6439_v6  ;;  %v2474_v51 = vadd.f32 %v7180_v0, %v2432_v30 }
 0x363   : > { %v3158_v48 = vpop.f32.mrf.mxu1  ;;  %v2480_v0 = vadd.f32 %v7196_v22, %v2437_v26 }
 0x364   : > { %3962 = vmatmul.f32.vlgmr.msra.gmra.mxu0 %v6397_v23  ;;  %4008 = vmatmul.f32.gmra.mxu1 %v8323_v56 }
 0x365   : > { %4298 = vmatpush.msra.mxu0 %v8357_v40  ;;  %v2545_v24 = vpop.f32.mrf.mxu3  ;;  %v2514_v1 = vpop.f32.mrf.mxu2 }
 0x366   : > { %v2546_v58 = vadd.f32 %v2545_v24, %v2511_v42  ;;  %v2515_v33 = vadd.f32 %v2514_v1, %v2474_v51 }
 0x367   : > { %4302 = vmatpush.msra.mxu0 %v8358_v63 }
 0x368   : > { %5772 = vst.msk [vmem:[%s6945_s10 + $0x68] sm:$0xff] %vm1521_vm1, %v2546_v58  ;;  %v3107_v5 = vpop.f32.mrf.mxu0  ;;  %v8359_v58 = vld [vmem:[#allocation19_spill] sm:$0xff] }
 0x369   : > { %v7404_v3 = vadd.f32 %v3158_v48, %v3107_v5  ;;  %v7430_v63 = vand.u32 4294901760, %v8359_v58 }
 0x36a   : > { %3243 = vmatmul.f32.gmra.mxu3 %v6450_v7  ;;  %3206 = vmatmul.f32.gmra.mxu2 %v6460_v13 }
 0x36b   : > { %v3162_v50 = vpop.f32.mrf.mxu1 }
 0x36c   : > { %3967 = vmatmul.f32.gmra.mxu0 %v8321_v62  ;;  %4014 = vmatmul.f32.gmra.mxu1 %v6450_v7 }
 0x36d   : > { %v2549_v31 = vpop.f32.mrf.mxu3  ;;  %v2518_v11 = vpop.f32.mrf.mxu2 }
 0x36e   : > { %v2550_v10 = vadd.f32 %v2549_v31, %v2515_v33  ;;  %v2519_v37 = vadd.f32 %v2518_v11, %v2480_v0  ;;  %v7445_v33 = vsub.f32 %v8359_v58, %v7430_v63 }
 0x370   : > { %5773 = vst.msk [vmem:[%s6945_s10 + $0x70] sm:$0xff] %vm1521_vm1, %v2550_v10  ;;  %v3115_v19 = vpop.f32.mrf.mxu0 }
 0x371   : > { %v7415_v59 = vadd.f32 %v3162_v50, %v3115_v19 }
 0x372   : > { %3249 = vmatmul.f32.gmra.mxu3 %v6468_v15  ;;  %3355 = vmatmul.f32.vlgmr.msrb.gmra.mxu2 %v6424_v28 }
 0x373   : > { %3699 = vmatpush.msrb.mxu2 %v7108_v47  ;;  %v3166_v30 = vpop.f32.mrf.mxu1 }
 0x374   : > { %3972 = vmatmul.f32.gmra.mxu0 %v6439_v6  ;;  %4020 = vmatmul.f32.gmra.mxu1 %v6468_v15 }
 0x375   : > { %v2553_v42 = vpop.f32.mrf.mxu3  ;;  %3702 = vmatpush.msrb.mxu2 %v7115_v38  ;;  %v2678_v24 = vpop.f32.mrf.mxu2 }
 0x376   : > { %v2554_v40 = vadd.f32 %v2553_v42, %v2519_v37  ;;  %v2679_v22 = vadd.f32 %v2678_v24, %v7215_v35 }
 0x378   : > { %5774 = vst.msk [vmem:[%s6945_s10 + $0x78] sm:$0xff] %vm1521_vm1, %v2554_v40  ;;  %v3123_v47 = vpop.f32.mrf.mxu0  ;;  %v8361_v40 = vld [vmem:[#allocation61_spill] sm:$0xff] }
 0x379   : > { %v7427_v38 = vadd.f32 %v3166_v30, %v3123_v47  ;;  %v7474_v24 = vand.u32 4294901760, %v8361_v40  ;;  %v8362_v47 = vld [vmem:[#allocation59_spill] sm:$0xff] }
 0x37a   : > { %3410 = vmatmul.f32.vlgmr.msrb.gmra.mxu3 %v6385_v55  ;;  %3363 = vmatmul.f32.gmra.mxu2 %v6447_v49 }
 0x37b   : > { %3739 = vmatpush.msrb.mxu3 %v7095_v36  ;;  %v7433_v51 = vpop.f32.mrf.mxu1  ;;  %v8360_v36 = vld [vmem:[#allocation57_spill] sm:$0xff]  ;;  %v7486_v58 = vsub.f32 %v8361_v40, %v7474_v24 }
 0x37c   : > { %3977 = vmatmul.f32.gmra.mxu0 %v6460_v13  ;;  %4181 = vmatmul.f32.vlgmr.msrb.gmra.mxu1 %v6385_v55  ;;  %v7436_v5 = vand.u32 4294901760, %v8360_v36 }
 0x37d   : > { %3741 = vmatpush.msrb.mxu3 %v7103_v41  ;;  %v2718_v1 = vpop.f32.mrf.mxu3  ;;  %v2683_v48 = vpop.f32.mrf.mxu2  ;;  %4510 = vmatpush.msrb.mxu1 %v7430_v63 }
 0x37e   : > { %v2719_v44 = vadd.f32 %v2718_v1, %v2679_v22  ;;  %v2684_v26 = vadd.f32 %v2683_v48, %v7223_v18  ;;  %v7480_v22 = vand.u32 4294901760, %v8362_v47 }
 0x37f   : > { %4512 = vmatpush.msrb.mxu1 %v7436_v5 }
 0x380   : > { %v2764_v41 = vadd.f32 %v7263_v39, %v2719_v44  ;;  %v7449_v31 = vpop.f32.mrf.mxu0  ;;  %v7456_v39 = vsub.f32 %v8360_v36, %v7436_v5  ;;  %v3919_v44 = vand.u32 4294901760, %v7269_v8  ;;  %v7494_v36 = vsub.f32 %v8362_v47, %v7480_v22 }
 0x382   : > { %3414 = vmatmul.f32.gmra.mxu3 %v6404_v21  ;;  %v2799_v35 = vadd.f32 %v7247_v14, %v2764_v41  ;;  %3371 = vmatmul.f32.gmra.mxu2 %v8233_v54 }
 0x383   : > { %v7461_v50 = vpop.f32.mrf.mxu1 }
 0x384   : > { %4126 = vmatmul.f32.vlgmr.msrb.gmra.mxu0 %v6424_v28  ;;  %5775 = vst.msk [vmem:[%s6945_s10 + $0x80] sm:$0xff] %vm1521_vm1, %v2799_v35  ;;  %4185 = vmatmul.f32.gmra.mxu1 %v6404_v21 }
 0x385   : > { %4470 = vmatpush.msrb.mxu0 %v7445_v33  ;;  %v2724_v14 = vpop.f32.mrf.mxu3  ;;  %v2688_v11 = vpop.f32.mrf.mxu2 }
 0x386   : > { %v2725_v10 = vadd.f32 %v2724_v14, %v2684_v26  ;;  %v2689_v37 = vadd.f32 %v2688_v11, %v7232_v43  ;;  %v3913_v43 = vand.u32 4294901760, %v7259_v57  ;;  %v8143_v26 = vand.u32 4294901760, %v7486_v58  ;;  %v8363_v14 = vld [vmem:[#allocation66_spill] sm:$0xff] }
 0x387   : > { %4473 = vmatpush.msrb.mxu0 %v7456_v39 }
 0x388   : > { %v2768_v18 = vadd.f32 %v7281_v17, %v2725_v10  ;;  %v7468_v19 = vpop.f32.mrf.mxu0  ;;  %v4685_v40 = vsub.f32 %v7486_v58, %v8143_v26 }
 0x38a   : > { %3418 = vmatmul.f32.gmra.mxu3 %v6429_v2  ;;  %v2803_v0 = vadd.f32 %v7274_v16, %v2768_v18  ;;  %3379 = vmatmul.f32.gmra.mxu2 %v6481_v12  ;;  %v3920_v18 = vsub.f32 %v7269_v8, %v3919_v44 }
 0x38b   : > { %v7477_v16 = vpop.f32.mrf.mxu1 }
 0x38c   : > { %4134 = vmatmul.f32.gmra.mxu0 %v6447_v49  ;;  %5776 = vst.msk [vmem:[%s6945_s10 + $0x88] sm:$0xff] %vm1521_vm1, %v2803_v0  ;;  %4189 = vmatmul.f32.gmra.mxu1 %v6429_v2  ;;  %v3921_v47 = vand.u32 4294901760, %v3920_v18 }
 0x38d   : > { %v2730_v42 = vpop.f32.mrf.mxu3  ;;  %v2693_v30 = vpop.f32.mrf.mxu2 }
 0x38e   : > { %v2731_v17 = vadd.f32 %v2730_v42, %v2689_v37  ;;  %v2694_v41 = vadd.f32 %v2693_v30, %v7241_v27  ;;  %v8142_v27 = vand.u32 4294901760, %v7494_v36  ;;  %v8364_v30 = vld [vmem:[#allocation67_spill] sm:$0xff] }
 0x390   : > { %v2772_v1 = vadd.f32 %v7311_v20, %v2731_v17  ;;  %v7498_v20 = vpop.f32.mrf.mxu0  ;;  %v4691_v8 = vsub.f32 %v7494_v36, %v8142_v27  ;;  %v8369_v27 = vld [vmem:[#allocation26_spill] sm:$0xff] }
 0x392   : > { %3422 = vmatmul.f32.gmra.mxu3 %v6452_v32  ;;  %v2807_v48 = vadd.f32 %v7289_v4, %v2772_v1  ;;  %3533 = vmatmul.f32.vlgmr.msra.gmra.mxu2 %v6385_v55  ;;  %v3914_v4 = vsub.f32 %v7259_v57, %v3913_v43 }
 0x393   : > { %3861 = vmatpush.msra.mxu2 %v7244_v45  ;;  %v7510_v0 = vpop.f32.mrf.mxu1 }
 0x394   : > { %4142 = vmatmul.f32.gmra.mxu0 %v8233_v54  ;;  %5777 = vst.msk [vmem:[%s6945_s10 + $0x90] sm:$0xff] %vm1521_vm1, %v2807_v48  ;;  %4193 = vmatmul.f32.gmra.mxu1 %v6452_v32  ;;  %v3915_v42 = vand.u32 4294901760, %v3914_v4  ;;  %v4686_v48 = vand.u32 4294901760, %v4685_v40 }
 0x395   : > { %v2736_v35 = vpop.f32.mrf.mxu3  ;;  %3863 = vmatpush.msra.mxu2 %v8363_v14  ;;  %v2842_v10 = vpop.f32.mrf.mxu2 }
 0x396   : > { %v2737_v11 = vadd.f32 %v2736_v35, %v2694_v41  ;;  %v4692_v35 = vand.u32 4294901760, %v4691_v8 }
 0x398   : > { %v2776_v37 = vadd.f32 %v7336_v34, %v2737_v11  ;;  %v7524_v34 = vpop.f32.mrf.mxu0 }
 0x39a   : > { %3568 = vmatmul.f32.vlgmr.msra.gmra.mxu3 %v6385_v55  ;;  %v2811_v17 = vadd.f32 %v8364_v30, %v2776_v37  ;;  %3537 = vmatmul.f32.gmra.mxu2 %v6404_v21 }
 0x39b   : > { %3916 = vmatpush.msra.mxu3 %v3915_v42  ;;  %v7529_v4 = vpop.f32.mrf.mxu1 }
 0x39c   : > { %4150 = vmatmul.f32.gmra.mxu0 %v6481_v12  ;;  %5778 = vst.msk [vmem:[%s6945_s10 + $0x98] sm:$0xff] %vm1521_vm1, %v2811_v17  ;;  %4339 = vmatmul.f32.vlgmr.msra.gmra.mxu1 %v6385_v55 }
 0x39d   : > { %3922 = vmatpush.msra.mxu3 %v3921_v47  ;;  %v2897_v1 = vpop.f32.mrf.mxu3  ;;  %v2850_v41 = vpop.f32.mrf.mxu2  ;;  %4687 = vmatpush.msra.mxu1 %v4686_v48 }
 0x39e   : > { %v2898_v8 = vadd.f32 %v2897_v1, %v2842_v10  ;;  %v8371_v1 = vld [vmem:[#allocation27_spill] sm:$0xff] }
 0x39f   : > { %4693 = vmatpush.msra.mxu1 %v4692_v35 }
 0x3a0   : > { %v7534_v11 = vpop.f32.mrf.mxu0  ;;  %v2936_v26 = vadd.f32 %v8369_v27, %v2898_v8  ;;  %v8372_v8 = vld [vmem:[#allocation8_spill] sm:$0xff] }
 0x3a2   : > { %3572 = vmatmul.f32.gmra.mxu3 %v6404_v21  ;;  %3541 = vmatmul.f32.gmra.mxu2 %v6429_v2  ;;  %v2976_v57 = vadd.f32 %v8371_v1, %v2936_v26  ;;  %v8373_v26 = vld [vmem:[#allocation68_spill] sm:$0xff] }
 0x3a3   : > { %v7539_v42 = vpop.f32.mrf.mxu1 }
 0x3a4   : > { %4304 = vmatmul.f32.vlgmr.msra.gmra.mxu0 %v6385_v55  ;;  %4343 = vmatmul.f32.gmra.mxu1 %v6404_v21  ;;  %8365 = vst [vmem:[#allocation5_spill] sm:$0xff] %v7539_v42 }
 0x3a5   : > { %4632 = vmatpush.msra.mxu0 %v7474_v24  ;;  %v2901_v18 = vpop.f32.mrf.mxu3  ;;  %v2858_v37 = vpop.f32.mrf.mxu2 }
 0x3a6   : > { %v2902_v10 = vadd.f32 %v2901_v18, %v2850_v41 }
 0x3a7   : > { %4634 = vmatpush.msra.mxu0 %v7480_v22 }
 0x3a8   : > { %v7544_v40 = vpop.f32.mrf.mxu0 }
 0x3a9   : > { %8366 = vst [vmem:[#allocation35_spill] sm:$0xff] %v7544_v40 }
 0x3aa   : > { %3576 = vmatmul.f32.gmra.mxu3 %v6429_v2  ;;  %3545 = vmatmul.f32.gmra.mxu2 %v6452_v32 }
 0x3ab   : > { %v7547_v47 = vpop.f32.mrf.mxu1 }
 0x3ac   : > { %4308 = vmatmul.f32.gmra.mxu0 %v6404_v21  ;;  %4347 = vmatmul.f32.gmra.mxu1 %v6429_v2  ;;  %8367 = vst [vmem:[#allocation29_spill] sm:$0xff] %v7547_v47 }
 0x3ad   : > { %v2905_v30 = vpop.f32.mrf.mxu3  ;;  %v2866_v17 = vpop.f32.mrf.mxu2 }
 0x3b0   : > { %v7554_v48 = vpop.f32.mrf.mxu0 }
 0x3b1   : > { %8368 = vst [vmem:[#allocation28_spill] sm:$0xff] %v7554_v48 }
 0x3b2   : > { %3580 = vmatmul.f32.gmra.mxu3 %v6452_v32  ;;  %3705 = vmatmul.f32.vlgmr.msrb.gmra.mxu2 %v6397_v23 }
 0x3b3   : > { %4041 = vmatpush.msrb.mxu2 %v3913_v43  ;;  %v7558_v47 = vpop.f32.mrf.mxu1 }
 0x3b4   : > { %4312 = vmatmul.f32.gmra.mxu0 %v6429_v2  ;;  %4351 = vmatmul.f32.gmra.mxu1 %v6452_v32  ;;  %8370 = vst [vmem:[#allocation30_spill] sm:$0xff] %v7558_v47  ;;  %v2941_v47 = vadd.f32 %v8372_v8, %v2902_v10  ;;  %v8374_v10 = vand.u32 4294901760, %v7486_v58 }
 0x3b5   : > { %v2909_v35 = vpop.f32.mrf.mxu3  ;;  %4045 = vmatpush.msrb.mxu2 %v3919_v44  ;;  %v3020_v42 = vpop.f32.mrf.mxu2 }
 0x3b6   : > { %v3021_v44 = vadd.f32 %v3020_v42, %v2976_v57 }
 0x3b8   : > { %v7565_v43 = vpop.f32.mrf.mxu0 }
 0x3ba   : > { %3745 = vmatmul.f32.vlgmr.msrb.gmra.mxu3 %v6402_v29  ;;  %3710 = vmatmul.f32.gmra.mxu2 %v8321_v62 }
 0x3bb   : > { %4078 = vmatpush.msrb.mxu3 %v7244_v45  ;;  %v3668_v41 = vpop.f32.mrf.mxu1  ;;  %v2906_v45 = vadd.f32 %v2905_v30, %v2858_v37  ;;  %v8375_v37 = vand.u32 4294901760, %v7494_v36 }
 0x3bc   : > { %4316 = vmatmul.f32.gmra.mxu0 %v6452_v32  ;;  %4516 = vmatmul.f32.vlgmr.msrb.gmra.mxu1 %v6402_v29 }
 0x3bd   : > { %4080 = vmatpush.msrb.mxu3 %v8363_v14  ;;  %v3055_v27 = vpop.f32.mrf.mxu3  ;;  %v3024_v48 = vpop.f32.mrf.mxu2  ;;  %4849 = vmatpush.msrb.mxu1 %v7474_v24  ;;  %v2982_v14 = vadd.f32 %v8373_v26, %v2941_v47  ;;  %v2946_v57 = vadd.f32 %v7366_v60, %v2906_v45  ;;  %v2910_v47 = vadd.f32 %v2909_v35, %v2866_v17  ;;  %v8377_v35 = vld [vmem:[#allocation6_spill] sm:$0xff] }
 0x3be   : > { %v3056_v40 = vadd.f32 %v3055_v27, %v3021_v44 }
 0x3bf   : > { %4851 = vmatpush.msrb.mxu1 %v7480_v22  ;;  %v3025_v42 = vadd.f32 %v3024_v48, %v2982_v14  ;;  %v8376_v48 = vld [vmem:[#allocation7_spill] sm:$0xff]  ;;  %v2951_v14 = vadd.f32 %v7377_v9, %v2910_v47 }
 0x3c0   : > { %5779 = vst.msk [vmem:[%s6945_s10 + $0xa0] sm:$0xff] %vm1521_vm1, %v3056_v40  ;;  %v3613_v18 = vpop.f32.mrf.mxu0  ;;  %v2988_v8 = vadd.f32 %v8376_v48, %v2946_v57 }
 0x3c1   : > { %v7580_v1 = vadd.f32 %v3668_v41, %v3613_v18 }
 0x3c2   : > { %3751 = vmatmul.f32.gmra.mxu3 %v8323_v56  ;;  %3715 = vmatmul.f32.gmra.mxu2 %v6439_v6 }
 0x3c3   : > { %v3672_v30 = vpop.f32.mrf.mxu1 }
 0x3c4   : > { %4476 = vmatmul.f32.vlgmr.msrb.gmra.mxu0 %v6397_v23  ;;  %4522 = vmatmul.f32.gmra.mxu1 %v8323_v56 }
 0x3c5   : > { %4812 = vmatpush.msrb.mxu0 %v8374_v10  ;;  %v3059_v40 = vpop.f32.mrf.mxu3  ;;  %v3028_v44 = vpop.f32.mrf.mxu2  ;;  %v2994_v10 = vadd.f32 %v8377_v35, %v2951_v14 }
 0x3c6   : > { %v3060_v27 = vadd.f32 %v3059_v40, %v3025_v42  ;;  %v3029_v41 = vadd.f32 %v3028_v44, %v2988_v8  ;;  %v8378_v8 = vld [vmem:[#allocation20_spill] sm:$0xff] }
 0x3c7   : > { %4816 = vmatpush.msrb.mxu0 %v8375_v37 }
 0x3c8   : > { %5780 = vst.msk [vmem:[%s6945_s10 + $0xa8] sm:$0xff] %vm1521_vm1, %v3060_v27  ;;  %v3621_v60 = vpop.f32.mrf.mxu0 }
 0x3c9   : > { %v7592_v45 = vadd.f32 %v3672_v30, %v3621_v60  ;;  %v7618_v60 = vand.u32 4294901760, %v8378_v8 }
 0x3ca   : > { %3757 = vmatmul.f32.gmra.mxu3 %v6450_v7  ;;  %3720 = vmatmul.f32.gmra.mxu2 %v6460_v13 }
 0x3cb   : > { %v3676_v17 = vpop.f32.mrf.mxu1 }
 0x3cc   : > { %4481 = vmatmul.f32.gmra.mxu0 %v8321_v62  ;;  %4528 = vmatmul.f32.gmra.mxu1 %v6450_v7 }
 0x3cd   : > { %v3063_v26 = vpop.f32.mrf.mxu3  ;;  %v3032_v18 = vpop.f32.mrf.mxu2 }
 0x3ce   : > { %v3064_v42 = vadd.f32 %v3063_v26, %v3029_v41  ;;  %v3033_v9 = vadd.f32 %v3032_v18, %v2994_v10  ;;  %v7631_v18 = vsub.f32 %v8378_v8, %v7618_v60 }
 0x3d0   : > { %5781 = vst.msk [vmem:[%s6945_s10 + $0xb0] sm:$0xff] %vm1521_vm1, %v3064_v42  ;;  %v3629_v40 = vpop.f32.mrf.mxu0 }
 0x3d1   : > { %v7603_v57 = vadd.f32 %v3676_v17, %v3629_v40 }
 0x3d2   : > { %3763 = vmatmul.f32.gmra.mxu3 %v6468_v15  ;;  %3869 = vmatmul.f32.vlgmr.msra.gmra.mxu2 %v6424_v28 }
 0x3d3   : > { %4213 = vmatpush.msra.mxu2 %v7298_v25  ;;  %v3680_v25 = vpop.f32.mrf.mxu1 }
 0x3d4   : > { %4486 = vmatmul.f32.gmra.mxu0 %v6439_v6  ;;  %4534 = vmatmul.f32.gmra.mxu1 %v6468_v15 }
 0x3d5   : > { %v3067_v44 = vpop.f32.mrf.mxu3  ;;  %4216 = vmatpush.msra.mxu2 %v7307_v52  ;;  %v3192_v37 = vpop.f32.mrf.mxu2 }
 0x3d6   : > { %v3068_v27 = vadd.f32 %v3067_v44, %v3033_v9  ;;  %v3193_v47 = vadd.f32 %v3192_v37, %v7392_v53 }
 0x3d8   : > { %5782 = vst.msk [vmem:[%s6945_s10 + $0xb8] sm:$0xff] %vm1521_vm1, %v3068_v27  ;;  %v3637_v30 = vpop.f32.mrf.mxu0  ;;  %v8380_v27 = vld [vmem:[#allocation63_spill] sm:$0xff] }
 0x3d9   : > { %v7615_v52 = vadd.f32 %v3680_v25, %v3637_v30  ;;  %v7656_v37 = vand.u32 4294901760, %v8380_v27 }
 0x3da   : > { %3924 = vmatmul.f32.vlgmr.msra.gmra.mxu3 %v6385_v55  ;;  %3877 = vmatmul.f32.gmra.mxu2 %v6447_v49 }
 0x3db   : > { %4253 = vmatpush.msra.mxu3 %v7286_v46  ;;  %v8379_v46 = vld [vmem:[#allocation21_spill] sm:$0xff]  ;;  %v7653_v9 = vpop.f32.mrf.mxu1 }
 0x3dc   : > { %4491 = vmatmul.f32.gmra.mxu0 %v6460_v13  ;;  %4695 = vmatmul.f32.vlgmr.msra.gmra.mxu1 %v6385_v55  ;;  %v7622_v14 = vand.u32 4294901760, %v8379_v46 }
 0x3dd   : > { %4255 = vmatpush.msra.mxu3 %v7292_v61  ;;  %v3232_v48 = vpop.f32.mrf.mxu3  ;;  %v3197_v41 = vpop.f32.mrf.mxu2  ;;  %5024 = vmatpush.msra.mxu1 %v7618_v60 }
 0x3de   : > { %v3233_v26 = vadd.f32 %v3232_v48, %v3193_v47  ;;  %v3198_v42 = vadd.f32 %v3197_v41, %v7404_v3  ;;  %v7666_v48 = vsub.f32 %v8380_v27, %v7656_v37 }
 0x3df   : > { %5026 = vmatpush.msra.mxu1 %v7622_v14 }
 0x3e0   : > { %v3278_v53 = vadd.f32 %v7449_v31, %v3233_v26  ;;  %v7640_v31 = vsub.f32 %v8379_v46, %v7622_v14  ;;  %v7669_v8 = vpop.f32.mrf.mxu0  ;;  %v4433_v26 = vand.u32 4294901760, %v7456_v39 }
 0x3e2   : > { %3928 = vmatmul.f32.gmra.mxu3 %v6404_v21  ;;  %v3313_v61 = vadd.f32 %v7433_v51, %v3278_v53  ;;  %3885 = vmatmul.f32.gmra.mxu2 %v8233_v54 }
 0x3e4   : > { %4640 = vmatmul.f32.vlgmr.msra.gmra.mxu0 %v6424_v28  ;;  %5783 = vst.msk [vmem:[%s6945_s10 + $0xc0] sm:$0xff] %vm1521_vm1, %v3313_v61  ;;  %4699 = vmatmul.f32.gmra.mxu1 %v6404_v21 }
 0x3e5   : > { %4984 = vmatpush.msra.mxu0 %v7631_v18  ;;  %v3238_v51 = vpop.f32.mrf.mxu3  ;;  %v3202_v17 = vpop.f32.mrf.mxu2 }
 0x3e6   : > { %v3239_v35 = vadd.f32 %v3238_v51, %v3198_v42  ;;  %v3203_v40 = vadd.f32 %v3202_v17, %v7415_v59  ;;  %v4427_v59 = vand.u32 4294901760, %v7445_v33  ;;  %v4434_v17 = vsub.f32 %v7456_v39, %v4433_v26 }
 0x3e7   : > { %4987 = vmatpush.msra.mxu0 %v7640_v31 }
 0x3e8   : > { %v3282_v10 = vadd.f32 %v7468_v19, %v3239_v35  ;;  %v4428_v53 = vsub.f32 %v7445_v33, %v4427_v59  ;;  %v7688_v35 = vpop.f32.mrf.mxu1 }
 0x3ea   : > { %3932 = vmatmul.f32.gmra.mxu3 %v6429_v2  ;;  %v3317_v3 = vadd.f32 %v7461_v50, %v3282_v10  ;;  %3893 = vmatmul.f32.gmra.mxu2 %v6481_v12  ;;  %v8381_v50 = vld [vmem:[#allocation62_spill] sm:$0xff] }
 0x3eb   : > { %v7660_v30 = vand.u32 4294901760, %v8381_v50 }
 0x3ec   : > { %4648 = vmatmul.f32.gmra.mxu0 %v6447_v49  ;;  %5784 = vst.msk [vmem:[%s6945_s10 + $0xc8] sm:$0xff] %vm1521_vm1, %v3317_v3  ;;  %4703 = vmatmul.f32.gmra.mxu1 %v6429_v2  ;;  %v4429_v3 = vand.u32 4294901760, %v4428_v53 }
 0x3ed   : > { %v3244_v44 = vpop.f32.mrf.mxu3  ;;  %v3207_v25 = vpop.f32.mrf.mxu2  ;;  %v7676_v46 = vsub.f32 %v8381_v50, %v7660_v30 }
 0x3ee   : > { %v3245_v19 = vadd.f32 %v3244_v44, %v3203_v40  ;;  %v4435_v44 = vand.u32 4294901760, %v4434_v17 }
 0x3f0   : > { %v3286_v47 = vadd.f32 %v7498_v20, %v3245_v19  ;;  %v3208_v20 = vadd.f32 %v3207_v25, %v7427_v38  ;;  %v8144_v38 = vand.u32 4294901760, %v7676_v46  ;;  %v7707_v50 = vpop.f32.mrf.mxu1 }
 0x3f2   : > { %3936 = vmatmul.f32.gmra.mxu3 %v6452_v32  ;;  %v3321_v41 = vadd.f32 %v7477_v16, %v3286_v47  ;;  %4047 = vmatmul.f32.vlgmr.msrb.gmra.mxu2 %v6385_v55  ;;  %v5198_v16 = vand.u32 4294901760, %v7666_v48  ;;  %v5205_v39 = vsub.f32 %v7676_v46, %v8144_v38 }
 0x3f3   : > { %4375 = vmatpush.msrb.mxu2 %v7430_v63 }
 0x3f4   : > { %4656 = vmatmul.f32.gmra.mxu0 %v8233_v54  ;;  %5785 = vst.msk [vmem:[%s6945_s10 + $0xd0] sm:$0xff] %vm1521_vm1, %v3321_v41  ;;  %4707 = vmatmul.f32.gmra.mxu1 %v6452_v32  ;;  %v5199_v33 = vsub.f32 %v7666_v48, %v5198_v16 }
 0x3f5   : > { %v3250_v61 = vpop.f32.mrf.mxu3  ;;  %4377 = vmatpush.msrb.mxu2 %v7436_v5  ;;  %v3356_v51 = vpop.f32.mrf.mxu2 }
 0x3f6   : > { %v3251_v42 = vadd.f32 %v3250_v61, %v3208_v20  ;;  %v5200_v25 = vand.u32 4294901760, %v5199_v33 }
 0x3f8   : > { %v3290_v10 = vadd.f32 %v7524_v34, %v3251_v42  ;;  %v7702_v34 = vpop.f32.mrf.mxu0  ;;  %v7719_v53 = vpop.f32.mrf.mxu1 }
 0x3fa   : > { %4082 = vmatmul.f32.vlgmr.msrb.gmra.mxu3 %v6385_v55  ;;  %v3325_v40 = vadd.f32 %v7510_v0, %v3290_v10  ;;  %4051 = vmatmul.f32.gmra.mxu2 %v6404_v21  ;;  %v5206_v0 = vand.u32 4294901760, %v5205_v39 }
 0x3fb   : > { %4430 = vmatpush.msrb.mxu3 %v4429_v3 }
 0x3fc   : > { %4664 = vmatmul.f32.gmra.mxu0 %v6481_v12  ;;  %5786 = vst.msk [vmem:[%s6945_s10 + $0xd8] sm:$0xff] %vm1521_vm1, %v3325_v40  ;;  %4853 = vmatmul.f32.vlgmr.msrb.gmra.mxu1 %v6385_v55 }
 0x3fd   : > { %4436 = vmatpush.msrb.mxu3 %v4435_v44  ;;  %v3411_v27 = vpop.f32.mrf.mxu3  ;;  %v3364_v19 = vpop.f32.mrf.mxu2  ;;  %5201 = vmatpush.msrb.mxu1 %v5200_v25 }
 0x3fe   : > { %v3412_v10 = vadd.f32 %v3411_v27, %v3356_v51 }
 0x3ff   : > { %5207 = vmatpush.msrb.mxu1 %v5206_v0 }
 0x400   : > { %v7713_v41 = vpop.f32.mrf.mxu0  ;;  %v7728_v3 = vpop.f32.mrf.mxu1  ;;  %v3450_v40 = vadd.f32 %v7534_v11, %v3412_v10 }
 0x402   : > { %4086 = vmatmul.f32.gmra.mxu3 %v6404_v21  ;;  %4055 = vmatmul.f32.gmra.mxu2 %v6429_v2  ;;  %v3490_v27 = vadd.f32 %v7529_v4, %v3450_v40 }
 0x404   : > { %4818 = vmatmul.f32.vlgmr.msrb.gmra.mxu0 %v6385_v55  ;;  %4857 = vmatmul.f32.gmra.mxu1 %v6404_v21 }
 0x405   : > { %5146 = vmatpush.msrb.mxu0 %v7656_v37  ;;  %v3415_v47 = vpop.f32.mrf.mxu3  ;;  %v3372_v20 = vpop.f32.mrf.mxu2 }
 0x406   : > { %v3416_v51 = vadd.f32 %v3415_v47, %v3364_v19 }
 0x407   : > { %5148 = vmatpush.msrb.mxu0 %v7660_v30 }
 0x408   : > { %v7723_v17 = vpop.f32.mrf.mxu0  ;;  %v7742_v38 = vpop.f32.mrf.mxu1 }
 0x40a   : > { %4090 = vmatmul.f32.gmra.mxu3 %v6429_v2  ;;  %4059 = vmatmul.f32.gmra.mxu2 %v6452_v32 }
 0x40c   : > { %4822 = vmatmul.f32.gmra.mxu0 %v6404_v21  ;;  %4861 = vmatmul.f32.gmra.mxu1 %v6429_v2 }
 0x40d   : > { %v3419_v61 = vpop.f32.mrf.mxu3  ;;  %v3380_v42 = vpop.f32.mrf.mxu2 }
 0x410   : > { %v7733_v39 = vpop.f32.mrf.mxu0 }
 0x412   : > { %4094 = vmatmul.f32.gmra.mxu3 %v6452_v32  ;;  %4219 = vmatmul.f32.vlgmr.msra.gmra.mxu2 %v6397_v23 }
 0x413   : > { %4555 = vmatpush.msra.mxu2 %v4427_v59 }
 0x414   : > { %4826 = vmatmul.f32.gmra.mxu0 %v6429_v2  ;;  %4865 = vmatmul.f32.gmra.mxu1 %v6452_v32 }
 0x415   : > { %v3423_v33 = vpop.f32.mrf.mxu3  ;;  %4559 = vmatpush.msra.mxu2 %v4433_v26  ;;  %v3534_v44 = vpop.f32.mrf.mxu2  ;;  %v8382_v26 = vld [vmem:[#allocation35_spill] sm:$0xff] }
 0x416   : > { %v3535_v59 = vadd.f32 %v3534_v44, %v3490_v27  ;;  %v3455_v25 = vadd.f32 %v8382_v26, %v3416_v51  ;;  %v8384_v44 = vld [vmem:[#allocation28_spill] sm:$0xff]  ;;  %v8386_v26 = vld [vmem:[#allocation29_spill] sm:$0xff] }
 0x418   : > { %v7752_v19 = vpop.f32.mrf.mxu0 }
 0x41a   : > { %4259 = vmatmul.f32.vlgmr.msra.gmra.mxu3 %v6402_v29  ;;  %4224 = vmatmul.f32.gmra.mxu2 %v8321_v62 }
 0x41b   : > { %4592 = vmatpush.msra.mxu3 %v7430_v63  ;;  %v3420_v63 = vadd.f32 %v3419_v61, %v3372_v20  ;;  %v7762_v20 = vpop.f32.mrf.mxu1  ;;  %v3424_v61 = vadd.f32 %v3423_v33, %v3380_v42  ;;  %v8387_v42 = vld [vmem:[#allocation30_spill] sm:$0xff] }
 0x41c   : > { %4830 = vmatmul.f32.gmra.mxu0 %v6452_v32  ;;  %5030 = vmatmul.f32.vlgmr.msra.gmra.mxu1 %v6402_v29 }
 0x41d   : > { %4594 = vmatpush.msra.mxu3 %v7436_v5  ;;  %v3569_v11 = vpop.f32.mrf.mxu3  ;;  %v3538_v0 = vpop.f32.mrf.mxu2  ;;  %5363 = vmatpush.msra.mxu1 %v7656_v37  ;;  %v8383_v5 = vld [vmem:[#allocation5_spill] sm:$0xff]  ;;  %v3460_v51 = vadd.f32 %v8384_v44, %v3420_v63  ;;  %v3465_v63 = vadd.f32 %v7565_v43, %v3424_v61 }
 0x41e   : > { %v3570_v10 = vadd.f32 %v3569_v11, %v3535_v59  ;;  %v3496_v4 = vadd.f32 %v8383_v5, %v3455_v25  ;;  %v8385_v11 = vand.u32 4294901760, %v7676_v46 }
 0x41f   : > { %5365 = vmatpush.msra.mxu1 %v7660_v30  ;;  %v3508_v33 = vadd.f32 %v8387_v42, %v3465_v63 }
 0x420   : > { %5787 = vst.msk [vmem:[%s6945_s10 + $0xe0] sm:$0xff] %vm1521_vm1, %v3570_v10  ;;  %v3539_v47 = vadd.f32 %v3538_v0, %v3496_v4  ;;  %v7768_v10 = vpop.f32.mrf.mxu0 }
 0x422   : > { %4265 = vmatmul.f32.gmra.mxu3 %v8323_v56  ;;  %4229 = vmatmul.f32.gmra.mxu2 %v6439_v6 }
 0x424   : > { %4990 = vmatmul.f32.vlgmr.msra.gmra.mxu0 %v6397_v23  ;;  %5036 = vmatmul.f32.gmra.mxu1 %v8323_v56 }
 0x425   : > { %5326 = vmatpush.msra.mxu0 %v5198_v16  ;;  %v3573_v40 = vpop.f32.mrf.mxu3  ;;  %v3542_v27 = vpop.f32.mrf.mxu2  ;;  %v3502_v16 = vadd.f32 %v8386_v26, %v3460_v51 }
 0x426   : > { %v3574_v59 = vadd.f32 %v3573_v40, %v3539_v47  ;;  %v7777_v47 = vpop.f32.mrf.mxu1 }
 0x427   : > { %5330 = vmatpush.msra.mxu0 %v8385_v11  ;;  %v3543_v25 = vadd.f32 %v3542_v27, %v3502_v16  ;;  %v8388_v11 = vld [vmem:[#allocation22_spill] sm:$0xff] }
 0x428   : > { %5788 = vst.msk [vmem:[%s6945_s10 + $0xe8] sm:$0xff] %vm1521_vm1, %v3574_v59  ;;  %v7783_v27 = vpop.f32.mrf.mxu0  ;;  %v7796_v61 = vand.u32 4294901760, %v8388_v11 }
 0x42a   : > { %4271 = vmatmul.f32.gmra.mxu3 %v6450_v7  ;;  %4234 = vmatmul.f32.gmra.mxu2 %v6460_v13  ;;  %v7811_v63 = vsub.f32 %v8388_v11, %v7796_v61 }
 0x42c   : > { %4995 = vmatmul.f32.gmra.mxu0 %v8321_v62  ;;  %5042 = vmatmul.f32.gmra.mxu1 %v6450_v7 }
 0x42d   : > { %v3577_v0 = vpop.f32.mrf.mxu3  ;;  %v3546_v5 = vpop.f32.mrf.mxu2 }
 0x42e   : > { %v3578_v4 = vadd.f32 %v3577_v0, %v3543_v25  ;;  %v3547_v43 = vadd.f32 %v3546_v5, %v3508_v33  ;;  %v8389_v25 = vld [vmem:[#allocation23_spill] sm:$0xff] }
 0x42f   : > { %v7800_v0 = vand.u32 4294901760, %v8389_v25 }
 0x430   : > { %5789 = vst.msk [vmem:[%s6945_s10 + $0xf0] sm:$0xff] %vm1521_vm1, %v3578_v4 }
 0x432   : > { %4277 = vmatmul.f32.gmra.mxu3 %v6468_v15  ;;  %4383 = vmatmul.f32.vlgmr.msrb.gmra.mxu2 %v6424_v28 }
 0x433   : > { %4727 = vmatpush.msrb.mxu2 %v7486_v58 }
 0x434   : > { %5000 = vmatmul.f32.gmra.mxu0 %v6439_v6  ;;  %5048 = vmatmul.f32.gmra.mxu1 %v6468_v15 }
 0x435   : > { %v3581_v40 = vpop.f32.mrf.mxu3  ;;  %4730 = vmatpush.msrb.mxu2 %v7494_v36  ;;  %v3706_v51 = vpop.f32.mrf.mxu2 }
 0x436   : > { %v3582_v44 = vadd.f32 %v3581_v40, %v3547_v43  ;;  %v3707_v58 = vadd.f32 %v3706_v51, %v7580_v1  ;;  %v7793_v36 = vpop.f32.mrf.mxu1 }
 0x438   : > { %5790 = vst.msk [vmem:[%s6945_s10 + $0xf8] sm:$0xff] %vm1521_vm1, %v3582_v44 }
 0x43a   : > { %4438 = vmatmul.f32.vlgmr.msrb.gmra.mxu3 %v6385_v55  ;;  %4391 = vmatmul.f32.gmra.mxu2 %v6447_v49 }
 0x43b   : > { %4767 = vmatpush.msrb.mxu3 %v7474_v24 }
 0x43c   : > { %5005 = vmatmul.f32.gmra.mxu0 %v6460_v13  ;;  %5209 = vmatmul.f32.vlgmr.msrb.gmra.mxu1 %v6385_v55 }
 0x43d   : > { %4769 = vmatpush.msrb.mxu3 %v7480_v22  ;;  %v3746_v59 = vpop.f32.mrf.mxu3  ;;  %v3711_v26 = vpop.f32.mrf.mxu2  ;;  %5538 = vmatpush.msrb.mxu1 %v7796_v61 }
 0x43e   : > { %v3747_v16 = vadd.f32 %v3746_v59, %v3707_v58  ;;  %v7806_v22 = vpop.f32.mrf.mxu0  ;;  %v3712_v5 = vadd.f32 %v3711_v26, %v7592_v45  ;;  %v4941_v59 = vand.u32 4294901760, %v7631_v18 }
 0x43f   : > { %5540 = vmatpush.msrb.mxu1 %v7800_v0 }
 0x440   : > { %v3792_v24 = vadd.f32 %v7669_v8, %v3747_v16  ;;  %v7820_v8 = vsub.f32 %v8389_v25, %v7800_v0  ;;  %v4942_v11 = vsub.f32 %v7631_v18, %v4941_v59 }
 0x442   : > { %4442 = vmatmul.f32.gmra.mxu3 %v6404_v21  ;;  %v3827_v1 = vadd.f32 %v7653_v9, %v3792_v24  ;;  %4399 = vmatmul.f32.gmra.mxu2 %v8233_v54  ;;  %v4943_v24 = vand.u32 4294901760, %v4942_v11 }
 0x444   : > { %5154 = vmatmul.f32.vlgmr.msrb.gmra.mxu0 %v6424_v28  ;;  %5791 = vst.msk [vmem:[%s6945_s10 + $0x100] sm:$0xff] %vm1521_vm1, %v3827_v1 }
 0x445   : > { %5498 = vmatpush.msrb.mxu0 %v7811_v63  ;;  %v3752_v9 = vpop.f32.mrf.mxu3  ;;  %v3716_v4 = vpop.f32.mrf.mxu2 }
 0x446   : > { %v3753_v42 = vadd.f32 %v3752_v9, %v3712_v5  ;;  %v3717_v43 = vadd.f32 %v3716_v4, %v7603_v57  ;;  %v7852_v9 = vpop.f32.mrf.mxu0 }
 0x447   : > { %5501 = vmatpush.msrb.mxu0 %v7820_v8 }
 0x448   : > { %v3796_v33 = vadd.f32 %v7702_v34, %v3753_v42 }
 0x44a   : > { %4446 = vmatmul.f32.gmra.mxu3 %v6429_v2  ;;  %v3831_v45 = vadd.f32 %v7688_v35, %v3796_v33  ;;  %4407 = vmatmul.f32.gmra.mxu2 %v6481_v12  ;;  %v4947_v35 = vand.u32 4294901760, %v7640_v31 }
 0x44c   : > { %5792 = vst.msk [vmem:[%s6945_s10 + $0x108] sm:$0xff] %vm1521_vm1, %v3831_v45  ;;  %5162 = vmatmul.f32.gmra.mxu0 %v6447_v49 }
 0x44d   : > { %v3758_v40 = vpop.f32.mrf.mxu3  ;;  %v3721_v44 = vpop.f32.mrf.mxu2 }
 0x44e   : > { %v3759_v51 = vadd.f32 %v3758_v40, %v3717_v43  ;;  %v3722_v57 = vadd.f32 %v3721_v44, %v7615_v52  ;;  %v7860_v33 = vpop.f32.mrf.mxu0 }
 0x450   : > { %v3800_v58 = vadd.f32 %v7713_v41, %v3759_v51 }
 0x452   : > { %4450 = vmatmul.f32.gmra.mxu3 %v6452_v32  ;;  %v3835_v34 = vadd.f32 %v7707_v50, %v3800_v58  ;;  %4561 = vmatmul.f32.vlgmr.msra.gmra.mxu2 %v6385_v55  ;;  %v4948_v50 = vsub.f32 %v7640_v31, %v4947_v35 }
 0x453   : > { %4889 = vmatpush.msra.mxu2 %v7618_v60 }
 0x454   : > { %5793 = vst.msk [vmem:[%s6945_s10 + $0x110] sm:$0xff] %vm1521_vm1, %v3835_v34  ;;  %v4949_v52 = vand.u32 4294901760, %v4948_v50  ;;  %5170 = vmatmul.f32.gmra.mxu0 %v8233_v54 }
 0x455   : > { %v3764_v41 = vpop.f32.mrf.mxu3  ;;  %4891 = vmatpush.msra.mxu2 %v7622_v14  ;;  %v3870_v16 = vpop.f32.mrf.mxu2 }
 0x456   : > { %v3765_v26 = vadd.f32 %v3764_v41, %v3722_v57  ;;  %v7869_v58 = vpop.f32.mrf.mxu0 }
 0x458   : > { %v3804_v25 = vadd.f32 %v7723_v17, %v3765_v26 }
 0x45a   : > { %4596 = vmatmul.f32.vlgmr.msra.gmra.mxu3 %v6385_v55  ;;  %v3839_v1 = vadd.f32 %v7719_v53, %v3804_v25  ;;  %4565 = vmatmul.f32.gmra.mxu2 %v6404_v21  ;;  %v7857_v53 = vpop.f32.mrf.mxu1 }
 0x45b   : > { %4944 = vmatpush.msra.mxu3 %v4943_v24  ;;  %5213 = vmatmul.f32.gmra.mxu1 %v6404_v21 }
 0x45c   : > { %5794 = vst.msk [vmem:[%s6945_s10 + $0x118] sm:$0xff] %vm1521_vm1, %v3839_v1  ;;  %5178 = vmatmul.f32.gmra.mxu0 %v6481_v12 }
 0x45d   : > { %4950 = vmatpush.msra.mxu3 %v4949_v52  ;;  %v3925_v18 = vpop.f32.mrf.mxu3  ;;  %v3878_v5 = vpop.f32.mrf.mxu2 }
 0x45e   : > { %v3926_v45 = vadd.f32 %v3925_v18, %v3870_v16 }
 0x460   : > { %v3964_v44 = vadd.f32 %v7733_v39, %v3926_v45 }
 0x462   : > { %4600 = vmatmul.f32.gmra.mxu3 %v6404_v21  ;;  %4569 = vmatmul.f32.gmra.mxu2 %v6429_v2  ;;  %v7865_v43 = vpop.f32.mrf.mxu1  ;;  %v4004_v57 = vadd.f32 %v7728_v3, %v3964_v44  ;;  %v4305_v3 = vpop.f32.mrf.mxu0 }
 0x463   : > { %5217 = vmatmul.f32.gmra.mxu1 %v6429_v2 }
 0x464   : > { %5332 = vmatmul.f32.vlgmr.msra.gmra.mxu0 %v6385_v55 }
 0x465   : > { %v3929_v31 = vpop.f32.mrf.mxu3  ;;  %v3886_v17 = vpop.f32.mrf.mxu2 }
 0x466   : > { %v3930_v34 = vadd.f32 %v3929_v31, %v3878_v5 }
 0x468   : > { %v3969_v11 = vadd.f32 %v7752_v19, %v3930_v34 }
 0x46a   : > { %4604 = vmatmul.f32.gmra.mxu3 %v6429_v2  ;;  %4573 = vmatmul.f32.gmra.mxu2 %v6452_v32  ;;  %v4010_v16 = vadd.f32 %v7742_v38, %v3969_v11  ;;  %v4309_v52 = vpop.f32.mrf.mxu0 }
 0x46c   : > { %5336 = vmatmul.f32.gmra.mxu0 %v6404_v21 }
 0x46d   : > { %v3933_v4 = vpop.f32.mrf.mxu3  ;;  %v3894_v42 = vpop.f32.mrf.mxu2 }
 0x472   : > { %4608 = vmatmul.f32.gmra.mxu3 %v6452_v32  ;;  %4733 = vmatmul.f32.vlgmr.msrb.gmra.mxu2 %v6397_v23  ;;  %v4313_v44 = vpop.f32.mrf.mxu0 }
 0x473   : > { %5069 = vmatpush.msrb.mxu2 %v4941_v59  ;;  %v7876_v59 = vpop.f32.mrf.mxu1  ;;  %5221 = vmatmul.f32.gmra.mxu1 %v6452_v32 }
 0x474   : > { %5340 = vmatmul.f32.gmra.mxu0 %v6429_v2 }
 0x475   : > { %v3937_v40 = vpop.f32.mrf.mxu3  ;;  %5073 = vmatpush.msrb.mxu2 %v4947_v35  ;;  %v4048_v51 = vpop.f32.mrf.mxu2 }
 0x476   : > { %v4049_v35 = vadd.f32 %v4048_v51, %v4004_v57  ;;  %v3938_v38 = vadd.f32 %v3937_v40, %v3894_v42  ;;  %v4183_v57 = vadd.f32 %v7793_v36, %v7806_v22 }
 0x47a   : > { %4773 = vmatmul.f32.vlgmr.msrb.gmra.mxu3 %v6402_v29  ;;  %4738 = vmatmul.f32.gmra.mxu2 %v8321_v62 }
 0x47b   : > { %5106 = vmatpush.msrb.mxu3 %v7618_v60  ;;  %v3934_v60 = vadd.f32 %v3933_v4, %v3886_v17  ;;  %v4340_v50 = vpop.f32.mrf.mxu1  ;;  %5367 = vmatmul.f32.vlgmr.msra.gmra.mxu1 %v6385_v55  ;;  %v3979_v17 = vadd.f32 %v7783_v27, %v3938_v38  ;;  %v5455_v38 = vand.u32 4294901760, %v7811_v63 }
 0x47d   : > { %5108 = vmatpush.msrb.mxu3 %v7622_v14  ;;  %v4083_v39 = vpop.f32.mrf.mxu3  ;;  %v4052_v41 = vpop.f32.mrf.mxu2  ;;  %v3974_v25 = vadd.f32 %v7768_v10, %v3934_v60 }
 0x47e   : > { %v4084_v26 = vadd.f32 %v4083_v39, %v4049_v35  ;;  %v4053_v14 = vadd.f32 %v4052_v41, %v4010_v16  ;;  %v4317_v35 = vpop.f32.mrf.mxu0  ;;  %5344 = vmatmul.f32.gmra.mxu0 %v6452_v32  ;;  %v4187_v39 = vadd.f32 %v7857_v53, %v7852_v9 }
 0x47f   : > { %v4016_v18 = vadd.f32 %v7762_v20, %v3974_v25  ;;  %v4022_v20 = vadd.f32 %v7777_v47, %v3979_v17 }
 0x480   : > { %5795 = vst.msk [vmem:[%s6945_s10 + $0x120] sm:$0xff] %vm1521_vm1, %v4084_v26 }
 0x482   : > { %4779 = vmatmul.f32.gmra.mxu3 %v8323_v56  ;;  %4743 = vmatmul.f32.gmra.mxu2 %v6439_v6 }
 0x483   : > { %v4344_v5 = vpop.f32.mrf.mxu1  ;;  %5371 = vmatmul.f32.gmra.mxu1 %v6404_v21 }
 0x485   : > { %v4087_v19 = vpop.f32.mrf.mxu3  ;;  %v4056_v24 = vpop.f32.mrf.mxu2 }
 0x486   : > { %v4088_v1 = vadd.f32 %v4087_v19, %v4053_v14  ;;  %v4057_v31 = vadd.f32 %v4056_v24, %v4016_v18  ;;  %v7918_v41 = vpop.f32.mrf.mxu0  ;;  %5504 = vmatmul.f32.vlgmr.msrb.gmra.mxu0 %v6397_v23 }
 0x488   : > { %5796 = vst.msk [vmem:[%s6945_s10 + $0x128] sm:$0xff] %vm1521_vm1, %v4088_v1  ;;  %v4195_v1 = vadd.f32 %v7876_v59, %v7869_v58  ;;  %v5456_v58 = vsub.f32 %v7811_v63, %v5455_v38 }
 0x48a   : > { %4785 = vmatmul.f32.gmra.mxu3 %v6450_v7  ;;  %4748 = vmatmul.f32.gmra.mxu2 %v6460_v13 }
 0x48b   : > { %v4348_v42 = vpop.f32.mrf.mxu1  ;;  %5375 = vmatmul.f32.gmra.mxu1 %v6429_v2 }
 0x48d   : > { %v4091_v10 = vpop.f32.mrf.mxu3  ;;  %v4060_v4 = vpop.f32.mrf.mxu2 }
 0x48e   : > { %v4092_v45 = vadd.f32 %v4091_v10, %v4057_v31  ;;  %v4061_v40 = vadd.f32 %v4060_v4, %v4022_v20  ;;  %v7930_v14 = vpop.f32.mrf.mxu0  ;;  %5509 = vmatmul.f32.gmra.mxu0 %v8321_v62  ;;  %v5461_v31 = vand.u32 4294901760, %v7820_v8 }
 0x490   : > { %5797 = vst.msk [vmem:[%s6945_s10 + $0x130] sm:$0xff] %vm1521_vm1, %v4092_v45 }
 0x492   : > { %4791 = vmatmul.f32.gmra.mxu3 %v6468_v15  ;;  %4897 = vmatmul.f32.vlgmr.msra.gmra.mxu2 %v6424_v28 }
 0x493   : > { %5241 = vmatpush.msra.mxu2 %v7666_v48  ;;  %v4352_v48 = vpop.f32.mrf.mxu1  ;;  %5379 = vmatmul.f32.gmra.mxu1 %v6452_v32 }
 0x495   : > { %v4095_v27 = vpop.f32.mrf.mxu3  ;;  %5244 = vmatpush.msra.mxu2 %v7676_v46  ;;  %v4220_v34 = vpop.f32.mrf.mxu2 }
 0x496   : > { %v4096_v51 = vadd.f32 %v4095_v27, %v4061_v40  ;;  %v4221_v47 = vadd.f32 %v4220_v34, %v4183_v57  ;;  %v7943_v18 = vpop.f32.mrf.mxu0  ;;  %5514 = vmatmul.f32.gmra.mxu0 %v6439_v6 }
 0x498   : > { %5798 = vst.msk [vmem:[%s6945_s10 + $0x138] sm:$0xff] %vm1521_vm1, %v4096_v51 }
 0x49a   : > { %4952 = vmatmul.f32.vlgmr.msra.gmra.mxu3 %v6385_v55  ;;  %4905 = vmatmul.f32.gmra.mxu2 %v6447_v49 }
 0x49b   : > { %5281 = vmatpush.msra.mxu3 %v7656_v37  ;;  %v7923_v26 = vpop.f32.mrf.mxu1  ;;  %5544 = vmatmul.f32.vlgmr.msrb.gmra.mxu1 %v6402_v29 }
 0x49d   : > { %5283 = vmatpush.msra.mxu3 %v7660_v30  ;;  %v4260_v46 = vpop.f32.mrf.mxu3  ;;  %v4225_v22 = vpop.f32.mrf.mxu2 }
 0x49e   : > { %v4261_v36 = vadd.f32 %v4260_v46, %v4221_v47  ;;  %v4226_v30 = vadd.f32 %v4225_v22, %v4187_v39  ;;  %v7958_v40 = vpop.f32.mrf.mxu0  ;;  %5519 = vmatmul.f32.gmra.mxu0 %v6460_v13 }
 0x4a0   : > { %v4306_v11 = vadd.f32 %v4305_v3, %v4261_v36  ;;  %v4191_v3 = vadd.f32 %v7865_v43, %v7860_v33 }
 0x4a2   : > { %4956 = vmatmul.f32.gmra.mxu3 %v6404_v21  ;;  %v4341_v37 = vadd.f32 %v4340_v50, %v4306_v11  ;;  %4913 = vmatmul.f32.gmra.mxu2 %v8233_v54 }
 0x4a3   : > { %v7935_v19 = vpop.f32.mrf.mxu1  ;;  %5550 = vmatmul.f32.gmra.mxu1 %v8323_v56 }
 0x4a4   : > { %5799 = vst.msk [vmem:[%s6945_s10 + $0x140] sm:$0xff] %vm1521_vm1, %v4341_v37 }
 0x4a5   : > { %v4266_v60 = vpop.f32.mrf.mxu3  ;;  %v4230_v53 = vpop.f32.mrf.mxu2 }
 0x4a6   : > { %v4267_v9 = vadd.f32 %v4266_v60, %v4226_v30  ;;  %v4231_v25 = vadd.f32 %v4230_v53, %v4191_v3  ;;  %v7968_v57 = vpop.f32.mrf.mxu0 }
 0x4a8   : > { %v4310_v16 = vadd.f32 %v4309_v52, %v4267_v9 }
 0x4aa   : > { %4960 = vmatmul.f32.gmra.mxu3 %v6429_v2  ;;  %v4345_v50 = vadd.f32 %v4344_v5, %v4310_v16  ;;  %4921 = vmatmul.f32.gmra.mxu2 %v6481_v12 }
 0x4ab   : > { %v7949_v10 = vpop.f32.mrf.mxu1  ;;  %5556 = vmatmul.f32.gmra.mxu1 %v6450_v7 }
 0x4ac   : > { %5800 = vst.msk [vmem:[%s6945_s10 + $0x148] sm:$0xff] %vm1521_vm1, %v4345_v50 }
 0x4ad   : > { %v4272_v24 = vpop.f32.mrf.mxu3  ;;  %v4235_v43 = vpop.f32.mrf.mxu2 }
 0x4ae   : > { %v4273_v33 = vadd.f32 %v4272_v24, %v4231_v25  ;;  %v4236_v17 = vadd.f32 %v4235_v43, %v4195_v1  ;;  %v7974_v46 = vpop.f32.mrf.mxu0 }
 0x4b0   : > { %v4314_v52 = vadd.f32 %v4313_v44, %v4273_v33  ;;  %v5462_v44 = vsub.f32 %v7820_v8, %v5461_v31 }
 0x4b2   : > { %4964 = vmatmul.f32.gmra.mxu3 %v6452_v32  ;;  %v4349_v5 = vadd.f32 %v4348_v42, %v4314_v52  ;;  %5075 = vmatmul.f32.vlgmr.msrb.gmra.mxu2 %v6385_v55  ;;  %v5457_v42 = vand.u32 4294901760, %v5456_v58  ;;  %v5463_v63 = vand.u32 4294901760, %v5462_v44 }
 0x4b3   : > { %5403 = vmatpush.msrb.mxu2 %v7796_v61  ;;  %v7963_v51 = vpop.f32.mrf.mxu1  ;;  %5562 = vmatmul.f32.gmra.mxu1 %v6468_v15 }
 0x4b4   : > { %5801 = vst.msk [vmem:[%s6945_s10 + $0x150] sm:$0xff] %vm1521_vm1, %v4349_v5 }
 0x4b5   : > { %v4278_v59 = vpop.f32.mrf.mxu3  ;;  %5405 = vmatpush.msrb.mxu2 %v7800_v0  ;;  %v4384_v45 = vpop.f32.mrf.mxu2 }
 0x4b6   : > { %v4279_v4 = vadd.f32 %v4278_v59, %v4236_v17  ;;  %v7980_v11 = vpop.f32.mrf.mxu0 }
 0x4b8   : > { %v4318_v20 = vadd.f32 %v4317_v35, %v4279_v4 }
 0x4ba   : > { %5110 = vmatmul.f32.vlgmr.msrb.gmra.mxu3 %v6385_v55  ;;  %v4353_v27 = vadd.f32 %v4352_v48, %v4318_v20  ;;  %5079 = vmatmul.f32.gmra.mxu2 %v6404_v21 }
 0x4bb   : > { %5458 = vmatpush.msrb.mxu3 %v5457_v42  ;;  %v7972_v35 = vpop.f32.mrf.mxu1 }
 0x4bc   : > { %5802 = vst.msk [vmem:[%s6945_s10 + $0x158] sm:$0xff] %vm1521_vm1, %v4353_v27  ;;  %v4697_v42 = vadd.f32 %v7972_v35, %v7968_v57 }
 0x4bd   : > { %5464 = vmatpush.msrb.mxu3 %v5463_v63  ;;  %v4439_v8 = vpop.f32.mrf.mxu3  ;;  %v4392_v34 = vpop.f32.mrf.mxu2 }
 0x4be   : > { %v4440_v37 = vadd.f32 %v4439_v8, %v4384_v45  ;;  %v7987_v3 = vpop.f32.mrf.mxu0 }
 0x4c0   : > { %v4478_v9 = vadd.f32 %v7918_v41, %v4440_v37 }
 0x4c2   : > { %5114 = vmatmul.f32.gmra.mxu3 %v6404_v21  ;;  %5083 = vmatmul.f32.gmra.mxu2 %v6429_v2  ;;  %v4518_v50 = vadd.f32 %v7923_v26, %v4478_v9 }
 0x4c3   : > { %v7978_v36 = vpop.f32.mrf.mxu1 }
 0x4c4   : > { %v4701_v8 = vadd.f32 %v7978_v36, %v7974_v46 }
 0x4c5   : > { %v4443_v48 = vpop.f32.mrf.mxu3  ;;  %v4400_v47 = vpop.f32.mrf.mxu2 }
 0x4c6   : > { %v4444_v16 = vadd.f32 %v4443_v48, %v4392_v34 }
 0x4c8   : > { %v4483_v33 = vadd.f32 %v7930_v14, %v4444_v16 }
 0x4ca   : > { %5118 = vmatmul.f32.gmra.mxu3 %v6429_v2  ;;  %5087 = vmatmul.f32.gmra.mxu2 %v6452_v32  ;;  %v4524_v26 = vadd.f32 %v7935_v19, %v4483_v33 }
 0x4cb   : > { %v7984_v30 = vpop.f32.mrf.mxu1 }
 0x4cd   : > { %v4447_v22 = vpop.f32.mrf.mxu3  ;;  %v4408_v39 = vpop.f32.mrf.mxu2 }
 0x4ce   : > { %v4448_v1 = vadd.f32 %v4447_v22, %v4400_v47 }
 0x4d2   : > { %5122 = vmatmul.f32.gmra.mxu3 %v6452_v32  ;;  %5247 = vmatmul.f32.vlgmr.msra.gmra.mxu2 %v6397_v23 }
 0x4d3   : > { %5583 = vmatpush.msra.mxu2 %v5455_v38  ;;  %v7993_v23 = vpop.f32.mrf.mxu1  ;;  %v4488_v38 = vadd.f32 %v7943_v18, %v4448_v1 }
 0x4d4   : > { %v4709_v16 = vadd.f32 %v7993_v23, %v7987_v3 }
 0x4d5   : > { %v4451_v60 = vpop.f32.mrf.mxu3  ;;  %5587 = vmatpush.msra.mxu2 %v5461_v31  ;;  %v4562_v53 = vpop.f32.mrf.mxu2  ;;  %v4530_v17 = vadd.f32 %v7949_v10, %v4488_v38 }
 0x4d6   : > { %v4563_v25 = vadd.f32 %v4562_v53, %v4518_v50  ;;  %v4452_v31 = vadd.f32 %v4451_v60, %v4408_v39  ;;  %v4705_v39 = vadd.f32 %v7984_v30, %v7980_v11 }
 0x4d8   : > { %v4493_v59 = vadd.f32 %v7958_v40, %v4452_v31 }
 0x4da   : > { %5287 = vmatmul.f32.vlgmr.msra.gmra.mxu3 %v6402_v29  ;;  %5252 = vmatmul.f32.gmra.mxu2 %v8321_v62  ;;  %v4819_v29 = vpop.f32.mrf.mxu0  ;;  %v4536_v18 = vadd.f32 %v7963_v51, %v4493_v59 }
 0x4db   : > { %5620 = vmatpush.msra.mxu3 %v7796_v61  ;;  %v4854_v62 = vpop.f32.mrf.mxu1 }
 0x4dd   : > { %5622 = vmatpush.msra.mxu3 %v7800_v0  ;;  %v4597_v24 = vpop.f32.mrf.mxu3  ;;  %v4566_v43 = vpop.f32.mrf.mxu2 }
 0x4de   : > { %v4598_v41 = vadd.f32 %v4597_v24, %v4563_v25  ;;  %v4567_v61 = vadd.f32 %v4566_v43, %v4524_v26 }
 0x4e0   : > { %5803 = vst.msk [vmem:[%s6945_s10 + $0x160] sm:$0xff] %vm1521_vm1, %v4598_v41 }
 0x4e2   : > { %5293 = vmatmul.f32.gmra.mxu3 %v8323_v56  ;;  %5257 = vmatmul.f32.gmra.mxu2 %v6439_v6  ;;  %v4823_v14 = vpop.f32.mrf.mxu0 }
 0x4e3   : > { %v4858_v56 = vpop.f32.mrf.mxu1 }
 0x4e5   : > { %v4601_v52 = vpop.f32.mrf.mxu3  ;;  %v4570_v5 = vpop.f32.mrf.mxu2 }
 0x4e6   : > { %v4602_v0 = vadd.f32 %v4601_v52, %v4567_v61  ;;  %v4571_v6 = vadd.f32 %v4570_v5, %v4530_v17 }
 0x4e8   : > { %5804 = vst.msk [vmem:[%s6945_s10 + $0x168] sm:$0xff] %vm1521_vm1, %v4602_v0 }
 0x4ea   : > { %5299 = vmatmul.f32.gmra.mxu3 %v6450_v7  ;;  %5262 = vmatmul.f32.gmra.mxu2 %v6460_v13  ;;  %v4827_v10 = vpop.f32.mrf.mxu0 }
 0x4eb   : > { %v4862_v13 = vpop.f32.mrf.mxu1 }
 0x4ed   : > { %v4605_v19 = vpop.f32.mrf.mxu3  ;;  %v4574_v4 = vpop.f32.mrf.mxu2 }
 0x4ee   : > { %v4606_v58 = vadd.f32 %v4605_v19, %v4571_v6  ;;  %v4575_v7 = vadd.f32 %v4574_v4, %v4536_v18 }
 0x4f0   : > { %5805 = vst.msk [vmem:[%s6945_s10 + $0x170] sm:$0xff] %vm1521_vm1, %v4606_v58 }
 0x4f2   : > { %5305 = vmatmul.f32.gmra.mxu3 %v6468_v15  ;;  %5411 = vmatmul.f32.vlgmr.msrb.gmra.mxu2 %v6424_v28  ;;  %v4831_v27 = vpop.f32.mrf.mxu0 }
 0x4f3   : > { %v4866_v51 = vpop.f32.mrf.mxu1 }
 0x4f5   : > { %v4609_v45 = vpop.f32.mrf.mxu3  ;;  %v4734_v20 = vpop.f32.mrf.mxu2 }
 0x4f6   : > { %v4610_v44 = vadd.f32 %v4609_v45, %v4575_v7  ;;  %v4735_v40 = vadd.f32 %v4734_v20, %v4697_v42 }
 0x4f8   : > { %5806 = vst.msk [vmem:[%s6945_s10 + $0x178] sm:$0xff] %vm1521_vm1, %v4610_v44 }
 0x4fa   : > { %5466 = vmatmul.f32.vlgmr.msrb.gmra.mxu3 %v6385_v55  ;;  %5419 = vmatmul.f32.gmra.mxu2 %v6447_v49  ;;  %v4991_v22 = vpop.f32.mrf.mxu0 }
 0x4fb   : > { %v5031_v60 = vpop.f32.mrf.mxu1 }
 0x4fd   : > { %v4774_v15 = vpop.f32.mrf.mxu3  ;;  %v4739_v63 = vpop.f32.mrf.mxu2 }
 0x4fe   : > { %v4775_v28 = vadd.f32 %v4774_v15, %v4735_v40  ;;  %v4740_v57 = vadd.f32 %v4739_v63, %v4701_v8 }
 0x500   : > { %v4820_v34 = vadd.f32 %v4819_v29, %v4775_v28 }
 0x502   : > { %5470 = vmatmul.f32.gmra.mxu3 %v6404_v21  ;;  %v4855_v48 = vadd.f32 %v4854_v62, %v4820_v34  ;;  %5427 = vmatmul.f32.gmra.mxu2 %v8233_v54  ;;  %v4996_v11 = vpop.f32.mrf.mxu0 }
 0x503   : > { %v5037_v25 = vpop.f32.mrf.mxu1 }
 0x504   : > { %5807 = vst.msk [vmem:[%s6945_s10 + $0x180] sm:$0xff] %vm1521_vm1, %v4855_v48 }
 0x505   : > { %v4780_v49 = vpop.f32.mrf.mxu3  ;;  %v4744_v47 = vpop.f32.mrf.mxu2 }
 0x506   : > { %v4781_v35 = vadd.f32 %v4780_v49, %v4740_v57  ;;  %v4745_v36 = vadd.f32 %v4744_v47, %v4705_v39 }
 0x508   : > { %v4824_v37 = vadd.f32 %v4823_v14, %v4781_v35 }
 0x50a   : > { %5474 = vmatmul.f32.gmra.mxu3 %v6429_v2  ;;  %v4859_v46 = vadd.f32 %v4858_v56, %v4824_v37  ;;  %5435 = vmatmul.f32.gmra.mxu2 %v6481_v12  ;;  %v5001_v3 = vpop.f32.mrf.mxu0 }
 0x50b   : > { %v5043_v1 = vpop.f32.mrf.mxu1 }
 0x50c   : > { %5808 = vst.msk [vmem:[%s6945_s10 + $0x188] sm:$0xff] %vm1521_vm1, %v4859_v46 }
 0x50d   : > { %v4786_v54 = vpop.f32.mrf.mxu3  ;;  %v4749_v53 = vpop.f32.mrf.mxu2 }
 0x50e   : > { %v4787_v9 = vadd.f32 %v4786_v54, %v4745_v36  ;;  %v4750_v24 = vadd.f32 %v4749_v53, %v4709_v16 }
 0x510   : > { %v4828_v50 = vadd.f32 %v4827_v10, %v4787_v9 }
 0x512   : > { %5478 = vmatmul.f32.gmra.mxu3 %v6452_v32  ;;  %v4863_v30 = vadd.f32 %v4862_v13, %v4828_v50  ;;  %5589 = vmatmul.f32.vlgmr.msra.gmra.mxu2 %v6385_v55  ;;  %v5006_v61 = vpop.f32.mrf.mxu0 }
 0x513   : > { %v5049_v0 = vpop.f32.mrf.mxu1 }
 0x514   : > { %5809 = vst.msk [vmem:[%s6945_s10 + $0x190] sm:$0xff] %vm1521_vm1, %v4863_v30 }
 0x515   : > { %v4792_v12 = vpop.f32.mrf.mxu3  ;;  %v4898_v33 = vpop.f32.mrf.mxu2 }
 0x516   : > { %v4793_v41 = vadd.f32 %v4792_v12, %v4750_v24 }
 0x518   : > { %v4832_v43 = vadd.f32 %v4831_v27, %v4793_v41 }
 0x51a   : > { %5624 = vmatmul.f32.vlgmr.msra.gmra.mxu3 %v6385_v55  ;;  %v4867_v29 = vadd.f32 %v4866_v51, %v4832_v43  ;;  %5593 = vmatmul.f32.gmra.mxu2 %v6404_v21  ;;  %v5155_v5 = vpop.f32.mrf.mxu0 }
 0x51b   : > { %v5210_v14 = vpop.f32.mrf.mxu1 }
 0x51c   : > { %5810 = vst.msk [vmem:[%s6945_s10 + $0x198] sm:$0xff] %vm1521_vm1, %v4867_v29  ;;  %v5211_v36 = vadd.f32 %v5210_v14, %v5155_v5 }
 0x51d   : > { %v4953_v23 = vpop.f32.mrf.mxu3  ;;  %v4906_v26 = vpop.f32.mrf.mxu2 }
 0x51e   : > { %v4954_v31 = vadd.f32 %v4953_v23, %v4898_v33 }
 0x522   : > { %5628 = vmatmul.f32.gmra.mxu3 %v6404_v21  ;;  %5597 = vmatmul.f32.gmra.mxu2 %v6429_v2  ;;  %v4992_v21 = vadd.f32 %v4991_v22, %v4954_v31  ;;  %v5163_v6 = vpop.f32.mrf.mxu0 }
 0x523   : > { %v5214_v59 = vpop.f32.mrf.mxu1 }
 0x524   : > { %v5032_v58 = vadd.f32 %v5031_v60, %v4992_v21 }
 0x525   : > { %v4957_v62 = vpop.f32.mrf.mxu3  ;;  %v4914_v52 = vpop.f32.mrf.mxu2 }
 0x526   : > { %v4958_v19 = vadd.f32 %v4957_v62, %v4906_v26 }
 0x528   : > { %v4997_v10 = vadd.f32 %v4996_v11, %v4958_v19  ;;  %v5215_v11 = vadd.f32 %v5214_v59, %v5163_v6 }
 0x52a   : > { %5632 = vmatmul.f32.gmra.mxu3 %v6429_v2  ;;  %5601 = vmatmul.f32.gmra.mxu2 %v6452_v32  ;;  %v5038_v13 = vadd.f32 %v5037_v25, %v4997_v10  ;;  %v5171_v44 = vpop.f32.mrf.mxu0 }
 0x52b   : > { %v5218_v42 = vpop.f32.mrf.mxu1 }
 0x52d   : > { %v4961_v55 = vpop.f32.mrf.mxu3  ;;  %v4922_v38 = vpop.f32.mrf.mxu2 }
 0x52e   : > { %v4962_v45 = vadd.f32 %v4961_v55, %v4914_v52 }
 0x530   : > { %v5002_v15 = vadd.f32 %v5001_v3, %v4962_v45  ;;  %v5219_v3 = vadd.f32 %v5218_v42, %v5171_v44 }
 0x532   : > { %5636 = vmatmul.f32.gmra.mxu3 %v6452_v32  ;;  %v5044_v63 = vadd.f32 %v5043_v1, %v5002_v15  ;;  %v5179_v34 = vpop.f32.mrf.mxu0 }
 0x533   : > { %v5222_v35 = vpop.f32.mrf.mxu1 }
 0x535   : > { %v4965_v17 = vpop.f32.mrf.mxu3  ;;  %v5076_v56 = vpop.f32.mrf.mxu2 }
 0x536   : > { %v5077_v4 = vadd.f32 %v5076_v56, %v5032_v58  ;;  %v4966_v28 = vadd.f32 %v4965_v17, %v4922_v38  ;;  %v5223_v38 = vadd.f32 %v5222_v35, %v5179_v34 }
 0x538   : > { %v5007_v57 = vadd.f32 %v5006_v61, %v4966_v28 }
 0x53a   : > { %v5050_v47 = vadd.f32 %v5049_v0, %v5007_v57  ;;  %v5333_v46 = vpop.f32.mrf.mxu0 }
 0x53b   : > { %v5368_v54 = vpop.f32.mrf.mxu1 }
 0x53d   : > { %v5111_v2 = vpop.f32.mrf.mxu3  ;;  %v5080_v7 = vpop.f32.mrf.mxu2 }
 0x53e   : > { %v5112_v18 = vadd.f32 %v5111_v2, %v5077_v4  ;;  %v5081_v20 = vadd.f32 %v5080_v7, %v5038_v13 }
 0x540   : > { %5811 = vst.msk [vmem:[%s6945_s10 + $0x1a0] sm:$0xff] %vm1521_vm1, %v5112_v18 }
 0x542   : > { %v5337_v25 = vpop.f32.mrf.mxu0 }
 0x543   : > { %v5372_v12 = vpop.f32.mrf.mxu1 }
 0x545   : > { %v5115_v32 = vpop.f32.mrf.mxu3  ;;  %v5084_v27 = vpop.f32.mrf.mxu2 }
 0x546   : > { %v5116_v40 = vadd.f32 %v5115_v32, %v5081_v20  ;;  %v5085_v51 = vadd.f32 %v5084_v27, %v5044_v63 }
 0x548   : > { %5812 = vst.msk [vmem:[%s6945_s10 + $0x1a8] sm:$0xff] %vm1521_vm1, %v5116_v40 }
 0x54a   : > { %v5341_v26 = vpop.f32.mrf.mxu0 }
 0x54b   : > { %v5376_v52 = vpop.f32.mrf.mxu1 }
 0x54d   : > { %v5119_v8 = vpop.f32.mrf.mxu3  ;;  %v5088_v49 = vpop.f32.mrf.mxu2 }
 0x54e   : > { %v5120_v48 = vadd.f32 %v5119_v8, %v5085_v51  ;;  %v5089_v22 = vadd.f32 %v5088_v49, %v5050_v47 }
 0x550   : > { %5813 = vst.msk [vmem:[%s6945_s10 + $0x1b0] sm:$0xff] %vm1521_vm1, %v5120_v48 }
 0x552   : > { %v5345_v21 = vpop.f32.mrf.mxu0 }
 0x553   : > { %v5380_v19 = vpop.f32.mrf.mxu1 }
 0x555   : > { %v5123_v39 = vpop.f32.mrf.mxu3  ;;  %v5248_v60 = vpop.f32.mrf.mxu2 }
 0x556   : > { %v5124_v37 = vadd.f32 %v5123_v39, %v5089_v22  ;;  %v5249_v9 = vadd.f32 %v5248_v60, %v5211_v36 }
 0x558   : > { %5814 = vst.msk [vmem:[%s6945_s10 + $0x1b8] sm:$0xff] %vm1521_vm1, %v5124_v37 }
 0x55a   : > { %v5505_v45 = vpop.f32.mrf.mxu0 }
 0x55b   : > { %v5545_v44 = vpop.f32.mrf.mxu1 }
 0x55d   : > { %v5288_v53 = vpop.f32.mrf.mxu3  ;;  %v5253_v50 = vpop.f32.mrf.mxu2 }
 0x55e   : > { %v5289_v16 = vadd.f32 %v5288_v53, %v5249_v9  ;;  %v5254_v41 = vadd.f32 %v5253_v50, %v5215_v11 }
 0x560   : > { %v5334_v30 = vadd.f32 %v5333_v46, %v5289_v16 }
 0x562   : > { %v5369_v24 = vadd.f32 %v5368_v54, %v5334_v30  ;;  %v5510_v15 = vpop.f32.mrf.mxu0 }
 0x563   : > { %v5551_v63 = vpop.f32.mrf.mxu1 }
 0x564   : > { %5815 = vst.msk [vmem:[%s6945_s10 + $0x1c0] sm:$0xff] %vm1521_vm1, %v5369_v24 }
 0x565   : > { %v5294_v33 = vpop.f32.mrf.mxu3  ;;  %v5258_v29 = vpop.f32.mrf.mxu2 }
 0x566   : > { %v5295_v43 = vadd.f32 %v5294_v33, %v5254_v41  ;;  %v5259_v62 = vadd.f32 %v5258_v29, %v5219_v3 }
 0x568   : > { %v5338_v23 = vadd.f32 %v5337_v25, %v5295_v43 }
 0x56a   : > { %v5373_v1 = vadd.f32 %v5372_v12, %v5338_v23  ;;  %v5515_v49 = vpop.f32.mrf.mxu0 }
 0x56b   : > { %v5557_v37 = vpop.f32.mrf.mxu1 }
 0x56c   : > { %5816 = vst.msk [vmem:[%s6945_s10 + $0x1c8] sm:$0xff] %vm1521_vm1, %v5373_v1 }
 0x56d   : > { %v5300_v61 = vpop.f32.mrf.mxu3  ;;  %v5263_v55 = vpop.f32.mrf.mxu2 }
 0x56e   : > { %v5301_v0 = vadd.f32 %v5300_v61, %v5259_v62  ;;  %v5264_v31 = vadd.f32 %v5263_v55, %v5223_v38 }
 0x570   : > { %v5342_v5 = vadd.f32 %v5341_v26, %v5301_v0 }
 0x572   : > { %v5377_v14 = vadd.f32 %v5376_v52, %v5342_v5  ;;  %v5520_v53 = vpop.f32.mrf.mxu0 }
 0x573   : > { %v5563_v25 = vpop.f32.mrf.mxu1 }
 0x574   : > { %5817 = vst.msk [vmem:[%s6945_s10 + $0x1d0] sm:$0xff] %vm1521_vm1, %v5377_v14 }
 0x575   : > { %v5306_v17 = vpop.f32.mrf.mxu3  ;;  %v5412_v6 = vpop.f32.mrf.mxu2 }
 0x576   : > { %v5307_v56 = vadd.f32 %v5306_v17, %v5264_v31 }
 0x578   : > { %v5346_v58 = vadd.f32 %v5345_v21, %v5307_v56 }
 0x57a   : > { %v5381_v59 = vadd.f32 %v5380_v19, %v5346_v58 }
 0x57c   : > { %5818 = vst.msk [vmem:[%s6945_s10 + $0x1d8] sm:$0xff] %vm1521_vm1, %v5381_v59 }
 0x57d   : > { %v5467_v4 = vpop.f32.mrf.mxu3  ;;  %v5420_v2 = vpop.f32.mrf.mxu2 }
 0x57e   : > { %v5468_v20 = vadd.f32 %v5467_v4, %v5412_v6 }
 0x580   : > { %v5506_v42 = vadd.f32 %v5505_v45, %v5468_v20 }
 0x582   : > { %v5546_v28 = vadd.f32 %v5545_v44, %v5506_v42 }
 0x585   : > { %v5471_v18 = vpop.f32.mrf.mxu3  ;;  %v5428_v10 = vpop.f32.mrf.mxu2 }
 0x586   : > { %v5472_v27 = vadd.f32 %v5471_v18, %v5420_v2 }
 0x588   : > { %v5511_v48 = vadd.f32 %v5510_v15, %v5472_v27 }
 0x58a   : > { %v5552_v47 = vadd.f32 %v5551_v63, %v5511_v48 }
 0x58d   : > { %v5475_v7 = vpop.f32.mrf.mxu3  ;;  %v5436_v13 = vpop.f32.mrf.mxu2 }
 0x58e   : > { %v5476_v35 = vadd.f32 %v5475_v7, %v5428_v10 }
 0x590   : > { %v5516_v46 = vadd.f32 %v5515_v49, %v5476_v35 }
 0x592   : > { %v5558_v9 = vadd.f32 %v5557_v37, %v5516_v46 }
 0x595   : > { %v5479_v32 = vpop.f32.mrf.mxu3  ;;  %v5590_v40 = vpop.f32.mrf.mxu2 }
 0x596   : > { %v5591_v51 = vadd.f32 %v5590_v40, %v5546_v28  ;;  %v5480_v54 = vadd.f32 %v5479_v32, %v5436_v13 }
 0x598   : > { %v5521_v30 = vadd.f32 %v5520_v53, %v5480_v54 }
 0x59a   : > { %v5564_v12 = vadd.f32 %v5563_v25, %v5521_v30 }
 0x59d   : > { %v5625_v8 = vpop.f32.mrf.mxu3  ;;  %v5594_v57 = vpop.f32.mrf.mxu2 }
 0x59e   : > { %v5626_v34 = vadd.f32 %v5625_v8, %v5591_v51  ;;  %v5595_v22 = vadd.f32 %v5594_v57, %v5552_v47 }
 0x5a0   : > { %5819 = vst.msk [vmem:[%s6945_s10 + $0x1e0] sm:$0xff] %vm1521_vm1, %v5626_v34 }
 0x5a5   : > { %v5629_v39 = vpop.f32.mrf.mxu3  ;;  %v5598_v36 = vpop.f32.mrf.mxu2 }
 0x5a6   : > { %v5630_v60 = vadd.f32 %v5629_v39, %v5595_v22  ;;  %v5599_v16 = vadd.f32 %v5598_v36, %v5558_v9 }
 0x5a8   : > { %5820 = vst.msk [vmem:[%s6945_s10 + $0x1e8] sm:$0xff] %vm1521_vm1, %v5630_v60 }
 0x5ad   : > { %v5633_v50 = vpop.f32.mrf.mxu3  ;;  %v5602_v24 = vpop.f32.mrf.mxu2 }
 0x5ae   : > { %v5634_v11 = vadd.f32 %v5633_v50, %v5599_v16  ;;  %v5603_v41 = vadd.f32 %v5602_v24, %v5564_v12 }
 0x5b0   : > { %5821 = vst.msk [vmem:[%s6945_s10 + $0x1f0] sm:$0xff] %vm1521_vm1, %v5634_v11 }
 0x5b5   : > { %v5637_v33 = vpop.f32.mrf.mxu3 }
 0x5b6   : > { %v5638_v43 = vadd.f32 %v5637_v33, %v5603_v41 }
 0x5b8   : > { %5822 = vst.msk [vmem:[%s6945_s10 + $0x1f8] sm:$0xff] %vm1521_vm1, %v5638_v43 }
 0x5b9 PF: > { %s14_s14 = sadd.s32 1, %s5918_s14   ;;  %s8390_s12 = smov %s5914_s13 }
 0x5ba   : > { %p11_p8 = scmp.ge.s32.totalorder %s14_s14, 8   ;;  %s8391_s13 = smov %s8393_s16 }
 0x5bc   :  { %13 = sbr.rel (!%p11_p8) target bundleno = 2 (0x2), region = 85 }
 0x5c1   :  { %5677 = vsyncpa [#allocation3], 1 }
 0x5c2   :  { %5679 = vsyncpa [#allocation3 + $0x1], 1 }

</bundles_post_ra>
